<compile_context>
chip_gen: v7x
topology: tpu7x:2x2x1
jax: 0.10.0
libtpu: 0.0.40
codegen_flags: <defaults>
</compile_context>

<pallas_src>
import functools
import math

import jax
import jax.numpy as jnp
from jax.experimental import pallas as pl
from jax.experimental.pallas import tpu as pltpu

_LANES = 128
_W1_OFF, _W2_OFF, _W3_OFF, _W4_OFF = 0, 128, 256, 384
_FC1_OFF, _FC2_OFF = 512, 640
_WSLAB_ROWS = 768


# ---------------------------------------------------------------------------
# Fused forward kernel
# ---------------------------------------------------------------------------
def _dyn_fused_kernel(x_ref, w_ref, b_ref, *rest, cin, apply_dropout):
    if apply_dropout:
        drop_ref, o_ref = rest
    else:
        (o_ref,) = rest

    P, bn, _ = x_ref.shape            # (256, bn, cin), bit-rev-Morton pixel major
    m = P * bn
    a = x_ref[...].reshape(m, cin)    # bf16; layout-preserving flatten

    # 4 x [1x1 conv (MXU) -> 2x2 max-pool -> bias + ReLU].
    # Row ordering guarantees each pool window is 4 equal contiguous row
    # blocks, so pooling is 3 VPU maxes of aligned slices (no relayout).
    w_offsets = (_W1_OFF, _W2_OFF, _W3_OFF, _W4_OFF)
    w_rows = (cin, _LANES, _LANES, _LANES)
    for s in range(4):
        w = w_ref[w_offsets[s]:w_offsets[s] + w_rows[s], :]        # static slice
        y = jnp.dot(a, w, preferred_element_type=jnp.float32)      # (m, 128) f32
        q = m // 4
        pooled = jnp.maximum(jnp.maximum(y[0:q], y[q:2 * q]),
                             jnp.maximum(y[2 * q:3 * q], y[3 * q:4 * q]))
        a = jnp.maximum(pooled + b_ref[s:s + 1, :], 0.0).astype(jnp.bfloat16)
        m = q

    # a: (bn, 128) bf16 -- flattened 1x1 feature map (real channels in low lanes).
    h = jnp.dot(a, w_ref[_FC1_OFF:_FC1_OFF + _LANES, :],
                preferred_element_type=jnp.float32) + b_ref[4:5, :]
    h = jnp.maximum(h, 0.0)
    if apply_dropout:
        h = h * drop_ref[...]                 # pre-scaled keep mask (1/keep_prob)

    logits = jnp.dot(h.astype(jnp.bfloat16), w_ref[_FC2_OFF:_FC2_OFF + _LANES, :],
                     preferred_element_type=jnp.float32) + b_ref[5:6, :]
    # log_softmax over the lane-dense class axis; padded lanes carry -1e9 bias.
    mx = jnp.max(logits, axis=1, keepdims=True)
    z = logits - mx
    lse = jnp.log(jnp.sum(jnp.exp(z), axis=1, keepdims=True))
    o_ref[...] = z - lse


# ---------------------------------------------------------------------------
# Parameter init (matches PyTorch Conv2d/Linear default init) and packing
# ---------------------------------------------------------------------------
def init_params(key, cfg):
    cin = cfg['channels_in']
    hin, win = cfg['shape_in']
    f0 = cfg['initial_filters']
    nfc1 = cfg['num_fc1']
    ncls = cfg['num_classes']

    dims = [cin, f0, 2 * f0, 4 * f0, 8 * f0]
    convs = []
    for i in range(4):
        key, k1, k2 = jax.random.split(key, 3)
        bound = 1.0 / math.sqrt(dims[i])
        w = jax.random.uniform(k1, (dims[i], dims[i + 1]), jnp.float32, -bound, bound)
        b = jax.random.uniform(k2, (dims[i + 1],), jnp.float32, -bound, bound)
        convs.append((w, b))

    h, w_ = hin, win
    for _ in range(4):
        h, w_ = h // 2, w_ // 2
    num_flatten = h * w_ * 8 * f0

    key, k1, k2, k3, k4 = jax.random.split(key, 5)
    b1 = 1.0 / math.sqrt(num_flatten)
    fc1_w = jax.random.uniform(k1, (num_flatten, nfc1), jnp.float32, -b1, b1)
    fc1_b = jax.random.uniform(k2, (nfc1,), jnp.float32, -b1, b1)
    b2 = 1.0 / math.sqrt(nfc1)
    fc2_w = jax.random.uniform(k3, (nfc1, ncls), jnp.float32, -b2, b2)
    fc2_b = jax.random.uniform(k4, (ncls,), jnp.float32, -b2, b2)

    return {'convs': convs, 'fc1': (fc1_w, fc1_b), 'fc2': (fc2_w, fc2_b),
            'num_flatten': num_flatten}


def pack_params(params):
    """Pack all weights/biases into one bf16 weight slab + one f32 bias slab."""
    convs = params['convs']
    fc1_w, fc1_b = params['fc1']
    fc2_w, fc2_b = params['fc2']

    assert params['num_flatten'] <= _LANES
    assert fc1_w.shape[1] <= _LANES and fc2_w.shape[1] <= _LANES
    assert all(w.shape[0] <= _LANES and w.shape[1] <= _LANES for w, _ in convs)

    wslab = jnp.zeros((_WSLAB_ROWS, _LANES), jnp.float32)
    bslab = jnp.zeros((8, _LANES), jnp.float32)

    offs = (_W1_OFF, _W2_OFF, _W3_OFF, _W4_OFF)
    for s, (w, b) in enumerate(convs):
        r, c = w.shape
        wslab = wslab.at[offs[s]:offs[s] + r, :c].set(w)
        bslab = bslab.at[s, :c].set(b)

    r, c = fc1_w.shape
    wslab = wslab.at[_FC1_OFF:_FC1_OFF + r, :c].set(fc1_w)
    bslab = bslab.at[4, :c].set(fc1_b)

    r, c = fc2_w.shape
    wslab = wslab.at[_FC2_OFF:_FC2_OFF + r, :c].set(fc2_w)
    bslab = bslab.at[5, :c].set(fc2_b)
    bslab = bslab.at[5, c:].set(-1e9)      # padded class lanes ignored by softmax

    return wslab.astype(jnp.bfloat16), bslab


# ---------------------------------------------------------------------------
# Forward wrapper
# ---------------------------------------------------------------------------
def dyn_model_forward(x_nchw, wslab, bslab, dropout_key=None, *,
                      cin, num_classes, dropout_rate, train=True):
    N, Cin, H, W = x_nchw.shape
    assert Cin == cin
    # TODO(synk): spatial sizes other than 16x16 (i.e. not reducing to 1x1
    # after 4 pools) would need a channel-major flatten before fc1.
    assert (H, W) == (16, 16), "fused kernel assumes 16x16 inputs"

    # bn: multiple of 16 (bf16 sublane tile) -> layout-preserving in-kernel
    # flatten; small enough that the lane-padded narrow-channel intermediates
    # stay well under the default VMEM scoped limit on v5e/v6e/v7x.
    bn = 16
    n_blocks = max(2, pl.cdiv(N, bn))     # >=2 parallel steps (v7x dual TC)
    n_pad = n_blocks * bn

    # NCHW -> (P, N_pad, Cin) with pixels in bit-reversed-Morton order
    # (flat pixel index = h0 w0 h1 w1 h2 w2 h3 w3) and batch fastest-varying.
    # Pure reshape/transpose -- no gather.
    x = x_nchw.reshape(N, Cin, 2, 2, 2, 2, 2, 2, 2, 2)
    #                  0  1   h3 h2 h1 h0 w3 w2 w1 w0
    x = jnp.transpose(x, (5, 9, 4, 8, 3, 7, 2, 6, 0, 1))
    x = x.reshape(H * W, N, Cin)
    if n_pad > N:
        x = jnp.pad(x, ((0, 0), (0, n_pad - N), (0, 0)))
    x = x.astype(jnp.bfloat16)

    keep_prob = 1.0 - float(dropout_rate)
    apply_dropout = bool(train) and keep_prob < 1.0

    in_specs = [
        pl.BlockSpec((H * W, bn, Cin), lambda i: (0, i, 0)),
        pl.BlockSpec((_WSLAB_ROWS, _LANES), lambda i: (0, 0)),
        pl.BlockSpec((8, _LANES), lambda i: (0, 0)),
    ]
    args = [x, wslab, bslab]
    if apply_dropout:
        if dropout_key is None:
            dropout_key = jax.random.PRNGKey(0)
        keep = jax.random.bernoulli(dropout_key, keep_prob, (n_pad, _LANES))
        args.append(keep.astype(jnp.float32) * (1.0 / keep_prob))
        in_specs.append(pl.BlockSpec((bn, _LANES), lambda i: (i, 0)))

    kern = functools.partial(_dyn_fused_kernel, cin=Cin,
                             apply_dropout=apply_dropout)
    out_padded = pl.pallas_call(
        kern,
        out_shape=jax.ShapeDtypeStruct((n_pad, _LANES), jnp.float32),
        grid=(n_blocks,),
        in_specs=in_specs,
        out_specs=pl.BlockSpec((bn, _LANES), lambda i: (i, 0)),
        compiler_params=pltpu.CompilerParams(
            dimension_semantics=("parallel",)),
    )(*args)

    return out_padded[:N, :num_classes]


# ---------------------------------------------------------------------------
if __name__ == "__main__":
    model_cfg = {
        'channels_in': 4,
        'shape_in': (16, 16),
        'initial_filters': 8,
        'num_fc1': 32,
        'num_classes': 10,
        'dropout_rate': 0.25,
    }

    key = jax.random.PRNGKey(0)
    kx, kp, kd = jax.random.split(key, 3)
    x = jax.random.normal(kx, (2, model_cfg['channels_in'],
                               *model_cfg['shape_in']), jnp.float32)
    params = init_params(kp, model_cfg)
    wslab, bslab = pack_params(params)

    forward = jax.jit(functools.partial(
        dyn_model_forward,
        cin=model_cfg['channels_in'],
        num_classes=model_cfg['num_classes'],
        dropout_rate=model_cfg['dropout_rate'],
        train=True))

    out = forward(x, wslab, bslab, kd)
    out = jax.block_until_ready(out)

    assert out.shape == (2, model_cfg['num_classes']), out.shape
    assert bool(jnp.all(jnp.isfinite(out)))
    # rows of log_softmax should exponentiate-sum to ~1
    assert bool(jnp.allclose(jnp.sum(jnp.exp(out), axis=1), 1.0, atol=1e-4))
    print("KERNEL_OK")
</pallas_src>

<mosaic_0001>
module attributes {stable_mosaic.version = 11 : i64} {
  func.func @_dyn_fused_kernel(%arg0: i32, %arg1: memref<256x16x4xbf16, #tpu.memory_space<vmem>>, %arg2: memref<768x128xbf16, #tpu.memory_space<vmem>>, %arg3: memref<8x128xf32, #tpu.memory_space<vmem>>, %arg4: memref<16x128xf32, #tpu.memory_space<vmem>>, %arg5: memref<16x128xf32, #tpu.memory_space<vmem>>) attributes {dimension_semantics = [#tpu.dimension_semantics<parallel>], iteration_bounds = array<i64: 2>, scalar_prefetch = 0 : i64, scratch_operands = 0 : i64, tpu.core_type = #tpu.core_type<tc>, window_params = [{transform_indices = @transform_0, window_bounds = array<i64: 256, 16, 4>}, {pipeline_mode = #tpu.pipeline_mode<synchronous>, transform_indices = @transform_1, window_bounds = array<i64: 768, 128>}, {pipeline_mode = #tpu.pipeline_mode<synchronous>, transform_indices = @transform_2, window_bounds = array<i64: 8, 128>}, {transform_indices = @transform_3, window_bounds = array<i64: 16, 128>}, {transform_indices = @transform_4, window_bounds = array<i64: 16, 128>}]} {
    %c0 = arith.constant 0 : index
    %c0_0 = arith.constant 0 : index
    %c0_1 = arith.constant 0 : index
    %0 = vector.load %arg1[%c0, %c0_0, %c0_1] : memref<256x16x4xbf16, #tpu.memory_space<vmem>>, vector<256x16x4xbf16>
    %1 = vector.shape_cast %0 : vector<256x16x4xbf16> to vector<4096x4xbf16>
    %c0_2 = arith.constant 0 : index
    %c0_3 = arith.constant 0 : index
    %2 = vector.load %arg2[%c0_2, %c0_3] : memref<768x128xbf16, #tpu.memory_space<vmem>>, vector<4x128xbf16>
    %cst = arith.constant dense<0.000000e+00> : vector<4096x128xf32>
    %3 = tpu.matmul %1, %2, %cst {dimension_numbers = #tpu.dot_dimension_numbers<[1], [0], [0], [1], [0, 0, 1, 1], [], []>} : vector<4096x4xbf16>, vector<4x128xbf16>, vector<4096x128xf32> -> vector<4096x128xf32>
    %4 = vector.extract_strided_slice %3 {offsets = [0, 0], sizes = [1024, 128], strides = [1, 1]} : vector<4096x128xf32> to vector<1024x128xf32>
    %5 = vector.extract_strided_slice %3 {offsets = [1024, 0], sizes = [1024, 128], strides = [1, 1]} : vector<4096x128xf32> to vector<1024x128xf32>
    %6 = arith.maximumf %4, %5 : vector<1024x128xf32>
    %7 = vector.extract_strided_slice %3 {offsets = [2048, 0], sizes = [1024, 128], strides = [1, 1]} : vector<4096x128xf32> to vector<1024x128xf32>
    %8 = vector.extract_strided_slice %3 {offsets = [3072, 0], sizes = [1024, 128], strides = [1, 1]} : vector<4096x128xf32> to vector<1024x128xf32>
    %9 = arith.maximumf %7, %8 : vector<1024x128xf32>
    %10 = arith.maximumf %6, %9 : vector<1024x128xf32>
    %c0_4 = arith.constant 0 : index
    %c0_5 = arith.constant 0 : index
    %11 = vector.load %arg3[%c0_4, %c0_5] : memref<8x128xf32, #tpu.memory_space<vmem>>, vector<1x128xf32>
    %12 = vector.broadcast %11 : vector<1x128xf32> to vector<1024x128xf32>
    %13 = arith.addf %10, %12 : vector<1024x128xf32>
    %cst_6 = arith.constant 0.000000e+00 : f32
    %14 = vector.broadcast %cst_6 : f32 to vector<1024x128xf32>
    %15 = arith.maximumf %13, %14 : vector<1024x128xf32>
    %16 = arith.truncf %15 : vector<1024x128xf32> to vector<1024x128xbf16>
    %c128 = arith.constant 128 : index
    %c0_7 = arith.constant 0 : index
    %17 = vector.load %arg2[%c128, %c0_7] : memref<768x128xbf16, #tpu.memory_space<vmem>>, vector<128x128xbf16>
    %cst_8 = arith.constant dense<0.000000e+00> : vector<1024x128xf32>
    %18 = tpu.matmul %16, %17, %cst_8 {dimension_numbers = #tpu.dot_dimension_numbers<[1], [0], [0], [1], [0, 0, 1, 1], [], []>} : vector<1024x128xbf16>, vector<128x128xbf16>, vector<1024x128xf32> -> vector<1024x128xf32>
    %19 = vector.extract_strided_slice %18 {offsets = [0, 0], sizes = [256, 128], strides = [1, 1]} : vector<1024x128xf32> to vector<256x128xf32>
    %20 = vector.extract_strided_slice %18 {offsets = [256, 0], sizes = [256, 128], strides = [1, 1]} : vector<1024x128xf32> to vector<256x128xf32>
    %21 = arith.maximumf %19, %20 : vector<256x128xf32>
    %22 = vector.extract_strided_slice %18 {offsets = [512, 0], sizes = [256, 128], strides = [1, 1]} : vector<1024x128xf32> to vector<256x128xf32>
    %23 = vector.extract_strided_slice %18 {offsets = [768, 0], sizes = [256, 128], strides = [1, 1]} : vector<1024x128xf32> to vector<256x128xf32>
    %24 = arith.maximumf %22, %23 : vector<256x128xf32>
    %25 = arith.maximumf %21, %24 : vector<256x128xf32>
    %c1 = arith.constant 1 : index
    %c0_9 = arith.constant 0 : index
    %26 = vector.load %arg3[%c1, %c0_9] : memref<8x128xf32, #tpu.memory_space<vmem>>, vector<1x128xf32>
    %27 = vector.broadcast %26 : vector<1x128xf32> to vector<256x128xf32>
    %28 = arith.addf %25, %27 : vector<256x128xf32>
    %cst_10 = arith.constant 0.000000e+00 : f32
    %29 = vector.broadcast %cst_10 : f32 to vector<256x128xf32>
    %30 = arith.maximumf %28, %29 : vector<256x128xf32>
    %31 = arith.truncf %30 : vector<256x128xf32> to vector<256x128xbf16>
    %c256 = arith.constant 256 : index
    %c0_11 = arith.constant 0 : index
    %32 = vector.load %arg2[%c256, %c0_11] : memref<768x128xbf16, #tpu.memory_space<vmem>>, vector<128x128xbf16>
    %cst_12 = arith.constant dense<0.000000e+00> : vector<256x128xf32>
    %33 = tpu.matmul %31, %32, %cst_12 {dimension_numbers = #tpu.dot_dimension_numbers<[1], [0], [0], [1], [0, 0, 1, 1], [], []>} : vector<256x128xbf16>, vector<128x128xbf16>, vector<256x128xf32> -> vector<256x128xf32>
    %34 = vector.extract_strided_slice %33 {offsets = [0, 0], sizes = [64, 128], strides = [1, 1]} : vector<256x128xf32> to vector<64x128xf32>
    %35 = vector.extract_strided_slice %33 {offsets = [64, 0], sizes = [64, 128], strides = [1, 1]} : vector<256x128xf32> to vector<64x128xf32>
    %36 = arith.maximumf %34, %35 : vector<64x128xf32>
    %37 = vector.extract_strided_slice %33 {offsets = [128, 0], sizes = [64, 128], strides = [1, 1]} : vector<256x128xf32> to vector<64x128xf32>
    %38 = vector.extract_strided_slice %33 {offsets = [192, 0], sizes = [64, 128], strides = [1, 1]} : vector<256x128xf32> to vector<64x128xf32>
    %39 = arith.maximumf %37, %38 : vector<64x128xf32>
    %40 = arith.maximumf %36, %39 : vector<64x128xf32>
    %c2 = arith.constant 2 : index
    %c0_13 = arith.constant 0 : index
    %41 = vector.load %arg3[%c2, %c0_13] : memref<8x128xf32, #tpu.memory_space<vmem>>, vector<1x128xf32>
    %42 = vector.broadcast %41 : vector<1x128xf32> to vector<64x128xf32>
    %43 = arith.addf %40, %42 : vector<64x128xf32>
    %cst_14 = arith.constant 0.000000e+00 : f32
    %44 = vector.broadcast %cst_14 : f32 to vector<64x128xf32>
    %45 = arith.maximumf %43, %44 : vector<64x128xf32>
    %46 = arith.truncf %45 : vector<64x128xf32> to vector<64x128xbf16>
    %c384 = arith.constant 384 : index
    %c0_15 = arith.constant 0 : index
    %47 = vector.load %arg2[%c384, %c0_15] : memref<768x128xbf16, #tpu.memory_space<vmem>>, vector<128x128xbf16>
    %cst_16 = arith.constant dense<0.000000e+00> : vector<64x128xf32>
    %48 = tpu.matmul %46, %47, %cst_16 {dimension_numbers = #tpu.dot_dimension_numbers<[1], [0], [0], [1], [0, 0, 1, 1], [], []>} : vector<64x128xbf16>, vector<128x128xbf16>, vector<64x128xf32> -> vector<64x128xf32>
    %49 = vector.extract_strided_slice %48 {offsets = [0, 0], sizes = [16, 128], strides = [1, 1]} : vector<64x128xf32> to vector<16x128xf32>
    %50 = vector.extract_strided_slice %48 {offsets = [16, 0], sizes = [16, 128], strides = [1, 1]} : vector<64x128xf32> to vector<16x128xf32>
    %51 = arith.maximumf %49, %50 : vector<16x128xf32>
    %52 = vector.extract_strided_slice %48 {offsets = [32, 0], sizes = [16, 128], strides = [1, 1]} : vector<64x128xf32> to vector<16x128xf32>
    %53 = vector.extract_strided_slice %48 {offsets = [48, 0], sizes = [16, 128], strides = [1, 1]} : vector<64x128xf32> to vector<16x128xf32>
    %54 = arith.maximumf %52, %53 : vector<16x128xf32>
    %55 = arith.maximumf %51, %54 : vector<16x128xf32>
    %c3 = arith.constant 3 : index
    %c0_17 = arith.constant 0 : index
    %56 = vector.load %arg3[%c3, %c0_17] : memref<8x128xf32, #tpu.memory_space<vmem>>, vector<1x128xf32>
    %57 = vector.broadcast %56 : vector<1x128xf32> to vector<16x128xf32>
    %58 = arith.addf %55, %57 : vector<16x128xf32>
    %cst_18 = arith.constant 0.000000e+00 : f32
    %59 = vector.broadcast %cst_18 : f32 to vector<16x128xf32>
    %60 = arith.maximumf %58, %59 : vector<16x128xf32>
    %61 = arith.truncf %60 : vector<16x128xf32> to vector<16x128xbf16>
    %c512 = arith.constant 512 : index
    %c0_19 = arith.constant 0 : index
    %62 = vector.load %arg2[%c512, %c0_19] : memref<768x128xbf16, #tpu.memory_space<vmem>>, vector<128x128xbf16>
    %cst_20 = arith.constant dense<0.000000e+00> : vector<16x128xf32>
    %63 = tpu.matmul %61, %62, %cst_20 {dimension_numbers = #tpu.dot_dimension_numbers<[1], [0], [0], [1], [0, 0, 1, 1], [], []>} : vector<16x128xbf16>, vector<128x128xbf16>, vector<16x128xf32> -> vector<16x128xf32>
    %c4 = arith.constant 4 : index
    %c0_21 = arith.constant 0 : index
    %64 = vector.load %arg3[%c4, %c0_21] : memref<8x128xf32, #tpu.memory_space<vmem>>, vector<1x128xf32>
    %65 = vector.broadcast %64 : vector<1x128xf32> to vector<16x128xf32>
    %66 = arith.addf %63, %65 : vector<16x128xf32>
    %cst_22 = arith.constant 0.000000e+00 : f32
    %67 = vector.broadcast %cst_22 : f32 to vector<16x128xf32>
    %68 = arith.maximumf %66, %67 : vector<16x128xf32>
    %c0_23 = arith.constant 0 : index
    %c0_24 = arith.constant 0 : index
    %69 = vector.load %arg4[%c0_23, %c0_24] : memref<16x128xf32, #tpu.memory_space<vmem>>, vector<16x128xf32>
    %70 = arith.mulf %68, %69 : vector<16x128xf32>
    %71 = arith.truncf %70 : vector<16x128xf32> to vector<16x128xbf16>
    %c640 = arith.constant 640 : index
    %c0_25 = arith.constant 0 : index
    %72 = vector.load %arg2[%c640, %c0_25] : memref<768x128xbf16, #tpu.memory_space<vmem>>, vector<128x128xbf16>
    %cst_26 = arith.constant dense<0.000000e+00> : vector<16x128xf32>
    %73 = tpu.matmul %71, %72, %cst_26 {dimension_numbers = #tpu.dot_dimension_numbers<[1], [0], [0], [1], [0, 0, 1, 1], [], []>} : vector<16x128xbf16>, vector<128x128xbf16>, vector<16x128xf32> -> vector<16x128xf32>
    %c5 = arith.constant 5 : index
    %c0_27 = arith.constant 0 : index
    %74 = vector.load %arg3[%c5, %c0_27] : memref<8x128xf32, #tpu.memory_space<vmem>>, vector<1x128xf32>
    %75 = vector.broadcast %74 : vector<1x128xf32> to vector<16x128xf32>
    %76 = arith.addf %73, %75 : vector<16x128xf32>
    %cst_28 = arith.constant dense<0xFF800000> : vector<16xf32>
    %77 = vector.multi_reduction <maximumf>, %76, %cst_28 [1] : vector<16x128xf32> to vector<16xf32>
    %78 = vector.shape_cast %77 : vector<16xf32> to vector<16x1xf32>
    %79 = vector.broadcast %78 : vector<16x1xf32> to vector<16x128xf32>
    %80 = arith.subf %76, %79 : vector<16x128xf32>
    %81 = math.exp %80 : vector<16x128xf32>
    %cst_29 = arith.constant dense<0.000000e+00> : vector<16xf32>
    %82 = vector.multi_reduction <add>, %81, %cst_29 [1] : vector<16x128xf32> to vector<16xf32>
    %83 = vector.shape_cast %82 : vector<16xf32> to vector<16x1xf32>
    %84 = math.log %83 : vector<16x1xf32>
    %85 = vector.broadcast %84 : vector<16x1xf32> to vector<16x128xf32>
    %86 = arith.subf %80, %85 : vector<16x128xf32>
    %c0_30 = arith.constant 0 : index
    %c0_31 = arith.constant 0 : index
    %87 = vector.load %arg5[%c0_30, %c0_31] : memref<16x128xf32, #tpu.memory_space<vmem>>, vector<16x128xf32>
    tpu.vector_store %arg5[%c0_30, %c0_31], %86 {strides = array<i32>} : memref<16x128xf32, #tpu.memory_space<vmem>>, vector<16x128xf32>,
    return
  }
  func.func @transform_0(%arg0: i32) -> (i32, i32, i32) {
    %c0_i32 = arith.constant 0 : i32
    %c0_i32_0 = arith.constant 0 : i32
    %c0_i32_1 = arith.constant 0 : i32
    return %c0_i32, %arg0, %c0_i32_0 : i32, i32, i32
  }
  func.func @transform_1(%arg0: i32) -> (i32, i32) {
    %c0_i32 = arith.constant 0 : i32
    %c0_i32_0 = arith.constant 0 : i32
    %c0_i32_1 = arith.constant 0 : i32
    return %c0_i32, %c0_i32_0 : i32, i32
  }
  func.func @transform_2(%arg0: i32) -> (i32, i32) {
    %c0_i32 = arith.constant 0 : i32
    %c0_i32_0 = arith.constant 0 : i32
    %c0_i32_1 = arith.constant 0 : i32
    return %c0_i32, %c0_i32_0 : i32, i32
  }
  func.func @transform_3(%arg0: i32) -> (i32, i32) {
    %c0_i32 = arith.constant 0 : i32
    %c0_i32_0 = arith.constant 0 : i32
    return %arg0, %c0_i32 : i32, i32
  }
  func.func @transform_4(%arg0: i32) -> (i32, i32) {
    %c0_i32 = arith.constant 0 : i32
    %c0_i32_0 = arith.constant 0 : i32
    return %arg0, %c0_i32 : i32, i32
  }
}

</mosaic_0001>

<bundles_post_ra>
// kernel: dyn_model_forward.1
= control target key start
LH: loop header
LB: loop body
LE: loop exit
PB: predicated region body
PF: predicated region fallthrough
CT: control target
= control target key end

     0   :  { %s13396_s15 = smov 0   ;;  %s13398_s16 = smov 0   ;;  %s16763_s0 = inlined_call_operand.vmem [shape: bf16[256,32,4], index: 0, kind: input, shape index: {}]   ;;  %s16764_s1 = inlined_call_operand.vmem [shape: bf16[768,128], index: 1, kind: input, shape index: {}]   ;;  %s16765_s2 = inlined_call_operand.vmem [shape: f32[8,128], index: 2, kind: input, shape index: {}]   ;;  %s16766_s3 = inlined_call_operand.vmem [shape: f32[32,128], index: 3, kind: input, shape index: {}]   ;;  %s16767_s4 = inlined_call_operand.vmem [shape: f32[32,128], index: 4, kind: output, shape index: {}]  }
   0x1   :  { %s13400_s17 = smov 0  }
   0x2 LB: > { %s11283_s18 = sadd.s32 4294967295, %s13367_s17   ;;  %s13413_s19 = sadd.s32 1, %s13367_s17   ;;  %s13367_s17 = sphi %s13400_s17, %s18032_s17   ;;  %s13363_s16 = sphi %s13398_s16, %s18031_s16   ;;  %s13359_s15 = sphi %s13396_s15, %s18030_s15  }
   0x3   : > { %s18_s20 = ssub.s32 %s13367_s17, %s13413_s19  ;;  %s21_s21 = sadd.s32 1, %s13363_s16 }
   0x4   : > { %p19_p0 = scmp.eq.s32.totalorder %s18_s20, 0  ;;  %p28_p1 = scmp.ne.s32.totalorder %s13363_s16, %s13359_s15 }
   0x5   : > { %p29_p2 = scmp.eq.s32.totalorder %s13367_s17, 0  ;;  %p11286_p4 = scmp.ge.s32.totalorder %s13367_s17, 2 }
   0x6   : > { %s13422_s22 = scalar_select %p19_p0, %s13363_s16, %s21_s21  }
   0x7   : > { %p30_p3 = por %p29_p2, %p28_p1  ;;  %154 = sbr.rel (%p11286_p4) target bundleno = 146 (0x92), region = 24 }
   0xe   : > { %157 = sbr.rel (!%p30_p3) target bundleno = 146 (0x92), region = 28  ;;  %s159_s23 = sand.u32 (%p30_p3), 1, %s13363_s16  }
   0xf   : > { %s11856_s24 = sshll.u32 (%p30_p3), %s13367_s17, 3  ;;  %s11287_s25 = sshll.u32 (%p30_p3), %s159_s23, 11 }
  0x10   : > { %s13430_s28 = scalar_lea.vmem (%p30_p3), %s16763_s0, %s11856_s24  ;;  %s13435_s29 = scalar_lea.vmem (%p30_p3), [#allocation2], %s11287_s25 }
  0x11   : > { %v180_v0 = vld [vmem:[%s13430_s28] sm:$0xff] (%p30_p3)   ;;  %v184_v1 = vld [vmem:[%s13430_s28 + $0x10] sm:$0xff] (%p30_p3)  }
  0x12   : > { %v188_v2 = vld [vmem:[%s13430_s28 + $0x20] sm:$0xff] (%p30_p3)   ;;  %181 = vst [vmem:[%s13435_s29] sm:$0xff] (%p30_p3), %v180_v0   ;;  %185 = vst [vmem:[%s13435_s29 + $0x8] sm:$0xff] (%p30_p3), %v184_v1   ;;  %v192_v3 = vld [vmem:[%s13430_s28 + $0x30] sm:$0xff] (%p30_p3)  }
  0x13   : > { %189 = vst [vmem:[%s13435_s29 + $0x10] sm:$0xff] (%p30_p3), %v188_v2   ;;  %v196_v4 = vld [vmem:[%s13430_s28 + $0x40] sm:$0xff] (%p30_p3)   ;;  %v200_v5 = vld [vmem:[%s13430_s28 + $0x50] sm:$0xff] (%p30_p3)   ;;  %193 = vst [vmem:[%s13435_s29 + $0x18] sm:$0xff] (%p30_p3), %v192_v3  }
  0x14   : > { %197 = vst [vmem:[%s13435_s29 + $0x20] sm:$0xff] (%p30_p3), %v196_v4   ;;  %201 = vst [vmem:[%s13435_s29 + $0x28] sm:$0xff] (%p30_p3), %v200_v5   ;;  %v204_v6 = vld [vmem:[%s13430_s28 + $0x60] sm:$0xff] (%p30_p3)   ;;  %v208_v7 = vld [vmem:[%s13430_s28 + $0x70] sm:$0xff] (%p30_p3)  }
  0x15   : > { %v212_v8 = vld [vmem:[%s13430_s28 + $0x80] sm:$0xff]   ;;  %205 = vst [vmem:[%s13435_s29 + $0x30] sm:$0xff] %v204_v6   ;;  %209 = vst [vmem:[%s13435_s29 + $0x38] sm:$0xff] %v208_v7   ;;  %v216_v9 = vld [vmem:[%s13430_s28 + $0x90] sm:$0xff]  }
  0x16   : > { %213 = vst [vmem:[%s13435_s29 + $0x40] sm:$0xff] %v212_v8   ;;  %v220_v10 = vld [vmem:[%s13430_s28 + $0xa0] sm:$0xff]   ;;  %v224_v11 = vld [vmem:[%s13430_s28 + $0xb0] sm:$0xff]   ;;  %217 = vst [vmem:[%s13435_s29 + $0x48] sm:$0xff] %v216_v9  }
  0x17   : > { %221 = vst [vmem:[%s13435_s29 + $0x50] sm:$0xff] %v220_v10   ;;  %225 = vst [vmem:[%s13435_s29 + $0x58] sm:$0xff] %v224_v11   ;;  %v228_v12 = vld [vmem:[%s13430_s28 + $0xc0] sm:$0xff]   ;;  %v232_v13 = vld [vmem:[%s13430_s28 + $0xd0] sm:$0xff]  }
  0x18   : > { %v236_v14 = vld [vmem:[%s13430_s28 + $0xe0] sm:$0xff]   ;;  %229 = vst [vmem:[%s13435_s29 + $0x60] sm:$0xff] %v228_v12   ;;  %233 = vst [vmem:[%s13435_s29 + $0x68] sm:$0xff] %v232_v13   ;;  %v240_v15 = vld [vmem:[%s13430_s28 + $0xf0] sm:$0xff]  }
  0x19   : > { %237 = vst [vmem:[%s13435_s29 + $0x70] sm:$0xff] %v236_v14   ;;  %v244_v16 = vld [vmem:[%s13430_s28 + $0x100] sm:$0xff]   ;;  %v248_v17 = vld [vmem:[%s13430_s28 + $0x110] sm:$0xff]   ;;  %241 = vst [vmem:[%s13435_s29 + $0x78] sm:$0xff] %v240_v15  }
  0x1a   : > { %245 = vst [vmem:[%s13435_s29 + $0x80] sm:$0xff] %v244_v16   ;;  %249 = vst [vmem:[%s13435_s29 + $0x88] sm:$0xff] %v248_v17   ;;  %v252_v18 = vld [vmem:[%s13430_s28 + $0x120] sm:$0xff]   ;;  %v256_v19 = vld [vmem:[%s13430_s28 + $0x130] sm:$0xff]  }
  0x1b   : > { %v260_v20 = vld [vmem:[%s13430_s28 + $0x140] sm:$0xff]   ;;  %253 = vst [vmem:[%s13435_s29 + $0x90] sm:$0xff] %v252_v18   ;;  %257 = vst [vmem:[%s13435_s29 + $0x98] sm:$0xff] %v256_v19   ;;  %v264_v21 = vld [vmem:[%s13430_s28 + $0x150] sm:$0xff]  }
  0x1c   : > { %261 = vst [vmem:[%s13435_s29 + $0xa0] sm:$0xff] %v260_v20   ;;  %v268_v22 = vld [vmem:[%s13430_s28 + $0x160] sm:$0xff]   ;;  %v272_v23 = vld [vmem:[%s13430_s28 + $0x170] sm:$0xff]   ;;  %265 = vst [vmem:[%s13435_s29 + $0xa8] sm:$0xff] %v264_v21  }
  0x1d   : > { %269 = vst [vmem:[%s13435_s29 + $0xb0] sm:$0xff] %v268_v22   ;;  %273 = vst [vmem:[%s13435_s29 + $0xb8] sm:$0xff] %v272_v23   ;;  %v276_v24 = vld [vmem:[%s13430_s28 + $0x180] sm:$0xff]   ;;  %v280_v25 = vld [vmem:[%s13430_s28 + $0x190] sm:$0xff]  }
  0x1e   : > { %v284_v26 = vld [vmem:[%s13430_s28 + $0x1a0] sm:$0xff]   ;;  %277 = vst [vmem:[%s13435_s29 + $0xc0] sm:$0xff] %v276_v24   ;;  %281 = vst [vmem:[%s13435_s29 + $0xc8] sm:$0xff] %v280_v25   ;;  %v288_v27 = vld [vmem:[%s13430_s28 + $0x1b0] sm:$0xff]  }
  0x1f   : > { %285 = vst [vmem:[%s13435_s29 + $0xd0] sm:$0xff] %v284_v26   ;;  %v292_v28 = vld [vmem:[%s13430_s28 + $0x1c0] sm:$0xff]   ;;  %v296_v29 = vld [vmem:[%s13430_s28 + $0x1d0] sm:$0xff]   ;;  %289 = vst [vmem:[%s13435_s29 + $0xd8] sm:$0xff] %v288_v27  }
  0x20   : > { %293 = vst [vmem:[%s13435_s29 + $0xe0] sm:$0xff] %v292_v28   ;;  %297 = vst [vmem:[%s13435_s29 + $0xe8] sm:$0xff] %v296_v29   ;;  %v300_v30 = vld [vmem:[%s13430_s28 + $0x1e0] sm:$0xff]   ;;  %v304_v31 = vld [vmem:[%s13430_s28 + $0x1f0] sm:$0xff]  }
  0x21   : > { %v308_v32 = vld [vmem:[%s13430_s28 + $0x200] sm:$0xff]   ;;  %301 = vst [vmem:[%s13435_s29 + $0xf0] sm:$0xff] %v300_v30   ;;  %305 = vst [vmem:[%s13435_s29 + $0xf8] sm:$0xff] %v304_v31   ;;  %v312_v33 = vld [vmem:[%s13430_s28 + $0x210] sm:$0xff]  }
  0x22   : > { %309 = vst [vmem:[%s13435_s29 + $0x100] sm:$0xff] %v308_v32   ;;  %v316_v34 = vld [vmem:[%s13430_s28 + $0x220] sm:$0xff]   ;;  %v320_v35 = vld [vmem:[%s13430_s28 + $0x230] sm:$0xff]   ;;  %313 = vst [vmem:[%s13435_s29 + $0x108] sm:$0xff] %v312_v33  }
  0x23   : > { %317 = vst [vmem:[%s13435_s29 + $0x110] sm:$0xff] %v316_v34   ;;  %321 = vst [vmem:[%s13435_s29 + $0x118] sm:$0xff] %v320_v35   ;;  %v324_v36 = vld [vmem:[%s13430_s28 + $0x240] sm:$0xff]   ;;  %v328_v37 = vld [vmem:[%s13430_s28 + $0x250] sm:$0xff]  }
  0x24   : > { %v332_v38 = vld [vmem:[%s13430_s28 + $0x260] sm:$0xff]   ;;  %325 = vst [vmem:[%s13435_s29 + $0x120] sm:$0xff] %v324_v36   ;;  %329 = vst [vmem:[%s13435_s29 + $0x128] sm:$0xff] %v328_v37   ;;  %v336_v39 = vld [vmem:[%s13430_s28 + $0x270] sm:$0xff]  }
  0x25   : > { %333 = vst [vmem:[%s13435_s29 + $0x130] sm:$0xff] %v332_v38   ;;  %v340_v40 = vld [vmem:[%s13430_s28 + $0x280] sm:$0xff]   ;;  %v344_v41 = vld [vmem:[%s13430_s28 + $0x290] sm:$0xff]   ;;  %337 = vst [vmem:[%s13435_s29 + $0x138] sm:$0xff] %v336_v39  }
  0x26   : > { %341 = vst [vmem:[%s13435_s29 + $0x140] sm:$0xff] %v340_v40   ;;  %345 = vst [vmem:[%s13435_s29 + $0x148] sm:$0xff] %v344_v41   ;;  %v348_v42 = vld [vmem:[%s13430_s28 + $0x2a0] sm:$0xff]   ;;  %v352_v43 = vld [vmem:[%s13430_s28 + $0x2b0] sm:$0xff]  }
  0x27   : > { %v356_v44 = vld [vmem:[%s13430_s28 + $0x2c0] sm:$0xff]   ;;  %349 = vst [vmem:[%s13435_s29 + $0x150] sm:$0xff] %v348_v42   ;;  %353 = vst [vmem:[%s13435_s29 + $0x158] sm:$0xff] %v352_v43   ;;  %v360_v45 = vld [vmem:[%s13430_s28 + $0x2d0] sm:$0xff]  }
  0x28   : > { %357 = vst [vmem:[%s13435_s29 + $0x160] sm:$0xff] %v356_v44   ;;  %v364_v46 = vld [vmem:[%s13430_s28 + $0x2e0] sm:$0xff]   ;;  %v368_v47 = vld [vmem:[%s13430_s28 + $0x2f0] sm:$0xff]   ;;  %361 = vst [vmem:[%s13435_s29 + $0x168] sm:$0xff] %v360_v45  }
  0x29   : > { %365 = vst [vmem:[%s13435_s29 + $0x170] sm:$0xff] %v364_v46   ;;  %369 = vst [vmem:[%s13435_s29 + $0x178] sm:$0xff] %v368_v47   ;;  %v372_v48 = vld [vmem:[%s13430_s28 + $0x300] sm:$0xff]   ;;  %v376_v49 = vld [vmem:[%s13430_s28 + $0x310] sm:$0xff]  }
  0x2a   : > { %v380_v50 = vld [vmem:[%s13430_s28 + $0x320] sm:$0xff]   ;;  %373 = vst [vmem:[%s13435_s29 + $0x180] sm:$0xff] %v372_v48   ;;  %377 = vst [vmem:[%s13435_s29 + $0x188] sm:$0xff] %v376_v49   ;;  %v384_v51 = vld [vmem:[%s13430_s28 + $0x330] sm:$0xff]  }
  0x2b   : > { %381 = vst [vmem:[%s13435_s29 + $0x190] sm:$0xff] %v380_v50   ;;  %v388_v52 = vld [vmem:[%s13430_s28 + $0x340] sm:$0xff]   ;;  %v392_v53 = vld [vmem:[%s13430_s28 + $0x350] sm:$0xff]   ;;  %385 = vst [vmem:[%s13435_s29 + $0x198] sm:$0xff] %v384_v51  }
  0x2c   : > { %389 = vst [vmem:[%s13435_s29 + $0x1a0] sm:$0xff] %v388_v52   ;;  %393 = vst [vmem:[%s13435_s29 + $0x1a8] sm:$0xff] %v392_v53   ;;  %v396_v54 = vld [vmem:[%s13430_s28 + $0x360] sm:$0xff]   ;;  %v400_v55 = vld [vmem:[%s13430_s28 + $0x370] sm:$0xff]  }
  0x2d   : > { %v404_v56 = vld [vmem:[%s13430_s28 + $0x380] sm:$0xff]   ;;  %397 = vst [vmem:[%s13435_s29 + $0x1b0] sm:$0xff] %v396_v54   ;;  %401 = vst [vmem:[%s13435_s29 + $0x1b8] sm:$0xff] %v400_v55   ;;  %v408_v57 = vld [vmem:[%s13430_s28 + $0x390] sm:$0xff]  }
  0x2e   : > { %405 = vst [vmem:[%s13435_s29 + $0x1c0] sm:$0xff] %v404_v56   ;;  %v412_v58 = vld [vmem:[%s13430_s28 + $0x3a0] sm:$0xff]   ;;  %v416_v59 = vld [vmem:[%s13430_s28 + $0x3b0] sm:$0xff]   ;;  %409 = vst [vmem:[%s13435_s29 + $0x1c8] sm:$0xff] %v408_v57  }
  0x2f   : > { %413 = vst [vmem:[%s13435_s29 + $0x1d0] sm:$0xff] %v412_v58   ;;  %417 = vst [vmem:[%s13435_s29 + $0x1d8] sm:$0xff] %v416_v59   ;;  %v420_v60 = vld [vmem:[%s13430_s28 + $0x3c0] sm:$0xff]   ;;  %v424_v61 = vld [vmem:[%s13430_s28 + $0x3d0] sm:$0xff]  }
  0x30   : > { %v428_v62 = vld [vmem:[%s13430_s28 + $0x3e0] sm:$0xff]   ;;  %421 = vst [vmem:[%s13435_s29 + $0x1e0] sm:$0xff] %v420_v60   ;;  %425 = vst [vmem:[%s13435_s29 + $0x1e8] sm:$0xff] %v424_v61   ;;  %v432_v63 = vld [vmem:[%s13430_s28 + $0x3f0] sm:$0xff]  }
  0x31   : > { %429 = vst [vmem:[%s13435_s29 + $0x1f0] sm:$0xff] %v428_v62   ;;  %v436_v0 = vld [vmem:[%s13430_s28 + $0x400] sm:$0xff]   ;;  %v440_v1 = vld [vmem:[%s13430_s28 + $0x410] sm:$0xff]   ;;  %433 = vst [vmem:[%s13435_s29 + $0x1f8] sm:$0xff] %v432_v63  }
  0x32   : > { %437 = vst [vmem:[%s13435_s29 + $0x200] sm:$0xff] %v436_v0   ;;  %441 = vst [vmem:[%s13435_s29 + $0x208] sm:$0xff] %v440_v1   ;;  %v444_v2 = vld [vmem:[%s13430_s28 + $0x420] sm:$0xff]   ;;  %v448_v3 = vld [vmem:[%s13430_s28 + $0x430] sm:$0xff]  }
  0x33   : > { %v452_v4 = vld [vmem:[%s13430_s28 + $0x440] sm:$0xff]   ;;  %445 = vst [vmem:[%s13435_s29 + $0x210] sm:$0xff] %v444_v2   ;;  %449 = vst [vmem:[%s13435_s29 + $0x218] sm:$0xff] %v448_v3   ;;  %v456_v5 = vld [vmem:[%s13430_s28 + $0x450] sm:$0xff]  }
  0x34   : > { %453 = vst [vmem:[%s13435_s29 + $0x220] sm:$0xff] %v452_v4   ;;  %v460_v6 = vld [vmem:[%s13430_s28 + $0x460] sm:$0xff]   ;;  %v464_v7 = vld [vmem:[%s13430_s28 + $0x470] sm:$0xff]   ;;  %457 = vst [vmem:[%s13435_s29 + $0x228] sm:$0xff] %v456_v5  }
  0x35   : > { %461 = vst [vmem:[%s13435_s29 + $0x230] sm:$0xff] %v460_v6   ;;  %465 = vst [vmem:[%s13435_s29 + $0x238] sm:$0xff] %v464_v7   ;;  %v468_v8 = vld [vmem:[%s13430_s28 + $0x480] sm:$0xff]   ;;  %v472_v9 = vld [vmem:[%s13430_s28 + $0x490] sm:$0xff]  }
  0x36   : > { %v476_v10 = vld [vmem:[%s13430_s28 + $0x4a0] sm:$0xff]   ;;  %469 = vst [vmem:[%s13435_s29 + $0x240] sm:$0xff] %v468_v8   ;;  %473 = vst [vmem:[%s13435_s29 + $0x248] sm:$0xff] %v472_v9   ;;  %v480_v11 = vld [vmem:[%s13430_s28 + $0x4b0] sm:$0xff]  }
  0x37   : > { %477 = vst [vmem:[%s13435_s29 + $0x250] sm:$0xff] %v476_v10   ;;  %v484_v12 = vld [vmem:[%s13430_s28 + $0x4c0] sm:$0xff]   ;;  %v488_v13 = vld [vmem:[%s13430_s28 + $0x4d0] sm:$0xff]   ;;  %481 = vst [vmem:[%s13435_s29 + $0x258] sm:$0xff] %v480_v11  }
  0x38   : > { %485 = vst [vmem:[%s13435_s29 + $0x260] sm:$0xff] %v484_v12   ;;  %489 = vst [vmem:[%s13435_s29 + $0x268] sm:$0xff] %v488_v13   ;;  %v492_v14 = vld [vmem:[%s13430_s28 + $0x4e0] sm:$0xff]   ;;  %v496_v15 = vld [vmem:[%s13430_s28 + $0x4f0] sm:$0xff]  }
  0x39   : > { %v500_v16 = vld [vmem:[%s13430_s28 + $0x500] sm:$0xff]   ;;  %493 = vst [vmem:[%s13435_s29 + $0x270] sm:$0xff] %v492_v14   ;;  %497 = vst [vmem:[%s13435_s29 + $0x278] sm:$0xff] %v496_v15   ;;  %v504_v17 = vld [vmem:[%s13430_s28 + $0x510] sm:$0xff]  }
  0x3a   : > { %501 = vst [vmem:[%s13435_s29 + $0x280] sm:$0xff] %v500_v16   ;;  %v508_v18 = vld [vmem:[%s13430_s28 + $0x520] sm:$0xff]   ;;  %v512_v19 = vld [vmem:[%s13430_s28 + $0x530] sm:$0xff]   ;;  %505 = vst [vmem:[%s13435_s29 + $0x288] sm:$0xff] %v504_v17  }
  0x3b   : > { %509 = vst [vmem:[%s13435_s29 + $0x290] sm:$0xff] %v508_v18   ;;  %513 = vst [vmem:[%s13435_s29 + $0x298] sm:$0xff] %v512_v19   ;;  %v516_v20 = vld [vmem:[%s13430_s28 + $0x540] sm:$0xff]   ;;  %v520_v21 = vld [vmem:[%s13430_s28 + $0x550] sm:$0xff]  }
  0x3c   : > { %v524_v22 = vld [vmem:[%s13430_s28 + $0x560] sm:$0xff]   ;;  %517 = vst [vmem:[%s13435_s29 + $0x2a0] sm:$0xff] %v516_v20   ;;  %521 = vst [vmem:[%s13435_s29 + $0x2a8] sm:$0xff] %v520_v21   ;;  %v528_v23 = vld [vmem:[%s13430_s28 + $0x570] sm:$0xff]  }
  0x3d   : > { %525 = vst [vmem:[%s13435_s29 + $0x2b0] sm:$0xff] %v524_v22   ;;  %v532_v24 = vld [vmem:[%s13430_s28 + $0x580] sm:$0xff]   ;;  %v536_v25 = vld [vmem:[%s13430_s28 + $0x590] sm:$0xff]   ;;  %529 = vst [vmem:[%s13435_s29 + $0x2b8] sm:$0xff] %v528_v23  }
  0x3e   : > { %533 = vst [vmem:[%s13435_s29 + $0x2c0] sm:$0xff] %v532_v24   ;;  %537 = vst [vmem:[%s13435_s29 + $0x2c8] sm:$0xff] %v536_v25   ;;  %v540_v26 = vld [vmem:[%s13430_s28 + $0x5a0] sm:$0xff]   ;;  %v544_v27 = vld [vmem:[%s13430_s28 + $0x5b0] sm:$0xff]  }
  0x3f   : > { %v548_v28 = vld [vmem:[%s13430_s28 + $0x5c0] sm:$0xff]   ;;  %541 = vst [vmem:[%s13435_s29 + $0x2d0] sm:$0xff] %v540_v26   ;;  %545 = vst [vmem:[%s13435_s29 + $0x2d8] sm:$0xff] %v544_v27   ;;  %v552_v29 = vld [vmem:[%s13430_s28 + $0x5d0] sm:$0xff]  }
  0x40   : > { %549 = vst [vmem:[%s13435_s29 + $0x2e0] sm:$0xff] %v548_v28   ;;  %v556_v30 = vld [vmem:[%s13430_s28 + $0x5e0] sm:$0xff]   ;;  %v560_v31 = vld [vmem:[%s13430_s28 + $0x5f0] sm:$0xff]   ;;  %553 = vst [vmem:[%s13435_s29 + $0x2e8] sm:$0xff] %v552_v29  }
  0x41   : > { %557 = vst [vmem:[%s13435_s29 + $0x2f0] sm:$0xff] %v556_v30   ;;  %561 = vst [vmem:[%s13435_s29 + $0x2f8] sm:$0xff] %v560_v31   ;;  %v564_v32 = vld [vmem:[%s13430_s28 + $0x600] sm:$0xff]   ;;  %v568_v33 = vld [vmem:[%s13430_s28 + $0x610] sm:$0xff]  }
  0x42   : > { %v572_v34 = vld [vmem:[%s13430_s28 + $0x620] sm:$0xff]   ;;  %565 = vst [vmem:[%s13435_s29 + $0x300] sm:$0xff] %v564_v32   ;;  %569 = vst [vmem:[%s13435_s29 + $0x308] sm:$0xff] %v568_v33   ;;  %v576_v35 = vld [vmem:[%s13430_s28 + $0x630] sm:$0xff]  }
  0x43   : > { %573 = vst [vmem:[%s13435_s29 + $0x310] sm:$0xff] %v572_v34   ;;  %v580_v36 = vld [vmem:[%s13430_s28 + $0x640] sm:$0xff]   ;;  %v584_v37 = vld [vmem:[%s13430_s28 + $0x650] sm:$0xff]   ;;  %577 = vst [vmem:[%s13435_s29 + $0x318] sm:$0xff] %v576_v35  }
  0x44   : > { %581 = vst [vmem:[%s13435_s29 + $0x320] sm:$0xff] %v580_v36   ;;  %585 = vst [vmem:[%s13435_s29 + $0x328] sm:$0xff] %v584_v37   ;;  %v588_v38 = vld [vmem:[%s13430_s28 + $0x660] sm:$0xff]   ;;  %v592_v39 = vld [vmem:[%s13430_s28 + $0x670] sm:$0xff]  }
  0x45   : > { %v596_v40 = vld [vmem:[%s13430_s28 + $0x680] sm:$0xff]   ;;  %589 = vst [vmem:[%s13435_s29 + $0x330] sm:$0xff] %v588_v38   ;;  %593 = vst [vmem:[%s13435_s29 + $0x338] sm:$0xff] %v592_v39   ;;  %v600_v41 = vld [vmem:[%s13430_s28 + $0x690] sm:$0xff]  }
  0x46   : > { %597 = vst [vmem:[%s13435_s29 + $0x340] sm:$0xff] %v596_v40   ;;  %v604_v42 = vld [vmem:[%s13430_s28 + $0x6a0] sm:$0xff]   ;;  %v608_v43 = vld [vmem:[%s13430_s28 + $0x6b0] sm:$0xff]   ;;  %601 = vst [vmem:[%s13435_s29 + $0x348] sm:$0xff] %v600_v41  }
  0x47   : > { %605 = vst [vmem:[%s13435_s29 + $0x350] sm:$0xff] %v604_v42   ;;  %609 = vst [vmem:[%s13435_s29 + $0x358] sm:$0xff] %v608_v43   ;;  %v612_v44 = vld [vmem:[%s13430_s28 + $0x6c0] sm:$0xff]   ;;  %v616_v45 = vld [vmem:[%s13430_s28 + $0x6d0] sm:$0xff]  }
  0x48   : > { %v620_v46 = vld [vmem:[%s13430_s28 + $0x6e0] sm:$0xff]   ;;  %613 = vst [vmem:[%s13435_s29 + $0x360] sm:$0xff] %v612_v44   ;;  %617 = vst [vmem:[%s13435_s29 + $0x368] sm:$0xff] %v616_v45   ;;  %v624_v47 = vld [vmem:[%s13430_s28 + $0x6f0] sm:$0xff]  }
  0x49   : > { %621 = vst [vmem:[%s13435_s29 + $0x370] sm:$0xff] %v620_v46   ;;  %v628_v48 = vld [vmem:[%s13430_s28 + $0x700] sm:$0xff]   ;;  %v632_v49 = vld [vmem:[%s13430_s28 + $0x710] sm:$0xff]   ;;  %625 = vst [vmem:[%s13435_s29 + $0x378] sm:$0xff] %v624_v47  }
  0x4a   : > { %629 = vst [vmem:[%s13435_s29 + $0x380] sm:$0xff] %v628_v48   ;;  %633 = vst [vmem:[%s13435_s29 + $0x388] sm:$0xff] %v632_v49   ;;  %v636_v50 = vld [vmem:[%s13430_s28 + $0x720] sm:$0xff]   ;;  %v640_v51 = vld [vmem:[%s13430_s28 + $0x730] sm:$0xff]  }
  0x4b   : > { %v644_v52 = vld [vmem:[%s13430_s28 + $0x740] sm:$0xff]   ;;  %637 = vst [vmem:[%s13435_s29 + $0x390] sm:$0xff] %v636_v50   ;;  %641 = vst [vmem:[%s13435_s29 + $0x398] sm:$0xff] %v640_v51   ;;  %v648_v53 = vld [vmem:[%s13430_s28 + $0x750] sm:$0xff]  }
  0x4c   : > { %645 = vst [vmem:[%s13435_s29 + $0x3a0] sm:$0xff] %v644_v52   ;;  %v652_v54 = vld [vmem:[%s13430_s28 + $0x760] sm:$0xff]   ;;  %v656_v55 = vld [vmem:[%s13430_s28 + $0x770] sm:$0xff]   ;;  %649 = vst [vmem:[%s13435_s29 + $0x3a8] sm:$0xff] %v648_v53  }
  0x4d   : > { %653 = vst [vmem:[%s13435_s29 + $0x3b0] sm:$0xff] %v652_v54   ;;  %657 = vst [vmem:[%s13435_s29 + $0x3b8] sm:$0xff] %v656_v55   ;;  %v660_v56 = vld [vmem:[%s13430_s28 + $0x780] sm:$0xff]   ;;  %v664_v57 = vld [vmem:[%s13430_s28 + $0x790] sm:$0xff]  }
  0x4e   : > { %v668_v58 = vld [vmem:[%s13430_s28 + $0x7a0] sm:$0xff]   ;;  %661 = vst [vmem:[%s13435_s29 + $0x3c0] sm:$0xff] %v660_v56   ;;  %665 = vst [vmem:[%s13435_s29 + $0x3c8] sm:$0xff] %v664_v57   ;;  %v672_v59 = vld [vmem:[%s13430_s28 + $0x7b0] sm:$0xff]  }
  0x4f   : > { %669 = vst [vmem:[%s13435_s29 + $0x3d0] sm:$0xff] %v668_v58   ;;  %v676_v60 = vld [vmem:[%s13430_s28 + $0x7c0] sm:$0xff]   ;;  %v680_v61 = vld [vmem:[%s13430_s28 + $0x7d0] sm:$0xff]   ;;  %673 = vst [vmem:[%s13435_s29 + $0x3d8] sm:$0xff] %v672_v59  }
  0x50   : > { %677 = vst [vmem:[%s13435_s29 + $0x3e0] sm:$0xff] %v676_v60   ;;  %681 = vst [vmem:[%s13435_s29 + $0x3e8] sm:$0xff] %v680_v61   ;;  %v684_v62 = vld [vmem:[%s13430_s28 + $0x7e0] sm:$0xff]   ;;  %v688_v63 = vld [vmem:[%s13430_s28 + $0x7f0] sm:$0xff]  }
  0x51   : > { %v692_v0 = vld [vmem:[%s13430_s28 + $0x800] sm:$0xff]   ;;  %685 = vst [vmem:[%s13435_s29 + $0x3f0] sm:$0xff] %v684_v62   ;;  %689 = vst [vmem:[%s13435_s29 + $0x3f8] sm:$0xff] %v688_v63   ;;  %v696_v1 = vld [vmem:[%s13430_s28 + $0x810] sm:$0xff]  }
  0x52   : > { %693 = vst [vmem:[%s13435_s29 + $0x400] sm:$0xff] %v692_v0   ;;  %v700_v2 = vld [vmem:[%s13430_s28 + $0x820] sm:$0xff]   ;;  %v704_v3 = vld [vmem:[%s13430_s28 + $0x830] sm:$0xff]   ;;  %697 = vst [vmem:[%s13435_s29 + $0x408] sm:$0xff] %v696_v1  }
  0x53   : > { %701 = vst [vmem:[%s13435_s29 + $0x410] sm:$0xff] %v700_v2   ;;  %705 = vst [vmem:[%s13435_s29 + $0x418] sm:$0xff] %v704_v3   ;;  %v708_v4 = vld [vmem:[%s13430_s28 + $0x840] sm:$0xff]   ;;  %v712_v5 = vld [vmem:[%s13430_s28 + $0x850] sm:$0xff]  }
  0x54   : > { %v716_v6 = vld [vmem:[%s13430_s28 + $0x860] sm:$0xff]   ;;  %709 = vst [vmem:[%s13435_s29 + $0x420] sm:$0xff] %v708_v4   ;;  %713 = vst [vmem:[%s13435_s29 + $0x428] sm:$0xff] %v712_v5   ;;  %v720_v7 = vld [vmem:[%s13430_s28 + $0x870] sm:$0xff]  }
  0x55   : > { %717 = vst [vmem:[%s13435_s29 + $0x430] sm:$0xff] %v716_v6   ;;  %v724_v8 = vld [vmem:[%s13430_s28 + $0x880] sm:$0xff]   ;;  %v728_v9 = vld [vmem:[%s13430_s28 + $0x890] sm:$0xff]   ;;  %721 = vst [vmem:[%s13435_s29 + $0x438] sm:$0xff] %v720_v7  }
  0x56   : > { %725 = vst [vmem:[%s13435_s29 + $0x440] sm:$0xff] %v724_v8   ;;  %729 = vst [vmem:[%s13435_s29 + $0x448] sm:$0xff] %v728_v9   ;;  %v732_v10 = vld [vmem:[%s13430_s28 + $0x8a0] sm:$0xff]   ;;  %v736_v11 = vld [vmem:[%s13430_s28 + $0x8b0] sm:$0xff]  }
  0x57   : > { %v740_v12 = vld [vmem:[%s13430_s28 + $0x8c0] sm:$0xff]   ;;  %733 = vst [vmem:[%s13435_s29 + $0x450] sm:$0xff] %v732_v10   ;;  %737 = vst [vmem:[%s13435_s29 + $0x458] sm:$0xff] %v736_v11   ;;  %v744_v13 = vld [vmem:[%s13430_s28 + $0x8d0] sm:$0xff]  }
  0x58   : > { %741 = vst [vmem:[%s13435_s29 + $0x460] sm:$0xff] %v740_v12   ;;  %v748_v14 = vld [vmem:[%s13430_s28 + $0x8e0] sm:$0xff]   ;;  %v752_v15 = vld [vmem:[%s13430_s28 + $0x8f0] sm:$0xff]   ;;  %745 = vst [vmem:[%s13435_s29 + $0x468] sm:$0xff] %v744_v13  }
  0x59   : > { %749 = vst [vmem:[%s13435_s29 + $0x470] sm:$0xff] %v748_v14   ;;  %753 = vst [vmem:[%s13435_s29 + $0x478] sm:$0xff] %v752_v15   ;;  %v756_v16 = vld [vmem:[%s13430_s28 + $0x900] sm:$0xff]   ;;  %v760_v17 = vld [vmem:[%s13430_s28 + $0x910] sm:$0xff]  }
  0x5a   : > { %v764_v18 = vld [vmem:[%s13430_s28 + $0x920] sm:$0xff]   ;;  %757 = vst [vmem:[%s13435_s29 + $0x480] sm:$0xff] %v756_v16   ;;  %761 = vst [vmem:[%s13435_s29 + $0x488] sm:$0xff] %v760_v17   ;;  %v768_v19 = vld [vmem:[%s13430_s28 + $0x930] sm:$0xff]  }
  0x5b   : > { %765 = vst [vmem:[%s13435_s29 + $0x490] sm:$0xff] %v764_v18   ;;  %v772_v20 = vld [vmem:[%s13430_s28 + $0x940] sm:$0xff]   ;;  %v776_v21 = vld [vmem:[%s13430_s28 + $0x950] sm:$0xff]   ;;  %769 = vst [vmem:[%s13435_s29 + $0x498] sm:$0xff] %v768_v19  }
  0x5c   : > { %773 = vst [vmem:[%s13435_s29 + $0x4a0] sm:$0xff] %v772_v20   ;;  %777 = vst [vmem:[%s13435_s29 + $0x4a8] sm:$0xff] %v776_v21   ;;  %v780_v22 = vld [vmem:[%s13430_s28 + $0x960] sm:$0xff]   ;;  %v784_v23 = vld [vmem:[%s13430_s28 + $0x970] sm:$0xff]  }
  0x5d   : > { %v788_v24 = vld [vmem:[%s13430_s28 + $0x980] sm:$0xff]   ;;  %781 = vst [vmem:[%s13435_s29 + $0x4b0] sm:$0xff] %v780_v22   ;;  %785 = vst [vmem:[%s13435_s29 + $0x4b8] sm:$0xff] %v784_v23   ;;  %v792_v25 = vld [vmem:[%s13430_s28 + $0x990] sm:$0xff]  }
  0x5e   : > { %789 = vst [vmem:[%s13435_s29 + $0x4c0] sm:$0xff] %v788_v24   ;;  %v796_v26 = vld [vmem:[%s13430_s28 + $0x9a0] sm:$0xff]   ;;  %v800_v27 = vld [vmem:[%s13430_s28 + $0x9b0] sm:$0xff]   ;;  %793 = vst [vmem:[%s13435_s29 + $0x4c8] sm:$0xff] %v792_v25  }
  0x5f   : > { %797 = vst [vmem:[%s13435_s29 + $0x4d0] sm:$0xff] %v796_v26   ;;  %801 = vst [vmem:[%s13435_s29 + $0x4d8] sm:$0xff] %v800_v27   ;;  %v804_v28 = vld [vmem:[%s13430_s28 + $0x9c0] sm:$0xff]   ;;  %v808_v29 = vld [vmem:[%s13430_s28 + $0x9d0] sm:$0xff]  }
  0x60   : > { %v812_v30 = vld [vmem:[%s13430_s28 + $0x9e0] sm:$0xff]   ;;  %805 = vst [vmem:[%s13435_s29 + $0x4e0] sm:$0xff] %v804_v28   ;;  %809 = vst [vmem:[%s13435_s29 + $0x4e8] sm:$0xff] %v808_v29   ;;  %v816_v31 = vld [vmem:[%s13430_s28 + $0x9f0] sm:$0xff]  }
  0x61   : > { %813 = vst [vmem:[%s13435_s29 + $0x4f0] sm:$0xff] %v812_v30   ;;  %v820_v32 = vld [vmem:[%s13430_s28 + $0xa00] sm:$0xff]   ;;  %v824_v33 = vld [vmem:[%s13430_s28 + $0xa10] sm:$0xff]   ;;  %817 = vst [vmem:[%s13435_s29 + $0x4f8] sm:$0xff] %v816_v31  }
  0x62   : > { %821 = vst [vmem:[%s13435_s29 + $0x500] sm:$0xff] %v820_v32   ;;  %825 = vst [vmem:[%s13435_s29 + $0x508] sm:$0xff] %v824_v33   ;;  %v828_v34 = vld [vmem:[%s13430_s28 + $0xa20] sm:$0xff]   ;;  %v832_v35 = vld [vmem:[%s13430_s28 + $0xa30] sm:$0xff]  }
  0x63   : > { %v836_v36 = vld [vmem:[%s13430_s28 + $0xa40] sm:$0xff]   ;;  %829 = vst [vmem:[%s13435_s29 + $0x510] sm:$0xff] %v828_v34   ;;  %833 = vst [vmem:[%s13435_s29 + $0x518] sm:$0xff] %v832_v35   ;;  %v840_v37 = vld [vmem:[%s13430_s28 + $0xa50] sm:$0xff]  }
  0x64   : > { %837 = vst [vmem:[%s13435_s29 + $0x520] sm:$0xff] %v836_v36   ;;  %v844_v38 = vld [vmem:[%s13430_s28 + $0xa60] sm:$0xff]   ;;  %v848_v39 = vld [vmem:[%s13430_s28 + $0xa70] sm:$0xff]   ;;  %841 = vst [vmem:[%s13435_s29 + $0x528] sm:$0xff] %v840_v37  }
  0x65   : > { %845 = vst [vmem:[%s13435_s29 + $0x530] sm:$0xff] %v844_v38   ;;  %849 = vst [vmem:[%s13435_s29 + $0x538] sm:$0xff] %v848_v39   ;;  %v852_v40 = vld [vmem:[%s13430_s28 + $0xa80] sm:$0xff]   ;;  %v856_v41 = vld [vmem:[%s13430_s28 + $0xa90] sm:$0xff]  }
  0x66   : > { %v860_v42 = vld [vmem:[%s13430_s28 + $0xaa0] sm:$0xff]   ;;  %853 = vst [vmem:[%s13435_s29 + $0x540] sm:$0xff] %v852_v40   ;;  %857 = vst [vmem:[%s13435_s29 + $0x548] sm:$0xff] %v856_v41   ;;  %v864_v43 = vld [vmem:[%s13430_s28 + $0xab0] sm:$0xff]  }
  0x67   : > { %861 = vst [vmem:[%s13435_s29 + $0x550] sm:$0xff] %v860_v42   ;;  %v868_v44 = vld [vmem:[%s13430_s28 + $0xac0] sm:$0xff]   ;;  %v872_v45 = vld [vmem:[%s13430_s28 + $0xad0] sm:$0xff]   ;;  %865 = vst [vmem:[%s13435_s29 + $0x558] sm:$0xff] %v864_v43  }
  0x68   : > { %869 = vst [vmem:[%s13435_s29 + $0x560] sm:$0xff] %v868_v44   ;;  %873 = vst [vmem:[%s13435_s29 + $0x568] sm:$0xff] %v872_v45   ;;  %v876_v46 = vld [vmem:[%s13430_s28 + $0xae0] sm:$0xff]   ;;  %v880_v47 = vld [vmem:[%s13430_s28 + $0xaf0] sm:$0xff]  }
  0x69   : > { %v884_v48 = vld [vmem:[%s13430_s28 + $0xb00] sm:$0xff]   ;;  %877 = vst [vmem:[%s13435_s29 + $0x570] sm:$0xff] %v876_v46   ;;  %881 = vst [vmem:[%s13435_s29 + $0x578] sm:$0xff] %v880_v47   ;;  %v888_v49 = vld [vmem:[%s13430_s28 + $0xb10] sm:$0xff]  }
  0x6a   : > { %885 = vst [vmem:[%s13435_s29 + $0x580] sm:$0xff] %v884_v48   ;;  %v892_v50 = vld [vmem:[%s13430_s28 + $0xb20] sm:$0xff]   ;;  %v896_v51 = vld [vmem:[%s13430_s28 + $0xb30] sm:$0xff]   ;;  %889 = vst [vmem:[%s13435_s29 + $0x588] sm:$0xff] %v888_v49  }
  0x6b   : > { %893 = vst [vmem:[%s13435_s29 + $0x590] sm:$0xff] %v892_v50   ;;  %897 = vst [vmem:[%s13435_s29 + $0x598] sm:$0xff] %v896_v51   ;;  %v900_v52 = vld [vmem:[%s13430_s28 + $0xb40] sm:$0xff]   ;;  %v904_v53 = vld [vmem:[%s13430_s28 + $0xb50] sm:$0xff]  }
  0x6c   : > { %v908_v54 = vld [vmem:[%s13430_s28 + $0xb60] sm:$0xff]   ;;  %901 = vst [vmem:[%s13435_s29 + $0x5a0] sm:$0xff] %v900_v52   ;;  %905 = vst [vmem:[%s13435_s29 + $0x5a8] sm:$0xff] %v904_v53   ;;  %v912_v55 = vld [vmem:[%s13430_s28 + $0xb70] sm:$0xff]  }
  0x6d   : > { %909 = vst [vmem:[%s13435_s29 + $0x5b0] sm:$0xff] %v908_v54   ;;  %v916_v56 = vld [vmem:[%s13430_s28 + $0xb80] sm:$0xff]   ;;  %v920_v57 = vld [vmem:[%s13430_s28 + $0xb90] sm:$0xff]   ;;  %913 = vst [vmem:[%s13435_s29 + $0x5b8] sm:$0xff] %v912_v55  }
  0x6e   : > { %917 = vst [vmem:[%s13435_s29 + $0x5c0] sm:$0xff] %v916_v56   ;;  %921 = vst [vmem:[%s13435_s29 + $0x5c8] sm:$0xff] %v920_v57   ;;  %v924_v58 = vld [vmem:[%s13430_s28 + $0xba0] sm:$0xff]   ;;  %v928_v59 = vld [vmem:[%s13430_s28 + $0xbb0] sm:$0xff]  }
  0x6f   : > { %v932_v60 = vld [vmem:[%s13430_s28 + $0xbc0] sm:$0xff]   ;;  %925 = vst [vmem:[%s13435_s29 + $0x5d0] sm:$0xff] %v924_v58   ;;  %929 = vst [vmem:[%s13435_s29 + $0x5d8] sm:$0xff] %v928_v59   ;;  %v936_v61 = vld [vmem:[%s13430_s28 + $0xbd0] sm:$0xff]  }
  0x70   : > { %933 = vst [vmem:[%s13435_s29 + $0x5e0] sm:$0xff] %v932_v60   ;;  %v940_v62 = vld [vmem:[%s13430_s28 + $0xbe0] sm:$0xff]   ;;  %v944_v63 = vld [vmem:[%s13430_s28 + $0xbf0] sm:$0xff]   ;;  %937 = vst [vmem:[%s13435_s29 + $0x5e8] sm:$0xff] %v936_v61  }
  0x71   : > { %941 = vst [vmem:[%s13435_s29 + $0x5f0] sm:$0xff] %v940_v62   ;;  %945 = vst [vmem:[%s13435_s29 + $0x5f8] sm:$0xff] %v944_v63   ;;  %v948_v0 = vld [vmem:[%s13430_s28 + $0xc00] sm:$0xff]   ;;  %v952_v1 = vld [vmem:[%s13430_s28 + $0xc10] sm:$0xff]  }
  0x72   : > { %v956_v2 = vld [vmem:[%s13430_s28 + $0xc20] sm:$0xff]   ;;  %949 = vst [vmem:[%s13435_s29 + $0x600] sm:$0xff] %v948_v0   ;;  %953 = vst [vmem:[%s13435_s29 + $0x608] sm:$0xff] %v952_v1   ;;  %v960_v3 = vld [vmem:[%s13430_s28 + $0xc30] sm:$0xff]  }
  0x73   : > { %957 = vst [vmem:[%s13435_s29 + $0x610] sm:$0xff] %v956_v2   ;;  %v964_v4 = vld [vmem:[%s13430_s28 + $0xc40] sm:$0xff]   ;;  %v968_v5 = vld [vmem:[%s13430_s28 + $0xc50] sm:$0xff]   ;;  %961 = vst [vmem:[%s13435_s29 + $0x618] sm:$0xff] %v960_v3  }
  0x74   : > { %965 = vst [vmem:[%s13435_s29 + $0x620] sm:$0xff] %v964_v4   ;;  %969 = vst [vmem:[%s13435_s29 + $0x628] sm:$0xff] %v968_v5   ;;  %v972_v6 = vld [vmem:[%s13430_s28 + $0xc60] sm:$0xff]   ;;  %v976_v7 = vld [vmem:[%s13430_s28 + $0xc70] sm:$0xff]  }
  0x75   : > { %v980_v8 = vld [vmem:[%s13430_s28 + $0xc80] sm:$0xff]   ;;  %973 = vst [vmem:[%s13435_s29 + $0x630] sm:$0xff] %v972_v6   ;;  %977 = vst [vmem:[%s13435_s29 + $0x638] sm:$0xff] %v976_v7   ;;  %v984_v9 = vld [vmem:[%s13430_s28 + $0xc90] sm:$0xff]  }
  0x76   : > { %981 = vst [vmem:[%s13435_s29 + $0x640] sm:$0xff] %v980_v8   ;;  %v988_v10 = vld [vmem:[%s13430_s28 + $0xca0] sm:$0xff]   ;;  %v992_v11 = vld [vmem:[%s13430_s28 + $0xcb0] sm:$0xff]   ;;  %985 = vst [vmem:[%s13435_s29 + $0x648] sm:$0xff] %v984_v9  }
  0x77   : > { %989 = vst [vmem:[%s13435_s29 + $0x650] sm:$0xff] %v988_v10   ;;  %993 = vst [vmem:[%s13435_s29 + $0x658] sm:$0xff] %v992_v11   ;;  %v996_v12 = vld [vmem:[%s13430_s28 + $0xcc0] sm:$0xff]   ;;  %v1000_v13 = vld [vmem:[%s13430_s28 + $0xcd0] sm:$0xff]  }
  0x78   : > { %v1004_v14 = vld [vmem:[%s13430_s28 + $0xce0] sm:$0xff]   ;;  %997 = vst [vmem:[%s13435_s29 + $0x660] sm:$0xff] %v996_v12   ;;  %1001 = vst [vmem:[%s13435_s29 + $0x668] sm:$0xff] %v1000_v13   ;;  %v1008_v15 = vld [vmem:[%s13430_s28 + $0xcf0] sm:$0xff]  }
  0x79   : > { %1005 = vst [vmem:[%s13435_s29 + $0x670] sm:$0xff] %v1004_v14   ;;  %v1012_v16 = vld [vmem:[%s13430_s28 + $0xd00] sm:$0xff]   ;;  %v1016_v17 = vld [vmem:[%s13430_s28 + $0xd10] sm:$0xff]   ;;  %1009 = vst [vmem:[%s13435_s29 + $0x678] sm:$0xff] %v1008_v15  }
  0x7a   : > { %1013 = vst [vmem:[%s13435_s29 + $0x680] sm:$0xff] %v1012_v16   ;;  %1017 = vst [vmem:[%s13435_s29 + $0x688] sm:$0xff] %v1016_v17   ;;  %v1020_v18 = vld [vmem:[%s13430_s28 + $0xd20] sm:$0xff]   ;;  %v1024_v19 = vld [vmem:[%s13430_s28 + $0xd30] sm:$0xff]  }
  0x7b   : > { %v1028_v20 = vld [vmem:[%s13430_s28 + $0xd40] sm:$0xff]   ;;  %1021 = vst [vmem:[%s13435_s29 + $0x690] sm:$0xff] %v1020_v18   ;;  %1025 = vst [vmem:[%s13435_s29 + $0x698] sm:$0xff] %v1024_v19   ;;  %v1032_v21 = vld [vmem:[%s13430_s28 + $0xd50] sm:$0xff]  }
  0x7c   : > { %1029 = vst [vmem:[%s13435_s29 + $0x6a0] sm:$0xff] %v1028_v20   ;;  %v1036_v22 = vld [vmem:[%s13430_s28 + $0xd60] sm:$0xff]   ;;  %v1040_v23 = vld [vmem:[%s13430_s28 + $0xd70] sm:$0xff]   ;;  %1033 = vst [vmem:[%s13435_s29 + $0x6a8] sm:$0xff] %v1032_v21  }
  0x7d   : > { %1037 = vst [vmem:[%s13435_s29 + $0x6b0] sm:$0xff] %v1036_v22   ;;  %1041 = vst [vmem:[%s13435_s29 + $0x6b8] sm:$0xff] %v1040_v23   ;;  %v1044_v24 = vld [vmem:[%s13430_s28 + $0xd80] sm:$0xff]   ;;  %v1048_v25 = vld [vmem:[%s13430_s28 + $0xd90] sm:$0xff]  }
  0x7e   : > { %v1052_v26 = vld [vmem:[%s13430_s28 + $0xda0] sm:$0xff]   ;;  %1045 = vst [vmem:[%s13435_s29 + $0x6c0] sm:$0xff] %v1044_v24   ;;  %1049 = vst [vmem:[%s13435_s29 + $0x6c8] sm:$0xff] %v1048_v25   ;;  %v1056_v27 = vld [vmem:[%s13430_s28 + $0xdb0] sm:$0xff]  }
  0x7f   : > { %1053 = vst [vmem:[%s13435_s29 + $0x6d0] sm:$0xff] %v1052_v26   ;;  %v1060_v28 = vld [vmem:[%s13430_s28 + $0xdc0] sm:$0xff]   ;;  %v1064_v29 = vld [vmem:[%s13430_s28 + $0xdd0] sm:$0xff]   ;;  %1057 = vst [vmem:[%s13435_s29 + $0x6d8] sm:$0xff] %v1056_v27  }
  0x80   : > { %1061 = vst [vmem:[%s13435_s29 + $0x6e0] sm:$0xff] %v1060_v28   ;;  %1065 = vst [vmem:[%s13435_s29 + $0x6e8] sm:$0xff] %v1064_v29   ;;  %v1068_v30 = vld [vmem:[%s13430_s28 + $0xde0] sm:$0xff]   ;;  %v1072_v31 = vld [vmem:[%s13430_s28 + $0xdf0] sm:$0xff]  }
  0x81   : > { %v1076_v32 = vld [vmem:[%s13430_s28 + $0xe00] sm:$0xff]   ;;  %1069 = vst [vmem:[%s13435_s29 + $0x6f0] sm:$0xff] %v1068_v30   ;;  %1073 = vst [vmem:[%s13435_s29 + $0x6f8] sm:$0xff] %v1072_v31   ;;  %v1080_v33 = vld [vmem:[%s13430_s28 + $0xe10] sm:$0xff]  }
  0x82   : > { %1077 = vst [vmem:[%s13435_s29 + $0x700] sm:$0xff] %v1076_v32   ;;  %v1084_v34 = vld [vmem:[%s13430_s28 + $0xe20] sm:$0xff]   ;;  %v1088_v35 = vld [vmem:[%s13430_s28 + $0xe30] sm:$0xff]   ;;  %1081 = vst [vmem:[%s13435_s29 + $0x708] sm:$0xff] %v1080_v33  }
  0x83   : > { %1085 = vst [vmem:[%s13435_s29 + $0x710] sm:$0xff] %v1084_v34   ;;  %1089 = vst [vmem:[%s13435_s29 + $0x718] sm:$0xff] %v1088_v35   ;;  %v1092_v36 = vld [vmem:[%s13430_s28 + $0xe40] sm:$0xff]   ;;  %v1096_v37 = vld [vmem:[%s13430_s28 + $0xe50] sm:$0xff]  }
  0x84   : > { %v1100_v38 = vld [vmem:[%s13430_s28 + $0xe60] sm:$0xff]   ;;  %1093 = vst [vmem:[%s13435_s29 + $0x720] sm:$0xff] %v1092_v36   ;;  %1097 = vst [vmem:[%s13435_s29 + $0x728] sm:$0xff] %v1096_v37   ;;  %v1104_v39 = vld [vmem:[%s13430_s28 + $0xe70] sm:$0xff]  }
  0x85   : > { %1101 = vst [vmem:[%s13435_s29 + $0x730] sm:$0xff] %v1100_v38   ;;  %v1108_v40 = vld [vmem:[%s13430_s28 + $0xe80] sm:$0xff]   ;;  %v1112_v41 = vld [vmem:[%s13430_s28 + $0xe90] sm:$0xff]   ;;  %1105 = vst [vmem:[%s13435_s29 + $0x738] sm:$0xff] %v1104_v39  }
  0x86   : > { %1109 = vst [vmem:[%s13435_s29 + $0x740] sm:$0xff] %v1108_v40   ;;  %1113 = vst [vmem:[%s13435_s29 + $0x748] sm:$0xff] %v1112_v41   ;;  %v1116_v42 = vld [vmem:[%s13430_s28 + $0xea0] sm:$0xff]   ;;  %v1120_v43 = vld [vmem:[%s13430_s28 + $0xeb0] sm:$0xff]  }
  0x87   : > { %v1124_v44 = vld [vmem:[%s13430_s28 + $0xec0] sm:$0xff]   ;;  %1117 = vst [vmem:[%s13435_s29 + $0x750] sm:$0xff] %v1116_v42   ;;  %1121 = vst [vmem:[%s13435_s29 + $0x758] sm:$0xff] %v1120_v43   ;;  %v1128_v45 = vld [vmem:[%s13430_s28 + $0xed0] sm:$0xff]  }
  0x88   : > { %1125 = vst [vmem:[%s13435_s29 + $0x760] sm:$0xff] %v1124_v44   ;;  %v1132_v46 = vld [vmem:[%s13430_s28 + $0xee0] sm:$0xff]   ;;  %v1136_v47 = vld [vmem:[%s13430_s28 + $0xef0] sm:$0xff]   ;;  %1129 = vst [vmem:[%s13435_s29 + $0x768] sm:$0xff] %v1128_v45  }
  0x89   : > { %1133 = vst [vmem:[%s13435_s29 + $0x770] sm:$0xff] %v1132_v46   ;;  %1137 = vst [vmem:[%s13435_s29 + $0x778] sm:$0xff] %v1136_v47   ;;  %v1140_v48 = vld [vmem:[%s13430_s28 + $0xf00] sm:$0xff]   ;;  %v1144_v49 = vld [vmem:[%s13430_s28 + $0xf10] sm:$0xff]  }
  0x8a   : > { %v1148_v50 = vld [vmem:[%s13430_s28 + $0xf20] sm:$0xff]   ;;  %1141 = vst [vmem:[%s13435_s29 + $0x780] sm:$0xff] %v1140_v48   ;;  %1145 = vst [vmem:[%s13435_s29 + $0x788] sm:$0xff] %v1144_v49   ;;  %v1152_v51 = vld [vmem:[%s13430_s28 + $0xf30] sm:$0xff]  }
  0x8b   : > { %1149 = vst [vmem:[%s13435_s29 + $0x790] sm:$0xff] %v1148_v50   ;;  %v1156_v52 = vld [vmem:[%s13430_s28 + $0xf40] sm:$0xff]   ;;  %v1160_v53 = vld [vmem:[%s13430_s28 + $0xf50] sm:$0xff]   ;;  %1153 = vst [vmem:[%s13435_s29 + $0x798] sm:$0xff] %v1152_v51  }
  0x8c   : > { %1157 = vst [vmem:[%s13435_s29 + $0x7a0] sm:$0xff] %v1156_v52   ;;  %1161 = vst [vmem:[%s13435_s29 + $0x7a8] sm:$0xff] %v1160_v53   ;;  %v1164_v54 = vld [vmem:[%s13430_s28 + $0xf60] sm:$0xff]   ;;  %v1168_v55 = vld [vmem:[%s13430_s28 + $0xf70] sm:$0xff]  }
  0x8d   : > { %v1172_v56 = vld [vmem:[%s13430_s28 + $0xf80] sm:$0xff]   ;;  %1165 = vst [vmem:[%s13435_s29 + $0x7b0] sm:$0xff] %v1164_v54   ;;  %1169 = vst [vmem:[%s13435_s29 + $0x7b8] sm:$0xff] %v1168_v55   ;;  %v1176_v57 = vld [vmem:[%s13430_s28 + $0xf90] sm:$0xff]  }
  0x8e   : > { %1173 = vst [vmem:[%s13435_s29 + $0x7c0] sm:$0xff] %v1172_v56   ;;  %v1180_v58 = vld [vmem:[%s13430_s28 + $0xfa0] sm:$0xff]   ;;  %v1184_v59 = vld [vmem:[%s13430_s28 + $0xfb0] sm:$0xff]   ;;  %1177 = vst [vmem:[%s13435_s29 + $0x7c8] sm:$0xff] %v1176_v57  }
  0x8f   : > { %1181 = vst [vmem:[%s13435_s29 + $0x7d0] sm:$0xff] %v1180_v58   ;;  %1185 = vst [vmem:[%s13435_s29 + $0x7d8] sm:$0xff] %v1184_v59   ;;  %v1188_v60 = vld [vmem:[%s13430_s28 + $0xfc0] sm:$0xff]   ;;  %v1192_v61 = vld [vmem:[%s13430_s28 + $0xfd0] sm:$0xff]  }
  0x90   : > { %v1196_v62 = vld [vmem:[%s13430_s28 + $0xfe0] sm:$0xff]   ;;  %1189 = vst [vmem:[%s13435_s29 + $0x7e0] sm:$0xff] %v1188_v60   ;;  %1193 = vst [vmem:[%s13435_s29 + $0x7e8] sm:$0xff] %v1192_v61   ;;  %v1200_v63 = vld [vmem:[%s13430_s28 + $0xff0] sm:$0xff]  }
  0x91   : > { %1197 = vst [vmem:[%s13435_s29 + $0x7f0] sm:$0xff] %v1196_v62   ;;  %1201 = vst [vmem:[%s13435_s29 + $0x7f8] sm:$0xff] %v1200_v63  }
  0x92 PF: > { %p11290_p5 = scmp.ge.s32.totalorder %s13367_s17, 1  ;;  %p4336_p6 = scmp.lt.s32.totalorder %s13367_s17, 3 }
  0x94   : > { %p4337_p7 = pnand %p11290_p5, %p4336_p6 }
  0x96   : > { %4340 = sbr.rel (%p4337_p7) target bundleno = 2580 (0xa14), region = 84 }
  0x9d   : > { %v4899_v0 = vld [vmem:[%s16764_s1] sm:$0x3]  ;;  %vm6949_vm0 = vcmask 1041408   ;;  %s4343_s6 = sand.u32 1, %s13359_s15   ;;  %vm6180_vm1 = vcmask 31744   ;;  %vm13370_vm2 = vmmov 0  }
  0x9e   : > { %13012 = vmatprep.subr.msk.bf16.mxu0 %vm6949_vm0, %v4899_v0  ;;  %v6951_v1 = vsel %vm6949_vm0, %v4899_v0, 0  ;;  %s11291_s7 = sshll.u32 %s4343_s6, 11  ;;  %13013 = vmatprep.subr.msk.bf16.mxu1 %vm6949_vm0, %v4899_v0  ;;  %s11292_s15 = sshll.u32 %s11283_s18, 1 }
  0x9f   : > { %12241 = vmatpush3.bf16.msra.mxu0 %v6951_v1  ;;  %13011 = vmatpush3.bf16.msra.mxu1 %v6951_v1  ;;  %s13952_s8 = scalar_lea.vmem [#allocation2], %s11291_s7  ;;  %p4375_p8 = scmp.lt.s32.totalorder %s11292_s15, 3 }
  0xa0   : > { %v13040_v2 = vld [vmem:[%s13952_s8] sm:$0xff]   ;;  %v13041_v3 = vld [vmem:[%s13952_s8 + $0x8] sm:$0xff]   ;;  %v13042_v4 = vld [vmem:[%s13952_s8 + $0x10] sm:$0xff]  }
  0xa1   : > { %12242 = vmatprep.mubr.msk.bf16.mxu0 %vm6180_vm1, %v13040_v2  ;;  %v13043_v5 = vld [vmem:[%s13952_s8 + $0x18] sm:$0xff]   ;;  %v13044_v6 = vld [vmem:[%s13952_s8 + $0x20] sm:$0xff]   ;;  %v13045_v7 = vld [vmem:[%s13952_s8 + $0x28] sm:$0xff]   ;;  %s18034_s15 = smov (!%p4375_p8, %s11292_s15), 3 }
  0xa2   : > { %12243 = vmatmul.mubr.msk.bf16.vlgmr.msra.gmra.mrb[0].mxu0 %vm6180_vm1, %v13041_v3  ;;  %v13046_v8 = vld [vmem:[%s13952_s8 + $0x30] sm:$0xff]   ;;  %v13047_v9 = vld [vmem:[%s13952_s8 + $0x38] sm:$0xff]   ;;  %v13048_v10 = vld [vmem:[%s13952_s8 + $0x40] sm:$0xff]   ;;  %s11293_s20 = sshll.u32 %s18034_s15, 3 }
  0xa3   : > { %12246 = vmatprep.mubr.msk.bf16.mxu0 %vm6180_vm1, %v13042_v4  ;;  %v13049_v11 = vld [vmem:[%s13952_s8 + $0x48] sm:$0xff]   ;;  %v13050_v12 = vld [vmem:[%s13952_s8 + $0x50] sm:$0xff]   ;;  %v13051_v13 = vld [vmem:[%s13952_s8 + $0x58] sm:$0xff]   ;;  %s4378_s26 = scalar_lea.vmem %s16766_s3, %s11293_s20  ;;  %s4384_s29 = scalar_lea.vmem %s16767_s4, %s11293_s20 }
  0xa4   : > { %v13052_v14 = vld [vmem:[%s13952_s8 + $0x60] sm:$0xff]   ;;  %v13082_v15 = vld [vmem:[%s13952_s8 + $0x590] sm:$0xff]   ;;  %v13084_v16 = vld [vmem:[%s13952_s8 + $0x598] sm:$0xff]  }
  0xa5   : > { %12598 = vmatprep.mubr.msk.bf16.mxu1 %vm6180_vm1, %v13082_v15  ;;  %v13086_v17 = vld [vmem:[%s13952_s8 + $0x5a0] sm:$0xff]   ;;  %v13053_v18 = vld [vmem:[%s13952_s8 + $0x68] sm:$0xff]   ;;  %v13054_v19 = vld [vmem:[%s13952_s8 + $0x70] sm:$0xff]  }
  0xa6   : > { %12599 = vmatmul.mubr.msk.bf16.vlgmr.msra.gmra.mrb[0].mxu1 %vm6180_vm1, %v13084_v16  ;;  %v13088_v20 = vld [vmem:[%s13952_s8 + $0x5a8] sm:$0xff]   ;;  %v13090_v21 = vld [vmem:[%s13952_s8 + $0x5b0] sm:$0xff]   ;;  %v13055_v22 = vld [vmem:[%s13952_s8 + $0x78] sm:$0xff]  }
  0xa7   : > { %12602 = vmatprep.mubr.msk.bf16.mxu1 %vm6180_vm1, %v13086_v17  ;;  %v13056_v23 = vld [vmem:[%s13952_s8 + $0x80] sm:$0xff]   ;;  %v13092_v24 = vld [vmem:[%s13952_s8 + $0x5b8] sm:$0xff]   ;;  %v13057_v26 = vld [vmem:[%s13952_s8 + $0x88] sm:$0xff]  }
  0xa8   : > { %v13094_v25 = vld [vmem:[%s13952_s8 + $0x5c0] sm:$0xff]   ;;  %v13058_v27 = vld [vmem:[%s13952_s8 + $0x90] sm:$0xff]   ;;  %v13096_v28 = vld [vmem:[%s13952_s8 + $0x5c8] sm:$0xff]  }
  0xa9   : > { %v13098_v29 = vld [vmem:[%s13952_s8 + $0x5d0] sm:$0xff]   ;;  %v13059_v30 = vld [vmem:[%s13952_s8 + $0x98] sm:$0xff]   ;;  %v13060_v31 = vld [vmem:[%s13952_s8 + $0xa0] sm:$0xff]  }
  0xaa   : > { %12247 = vmatmul.mubr.msk.bf16.gmra.mrb[4].mxu0 %vm6180_vm1, %v13043_v5  ;;  %v13100_v32 = vld [vmem:[%s13952_s8 + $0x5d8] sm:$0xff]   ;;  %v13102_v33 = vld [vmem:[%s13952_s8 + $0x5e0] sm:$0xff]   ;;  %v13061_v34 = vld [vmem:[%s13952_s8 + $0xa8] sm:$0xff]  }
  0xab   : > { %12250 = vmatprep.mubr.msk.bf16.mxu0 %vm6180_vm1, %v13044_v6  ;;  %v13062_v35 = vld [vmem:[%s13952_s8 + $0xb0] sm:$0xff]   ;;  %v13104_v36 = vld [vmem:[%s13952_s8 + $0x5e8] sm:$0xff]   ;;  %v13063_v37 = vld [vmem:[%s13952_s8 + $0xb8] sm:$0xff]  }
  0xac   : > { %v13106_v38 = vld [vmem:[%s13952_s8 + $0x5f0] sm:$0xff]   ;;  %v13064_v39 = vld [vmem:[%s13952_s8 + $0xc0] sm:$0xff]   ;;  %v13108_v40 = vld [vmem:[%s13952_s8 + $0x5f8] sm:$0xff]  }
  0xad   : > { %v13065_v41 = vld [vmem:[%s13952_s8 + $0xc8] sm:$0xff]   ;;  %v13110_v42 = vld [vmem:[%s13952_s8 + $0x600] sm:$0xff]   ;;  %v13066_v43 = vld [vmem:[%s13952_s8 + $0xd0] sm:$0xff]  }
  0xae   : > { %12603 = vmatmul.mubr.msk.bf16.gmra.mrb[4].mxu1 %vm6180_vm1, %v13088_v20  ;;  %v13112_v44 = vld [vmem:[%s13952_s8 + $0x608] sm:$0xff]   ;;  %v13067_v45 = vld [vmem:[%s13952_s8 + $0xd8] sm:$0xff]   ;;  %v13114_v46 = vld [vmem:[%s13952_s8 + $0x610] sm:$0xff]  }
  0xaf   : > { %12606 = vmatprep.mubr.msk.bf16.mxu1 %vm6180_vm1, %v13090_v21  ;;  %v13068_v47 = vld [vmem:[%s13952_s8 + $0xe0] sm:$0xff]   ;;  %v13116_v48 = vld [vmem:[%s13952_s8 + $0x618] sm:$0xff]   ;;  %v13069_v49 = vld [vmem:[%s13952_s8 + $0xe8] sm:$0xff]  }
  0xb0   : > { %v13118_v50 = vld [vmem:[%s13952_s8 + $0x620] sm:$0xff]   ;;  %v13070_v51 = vld [vmem:[%s13952_s8 + $0xf0] sm:$0xff]   ;;  %v13120_v52 = vld [vmem:[%s13952_s8 + $0x628] sm:$0xff]  }
  0xb1   : > { %v13071_v53 = vld [vmem:[%s13952_s8 + $0xf8] sm:$0xff]   ;;  %v13122_v54 = vld [vmem:[%s13952_s8 + $0x630] sm:$0xff]   ;;  %v13072_v55 = vld [vmem:[%s13952_s8 + $0x100] sm:$0xff]  }
  0xb2   : > { %12251 = vmatmul.mubr.msk.bf16.gmra.mrb[8].mxu0 %vm6180_vm1, %v13045_v7  ;;  %v13124_v56 = vld [vmem:[%s13952_s8 + $0x638] sm:$0xff]   ;;  %v13073_v57 = vld [vmem:[%s13952_s8 + $0x108] sm:$0xff]   ;;  %v13126_v58 = vld [vmem:[%s13952_s8 + $0x640] sm:$0xff]  }
  0xb3   : > { %12254 = vmatprep.mubr.msk.bf16.mxu0 %vm6180_vm1, %v13046_v8  ;;  %v13074_v59 = vld [vmem:[%s13952_s8 + $0x110] sm:$0xff]   ;;  %v13128_v60 = vld [vmem:[%s13952_s8 + $0x648] sm:$0xff]   ;;  %v13075_v61 = vld [vmem:[%s13952_s8 + $0x118] sm:$0xff]  }
  0xb4   : > { %v13130_v62 = vld [vmem:[%s13952_s8 + $0x650] sm:$0xff]   ;;  %v13076_v63 = vld [vmem:[%s13952_s8 + $0x120] sm:$0xff]   ;;  %v13132_v0 = vld [vmem:[%s13952_s8 + $0x658] sm:$0xff]  }
  0xb5   : > { %v13077_v1 = vld [vmem:[%s13952_s8 + $0x128] sm:$0xff]   ;;  %v13134_v2 = vld [vmem:[%s13952_s8 + $0x660] sm:$0xff]   ;;  %v13078_v3 = vld [vmem:[%s13952_s8 + $0x130] sm:$0xff]  }
  0xb6   : > { %12607 = vmatmul.mubr.msk.bf16.gmra.mrb[8].mxu1 %vm6180_vm1, %v13092_v24  ;;  %v13136_v4 = vld [vmem:[%s13952_s8 + $0x668] sm:$0xff]   ;;  %v13079_v5 = vld [vmem:[%s13952_s8 + $0x138] sm:$0xff]   ;;  %v13138_v6 = vld [vmem:[%s13952_s8 + $0x670] sm:$0xff]  }
  0xb7   : > { %12610 = vmatprep.mubr.msk.bf16.mxu1 %vm6180_vm1, %v13094_v25  ;;  %v13080_v7 = vld [vmem:[%s13952_s8 + $0x140] sm:$0xff]   ;;  %v13140_v8 = vld [vmem:[%s13952_s8 + $0x678] sm:$0xff]   ;;  %v13089_v17 = vld [vmem:[%s13952_s8 + $0x168] sm:$0xff]  }
  0xb8   : > { %v13087_v15 = vld [vmem:[%s13952_s8 + $0x160] sm:$0xff]   ;;  %v13148_v16 = vld [vmem:[%s13952_s8 + $0x698] sm:$0xff]   ;;  %v13152_v20 = vld [vmem:[%s13952_s8 + $0x6a8] sm:$0xff]  }
  0xb9   : > { %v13093_v21 = vld [vmem:[%s13952_s8 + $0x178] sm:$0xff]   ;;  %v13097_v25 = vld [vmem:[%s13952_s8 + $0x188] sm:$0xff]  }
  0xba   : > { %12255 = vmatmul.mubr.msk.bf16.gmra.mrb[12].mxu0 %vm6180_vm1, %v13047_v9  ;;  %v13081_v9 = vld [vmem:[%s13952_s8 + $0x148] sm:$0xff]   ;;  %v13156_v24 = vld [vmem:[%s13952_s8 + $0x6b8] sm:$0xff]  }
  0xbb   : > { %12258 = vmatprep.mubr.msk.bf16.mxu0 %vm6180_vm1, %v13048_v10  ;;  %v13142_v10 = vld [vmem:[%s13952_s8 + $0x680] sm:$0xff]  }
  0xbe   : > { %12611 = vmatmul.mubr.msk.bf16.gmra.mrb[12].mxu1 %vm6180_vm1, %v13096_v28  ;;  %v13160_v28 = vld [vmem:[%s13952_s8 + $0x6c8] sm:$0xff]  }
  0xbf   : > { %12614 = vmatprep.mubr.msk.bf16.mxu1 %vm6180_vm1, %v13098_v29  ;;  %v13101_v29 = vld [vmem:[%s13952_s8 + $0x198] sm:$0xff]  }
  0xc2   : > { %12259 = vmatmul.mubr.msk.bf16.gmra.mrb[16].mxu0 %vm6180_vm1, %v13049_v11  ;;  %v13083_v11 = vld [vmem:[%s13952_s8 + $0x150] sm:$0xff]  }
  0xc3   : > { %12262 = vmatprep.mubr.msk.bf16.mxu0 %vm6180_vm1, %v13050_v12  ;;  %v13144_v12 = vld [vmem:[%s13952_s8 + $0x688] sm:$0xff]  }
  0xc6   : > { %12615 = vmatmul.mubr.msk.bf16.gmra.mrb[16].mxu1 %vm6180_vm1, %v13100_v32  ;;  %v13164_v32 = vld [vmem:[%s13952_s8 + $0x6d8] sm:$0xff]  }
  0xc7   : > { %12618 = vmatprep.mubr.msk.bf16.mxu1 %vm6180_vm1, %v13102_v33  ;;  %v13105_v33 = vld [vmem:[%s13952_s8 + $0x1a8] sm:$0xff]  }
  0xca   : > { %12263 = vmatmul.mubr.msk.bf16.gmra.mrb[20].mxu0 %vm6180_vm1, %v13051_v13  ;;  %v13085_v13 = vld [vmem:[%s13952_s8 + $0x158] sm:$0xff]  }
  0xcb   : > { %12266 = vmatprep.mubr.msk.bf16.mxu0 %vm6180_vm1, %v13052_v14  ;;  %v13146_v14 = vld [vmem:[%s13952_s8 + $0x690] sm:$0xff]  }
  0xce   : > { %12619 = vmatmul.mubr.msk.bf16.gmra.mrb[20].mxu1 %vm6180_vm1, %v13104_v36  ;;  %v13168_v36 = vld [vmem:[%s13952_s8 + $0x6e8] sm:$0xff]  }
  0xcf   : > { %12622 = vmatprep.mubr.msk.bf16.mxu1 %vm6180_vm1, %v13106_v38  ;;  %v13109_v38 = vld [vmem:[%s13952_s8 + $0x1b8] sm:$0xff]  }
  0xd2   : > { %12267 = vmatmul.mubr.msk.bf16.gmra.mrb[24].mxu0 %vm6180_vm1, %v13053_v18  ;;  %v13150_v18 = vld [vmem:[%s13952_s8 + $0x6a0] sm:$0xff]  }
  0xd3   : > { %12270 = vmatprep.mubr.msk.bf16.mxu0 %vm6180_vm1, %v13054_v19  ;;  %v13091_v19 = vld [vmem:[%s13952_s8 + $0x170] sm:$0xff]  }
  0xd6   : > { %12623 = vmatmul.mubr.msk.bf16.gmra.mrb[24].mxu1 %vm6180_vm1, %v13108_v40  ;;  %v13170_v40 = vld [vmem:[%s13952_s8 + $0x6f0] sm:$0xff]  }
  0xd7   : > { %12626 = vmatprep.mubr.msk.bf16.mxu1 %vm6180_vm1, %v13110_v42  ;;  %v13111_v42 = vld [vmem:[%s13952_s8 + $0x1c0] sm:$0xff]  }
  0xda   : > { %12271 = vmatmul.mubr.msk.bf16.gmra.mrb[28].mxu0 %vm6180_vm1, %v13055_v22  ;;  %v13154_v22 = vld [vmem:[%s13952_s8 + $0x6b0] sm:$0xff]  }
  0xdb   : > { %12274 = vmatprep.mubr.msk.bf16.mxu0 %vm6180_vm1, %v13056_v23  ;;  %v13095_v23 = vld [vmem:[%s13952_s8 + $0x180] sm:$0xff]  }
  0xde   : > { %12627 = vmatmul.mubr.msk.bf16.gmra.mrb[28].mxu1 %vm6180_vm1, %v13112_v44  ;;  %v13172_v44 = vld [vmem:[%s13952_s8 + $0x6f8] sm:$0xff]  }
  0xdf   : > { %12630 = vmatprep.mubr.msk.bf16.mxu1 %vm6180_vm1, %v13114_v46  ;;  %v13113_v46 = vld [vmem:[%s13952_s8 + $0x1c8] sm:$0xff]  }
  0xe2   : > { %12275 = vmatmul.mubr.msk.bf16.gmra.mrb[32].mxu0 %vm6180_vm1, %v13057_v26  ;;  %v13158_v26 = vld [vmem:[%s13952_s8 + $0x6c0] sm:$0xff]  }
  0xe3   : > { %12278 = vmatprep.mubr.msk.bf16.mxu0 %vm6180_vm1, %v13058_v27  ;;  %v13099_v27 = vld [vmem:[%s13952_s8 + $0x190] sm:$0xff]  }
  0xe6   : > { %12631 = vmatmul.mubr.msk.bf16.gmra.mrb[32].mxu1 %vm6180_vm1, %v13116_v48  ;;  %v13174_v48 = vld [vmem:[%s13952_s8 + $0x700] sm:$0xff]  }
  0xe7   : > { %12634 = vmatprep.mubr.msk.bf16.mxu1 %vm6180_vm1, %v13118_v50  ;;  %v13115_v50 = vld [vmem:[%s13952_s8 + $0x1d0] sm:$0xff]  }
  0xea   : > { %12279 = vmatmul.mubr.msk.bf16.gmra.mrb[36].mxu0 %vm6180_vm1, %v13059_v30  ;;  %v13162_v30 = vld [vmem:[%s13952_s8 + $0x6d0] sm:$0xff]  }
  0xeb   : > { %12282 = vmatprep.mubr.msk.bf16.mxu0 %vm6180_vm1, %v13060_v31  ;;  %v13103_v31 = vld [vmem:[%s13952_s8 + $0x1a0] sm:$0xff]  }
  0xee   : > { %12635 = vmatmul.mubr.msk.bf16.gmra.mrb[36].mxu1 %vm6180_vm1, %v13120_v52  ;;  %v13176_v52 = vld [vmem:[%s13952_s8 + $0x708] sm:$0xff]  }
  0xef   : > { %12638 = vmatprep.mubr.msk.bf16.mxu1 %vm6180_vm1, %v13122_v54  ;;  %v13117_v54 = vld [vmem:[%s13952_s8 + $0x1d8] sm:$0xff]  }
  0xf2   : > { %12283 = vmatmul.mubr.msk.bf16.gmra.mrb[40].mxu0 %vm6180_vm1, %v13061_v34  ;;  %v13166_v34 = vld [vmem:[%s13952_s8 + $0x6e0] sm:$0xff]  }
  0xf3   : > { %12286 = vmatprep.mubr.msk.bf16.mxu0 %vm6180_vm1, %v13062_v35  ;;  %v13107_v35 = vld [vmem:[%s13952_s8 + $0x1b0] sm:$0xff]  }
  0xf6   : > { %12639 = vmatmul.mubr.msk.bf16.gmra.mrb[40].mxu1 %vm6180_vm1, %v13124_v56  ;;  %v13178_v56 = vld [vmem:[%s13952_s8 + $0x710] sm:$0xff]  }
  0xf7   : > { %12642 = vmatprep.mubr.msk.bf16.mxu1 %vm6180_vm1, %v13126_v58  ;;  %v13119_v58 = vld [vmem:[%s13952_s8 + $0x1e0] sm:$0xff]  }
  0xfa   : > { %12287 = vmatmul.mubr.msk.bf16.gmra.mrb[44].mxu0 %vm6180_vm1, %v13063_v37 }
  0xfb   : > { %12290 = vmatprep.mubr.msk.bf16.mxu0 %vm6180_vm1, %v13064_v39 }
  0xfe   : > { %12643 = vmatmul.mubr.msk.bf16.gmra.mrb[44].mxu1 %vm6180_vm1, %v13128_v60  ;;  %v13180_v60 = vld [vmem:[%s13952_s8 + $0x718] sm:$0xff]  }
  0xff   : > { %12646 = vmatprep.mubr.msk.bf16.mxu1 %vm6180_vm1, %v13130_v62  ;;  %v13121_v62 = vld [vmem:[%s13952_s8 + $0x1e8] sm:$0xff]  }
 0x102   : > { %12291 = vmatmul.mubr.msk.bf16.gmra.mrb[48].mxu0 %vm6180_vm1, %v13065_v41 }
 0x103   : > { %12294 = vmatprep.mubr.msk.bf16.mxu0 %vm6180_vm1, %v13066_v43 }
 0x106   : > { %12647 = vmatmul.mubr.msk.bf16.gmra.mrb[48].mxu1 %vm6180_vm1, %v13132_v0  ;;  %v13182_v0 = vld [vmem:[%s13952_s8 + $0x720] sm:$0xff]  }
 0x107   : > { %12650 = vmatprep.mubr.msk.bf16.mxu1 %vm6180_vm1, %v13134_v2  ;;  %v13123_v2 = vld [vmem:[%s13952_s8 + $0x1f0] sm:$0xff]  }
 0x10a   : > { %12295 = vmatmul.mubr.msk.bf16.gmra.mrb[52].mxu0 %vm6180_vm1, %v13067_v45 }
 0x10b   : > { %12298 = vmatprep.mubr.msk.bf16.mxu0 %vm6180_vm1, %v13068_v47 }
 0x10e   : > { %12651 = vmatmul.mubr.msk.bf16.gmra.mrb[52].mxu1 %vm6180_vm1, %v13136_v4  ;;  %v13184_v4 = vld [vmem:[%s13952_s8 + $0x728] sm:$0xff]  }
 0x10f   : > { %12654 = vmatprep.mubr.msk.bf16.mxu1 %vm6180_vm1, %v13138_v6 }
 0x112   : > { %12299 = vmatmul.mubr.msk.bf16.gmra.mrb[56].mxu0 %vm6180_vm1, %v13069_v49 }
 0x113   : > { %12302 = vmatprep.mubr.msk.bf16.mxu0 %vm6180_vm1, %v13070_v51 }
 0x116   : > { %12655 = vmatmul.mubr.msk.bf16.gmra.mrb[56].mxu1 %vm6180_vm1, %v13140_v8  ;;  %v13186_v8 = vld [vmem:[%s13952_s8 + $0x730] sm:$0xff]  }
 0x117   : > { %12658 = vmatprep.mubr.msk.bf16.mxu1 %vm6180_vm1, %v13142_v10  ;;  %v13127_v10 = vld [vmem:[%s13952_s8 + $0x200] sm:$0xff]  }
 0x11a   : > { %12303 = vmatmul.mubr.msk.bf16.gmra.mrb[60].mxu0 %vm6180_vm1, %v13071_v53 }
 0x11b   : > { %12306 = vmatprep.mubr.msk.bf16.mxu0 %vm6180_vm1, %v13072_v55 }
 0x11e   : > { %12659 = vmatmul.mubr.msk.bf16.gmra.mrb[60].mxu1 %vm6180_vm1, %v13144_v12  ;;  %v13188_v12 = vld [vmem:[%s13952_s8 + $0x738] sm:$0xff]  }
 0x11f   : > { %12662 = vmatprep.mubr.msk.bf16.mxu1 %vm6180_vm1, %v13146_v14 }
 0x122   : > { %12307 = vmatmul.mubr.msk.bf16.gmra.mrb[64].mxu0 %vm6180_vm1, %v13073_v57 }
 0x123   : > { %12310 = vmatprep.mubr.msk.bf16.mxu0 %vm6180_vm1, %v13074_v59 }
 0x126   : > { %12663 = vmatmul.mubr.msk.bf16.gmra.mrb[64].mxu1 %vm6180_vm1, %v13148_v16  ;;  %v13190_v16 = vld [vmem:[%s13952_s8 + $0x740] sm:$0xff]  }
 0x127   : > { %12666 = vmatprep.mubr.msk.bf16.mxu1 %vm6180_vm1, %v13150_v18  ;;  %v13131_v18 = vld [vmem:[%s13952_s8 + $0x210] sm:$0xff]  }
 0x12a   : > { %12311 = vmatmul.mubr.msk.bf16.gmra.mrb[68].mxu0 %vm6180_vm1, %v13075_v61 }
 0x12b   : > { %12314 = vmatprep.mubr.msk.bf16.mxu0 %vm6180_vm1, %v13076_v63 }
 0x12e   : > { %12667 = vmatmul.mubr.msk.bf16.gmra.mrb[68].mxu1 %vm6180_vm1, %v13152_v20  ;;  %v13192_v20 = vld [vmem:[%s13952_s8 + $0x748] sm:$0xff]  }
 0x12f   : > { %12670 = vmatprep.mubr.msk.bf16.mxu1 %vm6180_vm1, %v13154_v22 }
 0x132   : > { %12315 = vmatmul.mubr.msk.bf16.gmra.mrb[72].mxu0 %vm6180_vm1, %v13077_v1 }
 0x133   : > { %12318 = vmatprep.mubr.msk.bf16.mxu0 %vm6180_vm1, %v13078_v3 }
 0x136   : > { %12671 = vmatmul.mubr.msk.bf16.gmra.mrb[72].mxu1 %vm6180_vm1, %v13156_v24  ;;  %v13194_v24 = vld [vmem:[%s13952_s8 + $0x750] sm:$0xff]  }
 0x137   : > { %12674 = vmatprep.mubr.msk.bf16.mxu1 %vm6180_vm1, %v13158_v26  ;;  %v13135_v26 = vld [vmem:[%s13952_s8 + $0x220] sm:$0xff]  }
 0x13a   : > { %12319 = vmatmul.mubr.msk.bf16.gmra.mrb[76].mxu0 %vm6180_vm1, %v13079_v5 }
 0x13b   : > { %12322 = vmatprep.mubr.msk.bf16.mxu0 %vm6180_vm1, %v13080_v7  ;;  %v13125_v7 = vld [vmem:[%s13952_s8 + $0x1f8] sm:$0xff]  }
 0x13e   : > { %12675 = vmatmul.mubr.msk.bf16.gmra.mrb[76].mxu1 %vm6180_vm1, %v13160_v28  ;;  %v13196_v28 = vld [vmem:[%s13952_s8 + $0x758] sm:$0xff]  }
 0x13f   : > { %12678 = vmatprep.mubr.msk.bf16.mxu1 %vm6180_vm1, %v13162_v30 }
 0x142   : > { %12323 = vmatmul.mubr.msk.bf16.gmra.mrb[80].mxu0 %vm6180_vm1, %v13081_v9 }
 0x143   : > { %12326 = vmatprep.mubr.msk.bf16.mxu0 %vm6180_vm1, %v13083_v11 }
 0x146   : > { %12679 = vmatmul.mubr.msk.bf16.gmra.mrb[80].mxu1 %vm6180_vm1, %v13164_v32  ;;  %v13198_v32 = vld [vmem:[%s13952_s8 + $0x760] sm:$0xff]  }
 0x147   : > { %12682 = vmatprep.mubr.msk.bf16.mxu1 %vm6180_vm1, %v13166_v34  ;;  %v13139_v34 = vld [vmem:[%s13952_s8 + $0x230] sm:$0xff]  }
 0x14a   : > { %12327 = vmatmul.mubr.msk.bf16.gmra.mrb[84].mxu0 %vm6180_vm1, %v13085_v13 }
 0x14b   : > { %12330 = vmatprep.mubr.msk.bf16.mxu0 %vm6180_vm1, %v13087_v15  ;;  %v13129_v15 = vld [vmem:[%s13952_s8 + $0x208] sm:$0xff]  }
 0x14e   : > { %12683 = vmatmul.mubr.msk.bf16.gmra.mrb[84].mxu1 %vm6180_vm1, %v13168_v36  ;;  %v13200_v36 = vld [vmem:[%s13952_s8 + $0x768] sm:$0xff]  }
 0x14f   : > { %12686 = vmatprep.mubr.msk.bf16.mxu1 %vm6180_vm1, %v13170_v40 }
 0x152   : > { %12331 = vmatmul.mubr.msk.bf16.gmra.mrb[88].mxu0 %vm6180_vm1, %v13089_v17 }
 0x153   : > { %12334 = vmatprep.mubr.msk.bf16.mxu0 %vm6180_vm1, %v13091_v19 }
 0x156   : > { %12687 = vmatmul.mubr.msk.bf16.gmra.mrb[88].mxu1 %vm6180_vm1, %v13172_v44  ;;  %v13202_v44 = vld [vmem:[%s13952_s8 + $0x770] sm:$0xff]  }
 0x157   : > { %12690 = vmatprep.mubr.msk.bf16.mxu1 %vm6180_vm1, %v13174_v48  ;;  %v13143_v48 = vld [vmem:[%s13952_s8 + $0x240] sm:$0xff]  }
 0x15a   : > { %12335 = vmatmul.mubr.msk.bf16.gmra.mrb[92].mxu0 %vm6180_vm1, %v13093_v21 }
 0x15b   : > { %12338 = vmatprep.mubr.msk.bf16.mxu0 %vm6180_vm1, %v13095_v23  ;;  %v13133_v23 = vld [vmem:[%s13952_s8 + $0x218] sm:$0xff]  }
 0x15e   : > { %12691 = vmatmul.mubr.msk.bf16.gmra.mrb[92].mxu1 %vm6180_vm1, %v13176_v52  ;;  %v13204_v52 = vld [vmem:[%s13952_s8 + $0x778] sm:$0xff]  }
 0x15f   : > { %12694 = vmatprep.mubr.msk.bf16.mxu1 %vm6180_vm1, %v13178_v56 }
 0x162   : > { %12339 = vmatmul.mubr.msk.bf16.gmra.mrb[96].mxu0 %vm6180_vm1, %v13097_v25 }
 0x163   : > { %12342 = vmatprep.mubr.msk.bf16.mxu0 %vm6180_vm1, %v13099_v27 }
 0x166   : > { %12695 = vmatmul.mubr.msk.bf16.gmra.mrb[96].mxu1 %vm6180_vm1, %v13180_v60  ;;  %v13206_v60 = vld [vmem:[%s13952_s8 + $0x780] sm:$0xff]  }
 0x167   : > { %12698 = vmatprep.mubr.msk.bf16.mxu1 %vm6180_vm1, %v13182_v0  ;;  %v13147_v0 = vld [vmem:[%s13952_s8 + $0x250] sm:$0xff]  }
 0x16a   : > { %12343 = vmatmul.mubr.msk.bf16.gmra.mrb[100].mxu0 %vm6180_vm1, %v13101_v29 }
 0x16b   : > { %12346 = vmatprep.mubr.msk.bf16.mxu0 %vm6180_vm1, %v13103_v31  ;;  %v13137_v31 = vld [vmem:[%s13952_s8 + $0x228] sm:$0xff]  }
 0x16e   : > { %12699 = vmatmul.mubr.msk.bf16.gmra.mrb[100].mxu1 %vm6180_vm1, %v13184_v4  ;;  %v13208_v4 = vld [vmem:[%s13952_s8 + $0x788] sm:$0xff]  }
 0x16f   : > { %12702 = vmatprep.mubr.msk.bf16.mxu1 %vm6180_vm1, %v13186_v8 }
 0x172   : > { %12347 = vmatmul.mubr.msk.bf16.gmra.mrb[104].mxu0 %vm6180_vm1, %v13105_v33 }
 0x173   : > { %12350 = vmatprep.mubr.msk.bf16.mxu0 %vm6180_vm1, %v13107_v35 }
 0x175   : > { %v14151_v37 = vpop.f32.mrb[0].mxu0 }
 0x176   : > { %17017 = vst [vmem:[#allocation3_spill] sm:$0xff] %v14151_v37  ;;  %v14155_v39 = vpop.f32.mrb[1].mxu0  ;;  %12703 = vmatmul.mubr.msk.bf16.gmra.mrb[104].mxu1 %vm6180_vm1, %v13188_v12  ;;  %v13210_v12 = vld [vmem:[%s13952_s8 + $0x790] sm:$0xff]  }
 0x177   : > { %17018 = vst [vmem:[#allocation4_spill] sm:$0xff] %v14155_v39  ;;  %v14158_v41 = vpop.f32.mrb[2].mxu0  ;;  %12706 = vmatprep.mubr.msk.bf16.mxu1 %vm6180_vm1, %v13190_v16  ;;  %v13151_v16 = vld [vmem:[%s13952_s8 + $0x260] sm:$0xff]  }
 0x178   : > { %17019 = vst [vmem:[#allocation5_spill] sm:$0xff] %v14158_v41  ;;  %v14161_v43 = vpop.f32.mrb[3].mxu0 }
 0x179   : > { %17020 = vst [vmem:[#allocation6_spill] sm:$0xff] %v14161_v43 }
 0x17a   : > { %12351 = vmatmul.mubr.msk.bf16.gmra.mrb[108].mxu0 %vm6180_vm1, %v13109_v38 }
 0x17b   : > { %12354 = vmatprep.mubr.msk.bf16.mxu0 %vm6180_vm1, %v13111_v42  ;;  %v13141_v42 = vld [vmem:[%s13952_s8 + $0x238] sm:$0xff]  }
 0x17d   : > { %v14167_v45 = vpop.f32.mrb[4].mxu0 }
 0x17e   : > { %17021 = vst [vmem:[#allocation7_spill] sm:$0xff] %v14167_v45  ;;  %v14171_v47 = vpop.f32.mrb[5].mxu0  ;;  %12707 = vmatmul.mubr.msk.bf16.gmra.mrb[108].mxu1 %vm6180_vm1, %v13192_v20  ;;  %v13212_v20 = vld [vmem:[%s13952_s8 + $0x798] sm:$0xff]   ;;  %v13264_v45 = vld [vmem:[%s13952_s8 + $0x470] sm:$0xff]  }
 0x17f   : > { %17022 = vst [vmem:[#allocation8_spill] sm:$0xff] %v14171_v47  ;;  %v14174_v49 = vpop.f32.mrb[6].mxu0  ;;  %12710 = vmatprep.mubr.msk.bf16.mxu1 %vm6180_vm1, %v13194_v24 }
 0x180   : > { %17023 = vst [vmem:[#allocation9_spill] sm:$0xff] %v14174_v49  ;;  %v14177_v51 = vpop.f32.mrb[7].mxu0 }
 0x181   : > { %17024 = vst [vmem:[#allocation10_spill] sm:$0xff] %v14177_v51 }
 0x182   : > { %12355 = vmatmul.mubr.msk.bf16.gmra.mrb[112].mxu0 %vm6180_vm1, %v13113_v46 }
 0x183   : > { %12358 = vmatprep.mubr.msk.bf16.mxu0 %vm6180_vm1, %v13115_v50 }
 0x185   : > { %v14183_v53 = vpop.f32.mrb[8].mxu0 }
 0x186   : > { %17025 = vst [vmem:[#allocation11_spill] sm:$0xff] %v14183_v53  ;;  %v14187_v55 = vpop.f32.mrb[9].mxu0  ;;  %12711 = vmatmul.mubr.msk.bf16.gmra.mrb[112].mxu1 %vm6180_vm1, %v13196_v28  ;;  %v13153_v28 = vld [vmem:[%s13952_s8 + $0x268] sm:$0xff]  }
 0x187   : > { %17026 = vst [vmem:[#allocation12_spill] sm:$0xff] %v14187_v55  ;;  %v14190_v57 = vpop.f32.mrb[10].mxu0  ;;  %12714 = vmatprep.mubr.msk.bf16.mxu1 %vm6180_vm1, %v13198_v32 }
 0x188   : > { %17027 = vst [vmem:[#allocation13_spill] sm:$0xff] %v14190_v57  ;;  %v14193_v59 = vpop.f32.mrb[11].mxu0 }
 0x189   : > { %17028 = vst [vmem:[#allocation14_spill] sm:$0xff] %v14193_v59 }
 0x18a   : > { %12359 = vmatmul.mubr.msk.bf16.gmra.mrb[116].mxu0 %vm6180_vm1, %v13117_v54 }
 0x18b   : > { %12362 = vmatprep.mubr.msk.bf16.mxu0 %vm6180_vm1, %v13119_v58  ;;  %v13145_v58 = vld [vmem:[%s13952_s8 + $0x248] sm:$0xff]  }
 0x18d   : > { %v14199_v61 = vpop.f32.mrb[12].mxu0 }
 0x18e   : > { %17029 = vst [vmem:[#allocation15_spill] sm:$0xff] %v14199_v61  ;;  %v14203_v63 = vpop.f32.mrb[13].mxu0  ;;  %12715 = vmatmul.mubr.msk.bf16.gmra.mrb[116].mxu1 %vm6180_vm1, %v13200_v36  ;;  %v13262_v61 = vld [vmem:[%s13952_s8 + $0x460] sm:$0xff]  }
 0x18f   : > { %17030 = vst [vmem:[#allocation16_spill] sm:$0xff] %v14203_v63  ;;  %v14206_v1 = vpop.f32.mrb[14].mxu0  ;;  %12718 = vmatprep.mubr.msk.bf16.mxu1 %vm6180_vm1, %v13202_v44 }
 0x190   : > { %17031 = vst [vmem:[#allocation17_spill] sm:$0xff] %v14206_v1  ;;  %v14209_v3 = vpop.f32.mrb[15].mxu0 }
 0x191   : > { %17032 = vst [vmem:[#allocation18_spill] sm:$0xff] %v14209_v3 }
 0x192   : > { %12363 = vmatmul.mubr.msk.bf16.gmra.mrb[120].mxu0 %vm6180_vm1, %v13121_v62 }
 0x193   : > { %12366 = vmatprep.mubr.msk.bf16.mxu0 %vm6180_vm1, %v13123_v2 }
 0x195   : > { %v14215_v5 = vpop.f32.mrb[16].mxu0 }
 0x196   : > { %17033 = vst [vmem:[#allocation19_spill] sm:$0xff] %v14215_v5  ;;  %v14218_v6 = vpop.f32.mrb[17].mxu0  ;;  %12719 = vmatmul.mubr.msk.bf16.gmra.mrb[120].mxu1 %vm6180_vm1, %v13204_v52  ;;  %v13157_v52 = vld [vmem:[%s13952_s8 + $0x278] sm:$0xff]  }
 0x197   : > { %17034 = vst [vmem:[#allocation20_spill] sm:$0xff] %v14218_v6  ;;  %v14222_v9 = vpop.f32.mrb[18].mxu0  ;;  %12722 = vmatprep.mubr.msk.bf16.mxu1 %vm6180_vm1, %v13206_v60 }
 0x198   : > { %17035 = vst [vmem:[#allocation21_spill] sm:$0xff] %v14222_v9  ;;  %v14225_v11 = vpop.f32.mrb[19].mxu0 }
 0x199   : > { %17036 = vst [vmem:[#allocation22_spill] sm:$0xff] %v14225_v11 }
 0x19a   : > { %12367 = vmatmul.mubr.msk.bf16.gmra.mrb[124].mxu0 %vm6180_vm1, %v13125_v7 }
 0x19b   : > { %12370 = vmatprep.mubr.msk.bf16.mxu0 %vm6180_vm1, %v13127_v10  ;;  %v13149_v10 = vld [vmem:[%s13952_s8 + $0x258] sm:$0xff]  }
 0x19d   : > { %v14231_v13 = vpop.f32.mrb[20].mxu0 }
 0x19e   : > { %17037 = vst [vmem:[#allocation23_spill] sm:$0xff] %v14231_v13  ;;  %v14234_v14 = vpop.f32.mrb[21].mxu0  ;;  %12723 = vmatmul.mubr.msk.bf16.gmra.mrb[124].mxu1 %vm6180_vm1, %v13208_v4 }
 0x19f   : > { %17038 = vst [vmem:[#allocation24_spill] sm:$0xff] %v14234_v14  ;;  %v14238_v17 = vpop.f32.mrb[22].mxu0  ;;  %12726 = vmatprep.mubr.msk.bf16.mxu1 %vm6180_vm1, %v13210_v12 }
 0x1a0   : > { %17039 = vst [vmem:[#allocation25_spill] sm:$0xff] %v14238_v17  ;;  %v14241_v19 = vpop.f32.mrb[23].mxu0 }
 0x1a1   : > { %17040 = vst [vmem:[#allocation26_spill] sm:$0xff] %v14241_v19  ;;  %v13254_v19 = vld [vmem:[%s13952_s8 + $0x428] sm:$0xff]  }
 0x1a2   : > { %12371 = vmatmul.mubr.msk.bf16.gmra.mrb[128].mxu0 %vm6180_vm1, %v13129_v15 }
 0x1a3   : > { %12374 = vmatprep.mubr.msk.bf16.mxu0 %vm6180_vm1, %v13131_v18 }
 0x1a5   : > { %v14247_v21 = vpop.f32.mrb[24].mxu0 }
 0x1a6   : > { %17041 = vst [vmem:[#allocation27_spill] sm:$0xff] %v14247_v21  ;;  %v14250_v22 = vpop.f32.mrb[25].mxu0  ;;  %12727 = vmatmul.mubr.msk.bf16.gmra.mrb[128].mxu1 %vm6180_vm1, %v13212_v20  ;;  %v13161_v20 = vld [vmem:[%s13952_s8 + $0x288] sm:$0xff]  }
 0x1a7   : > { %17042 = vst [vmem:[#allocation28_spill] sm:$0xff] %v14250_v22  ;;  %v14254_v25 = vpop.f32.mrb[26].mxu0 }
 0x1a8   : > { %17043 = vst [vmem:[#allocation29_spill] sm:$0xff] %v14254_v25  ;;  %v14257_v27 = vpop.f32.mrb[27].mxu0 }
 0x1a9   : > { %17044 = vst [vmem:[#allocation30_spill] sm:$0xff] %v14257_v27  ;;  %v13256_v27 = vld [vmem:[%s13952_s8 + $0x438] sm:$0xff]  }
 0x1aa   : > { %12375 = vmatmul.mubr.msk.bf16.gmra.mrb[132].mxu0 %vm6180_vm1, %v13133_v23  ;;  %v13214_v23 = vld [vmem:[%s16764_s1 + $0x40] sm:$0xff]  }
 0x1ab   : > { %12378 = vmatprep.mubr.msk.bf16.mxu0 %vm6180_vm1, %v13135_v26  ;;  %12754 = vmatprep.subr.bf16.mxu1 %v13214_v23 }
 0x1ac   : > { %12755 = vmatpush3.bf16.msra.mxu1 %v13214_v23  ;;  %v13223_v23 = vld [vmem:[%s13952_s8 + $0x7c0] sm:$0xff]  }
 0x1ad   : > { %v14263_v29 = vpop.f32.mrb[28].mxu0 }
 0x1ae   : > { %17045 = vst [vmem:[#allocation31_spill] sm:$0xff] %v14263_v29  ;;  %v14266_v30 = vpop.f32.mrb[29].mxu0 }
 0x1af   : > { %17046 = vst [vmem:[#allocation32_spill] sm:$0xff] %v14266_v30  ;;  %v14270_v33 = vpop.f32.mrb[30].mxu0 }
 0x1b0   : > { %17047 = vst [vmem:[#allocation33_spill] sm:$0xff] %v14270_v33  ;;  %v14273_v35 = vpop.f32.mrb[31].mxu0 }
 0x1b1   : > { %17048 = vst [vmem:[#allocation34_spill] sm:$0xff] %v14273_v35 }
 0x1b2   : > { %12379 = vmatmul.mubr.msk.bf16.gmra.mrb[136].mxu0 %vm6180_vm1, %v13137_v31  ;;  %v13215_v31 = vld [vmem:[%s13952_s8 + $0x7a0] sm:$0xff]  }
 0x1b3   : > { %12382 = vmatprep.mubr.msk.bf16.mxu0 %vm6180_vm1, %v13139_v34  ;;  %v13155_v34 = vld [vmem:[%s13952_s8 + $0x270] sm:$0xff]   ;;  %12730 = vmatprep.mubr.msk.bf16.mxu1 %vm6180_vm1, %v13215_v31 }
 0x1b4   : > { %v13163_v31 = vld [vmem:[%s13952_s8 + $0x290] sm:$0xff]  }
 0x1b5   : > { %v14279_v38 = vpop.f32.mrb[32].mxu0 }
 0x1b6   : > { %17049 = vst [vmem:[#allocation35_spill] sm:$0xff] %v14279_v38  ;;  %v14282_v40 = vpop.f32.mrb[33].mxu0  ;;  %v13260_v38 = vld [vmem:[%s13952_s8 + $0x450] sm:$0xff]  }
 0x1b7   : > { %17050 = vst [vmem:[#allocation36_spill] sm:$0xff] %v14282_v40  ;;  %v14286_v46 = vpop.f32.mrb[34].mxu0 }
 0x1b8   : > { %17051 = vst [vmem:[#allocation37_spill] sm:$0xff] %v14286_v46  ;;  %v14289_v50 = vpop.f32.mrb[35].mxu0  ;;  %v13266_v46 = vld [vmem:[%s13952_s8 + $0x480] sm:$0xff]  }
 0x1b9   : > { %17052 = vst [vmem:[#allocation38_spill] sm:$0xff] %v14289_v50 }
 0x1ba   : > { %12383 = vmatmul.mubr.msk.bf16.gmra.mrb[140].mxu0 %vm6180_vm1, %v13141_v42  ;;  %v13217_v42 = vld [vmem:[%s13952_s8 + $0x7a8] sm:$0xff]  }
 0x1bb   : > { %12386 = vmatprep.mubr.msk.bf16.mxu0 %vm6180_vm1, %v13143_v48  ;;  %12731 = vmatmul.mubr.msk.bf16.gmra.mrb[132].mxu1 %vm6180_vm1, %v13217_v42  ;;  %v13225_v42 = vld [vmem:[%s13952_s8 + $0x7c8] sm:$0xff]  }
 0x1bd   : > { %v14295_v54 = vpop.f32.mrb[36].mxu0 }
 0x1be   : > { %17053 = vst [vmem:[#allocation39_spill] sm:$0xff] %v14295_v54  ;;  %v14298_v56 = vpop.f32.mrb[37].mxu0 }
 0x1bf   : > { %17054 = vst [vmem:[#allocation40_spill] sm:$0xff] %v14298_v56  ;;  %v14302_v62 = vpop.f32.mrb[38].mxu0 }
 0x1c0   : > { %17055 = vst [vmem:[#allocation41_spill] sm:$0xff] %v14302_v62  ;;  %v14305_v2 = vpop.f32.mrb[39].mxu0 }
 0x1c1   : > { %17056 = vst [vmem:[#allocation42_spill] sm:$0xff] %v14305_v2 }
 0x1c2   : > { %12387 = vmatmul.mubr.msk.bf16.gmra.mrb[144].mxu0 %vm6180_vm1, %v13145_v58  ;;  %v13219_v58 = vld [vmem:[%s13952_s8 + $0x7b0] sm:$0xff]  }
 0x1c3   : > { %12390 = vmatprep.mubr.msk.bf16.mxu0 %vm6180_vm1, %v13147_v0  ;;  %v13159_v0 = vld [vmem:[%s13952_s8 + $0x280] sm:$0xff]   ;;  %12734 = vmatprep.mubr.msk.bf16.mxu1 %vm6180_vm1, %v13219_v58 }
 0x1c5   : > { %v14311_v7 = vpop.f32.mrb[40].mxu0 }
 0x1c6   : > { %17057 = vst [vmem:[#allocation43_spill] sm:$0xff] %v14311_v7  ;;  %v14314_v8 = vpop.f32.mrb[41].mxu0 }
 0x1c7   : > { %17058 = vst [vmem:[#allocation44_spill] sm:$0xff] %v14314_v8  ;;  %v14318_v15 = vpop.f32.mrb[42].mxu0 }
 0x1c8   : > { %17059 = vst [vmem:[#allocation45_spill] sm:$0xff] %v14318_v15  ;;  %v14321_v18 = vpop.f32.mrb[43].mxu0 }
 0x1c9   : > { %17060 = vst [vmem:[#allocation46_spill] sm:$0xff] %v14321_v18 }
 0x1ca   : > { %12391 = vmatmul.mubr.msk.bf16.gmra.mrb[148].mxu0 %vm6180_vm1, %v13149_v10  ;;  %v13221_v10 = vld [vmem:[%s13952_s8 + $0x7b8] sm:$0xff]  }
 0x1cb   : > { %12394 = vmatprep.mubr.msk.bf16.mxu0 %vm6180_vm1, %v13151_v16  ;;  %12735 = vmatmul.mubr.msk.bf16.gmra.mrb[136].mxu1 %vm6180_vm1, %v13221_v10  ;;  %v13227_v10 = vld [vmem:[%s13952_s8 + $0x7d0] sm:$0xff]  }
 0x1cc   : > { %12738 = vmatprep.mubr.msk.bf16.mxu1 %vm6180_vm1, %v13223_v23  ;;  %v13167_v23 = vld [vmem:[%s13952_s8 + $0x2a0] sm:$0xff]  }
 0x1cd   : > { %v14330_v24 = vpop.f32.mrb[44].mxu0 }
 0x1ce   : > { %17061 = vst [vmem:[#allocation47_spill] sm:$0xff] %v14330_v24  ;;  %v14333_v26 = vpop.f32.mrb[45].mxu0 }
 0x1cf   : > { %17062 = vst [vmem:[#allocation48_spill] sm:$0xff] %v14333_v26  ;;  %v14337_v32 = vpop.f32.mrb[46].mxu0 }
 0x1d0   : > { %17063 = vst [vmem:[#allocation49_spill] sm:$0xff] %v14337_v32  ;;  %v14340_v36 = vpop.f32.mrb[47].mxu0 }
 0x1d1   : > { %17064 = vst [vmem:[#allocation50_spill] sm:$0xff] %v14340_v36 }
 0x1d2   : > { %12395 = vmatmul.mubr.msk.bf16.gmra.mrb[152].mxu0 %vm6180_vm1, %v13153_v28 }
 0x1d3   : > { %12398 = vmatprep.mubr.msk.bf16.mxu0 %vm6180_vm1, %v13155_v34  ;;  %12739 = vmatmul.mubr.msk.bf16.gmra.mrb[140].mxu1 %vm6180_vm1, %v13225_v42 }
 0x1d4   : > { %12742 = vmatprep.mubr.msk.bf16.mxu1 %vm6180_vm1, %v13227_v10 }
 0x1d5   : > { %v14346_v44 = vpop.f32.mrb[48].mxu0 }
 0x1d6   : > { %17065 = vst [vmem:[#allocation51_spill] sm:$0xff] %v14346_v44  ;;  %v14349_v48 = vpop.f32.mrb[49].mxu0 }
 0x1d7   : > { %17066 = vst [vmem:[#allocation52_spill] sm:$0xff] %v14349_v48  ;;  %v14353_v60 = vpop.f32.mrb[50].mxu0 }
 0x1d8   : > { %17067 = vst [vmem:[#allocation53_spill] sm:$0xff] %v14353_v60  ;;  %v14356_v4 = vpop.f32.mrb[51].mxu0 }
 0x1d9   : > { %17068 = vst [vmem:[#allocation54_spill] sm:$0xff] %v14356_v4 }
 0x1da   : > { %12399 = vmatmul.mubr.msk.bf16.gmra.mrb[156].mxu0 %vm6180_vm1, %v13157_v52 }
 0x1db   : > { %12402 = vmatprep.mubr.msk.bf16.mxu0 %vm6180_vm1, %v13159_v0  ;;  %v13165_v0 = vld [vmem:[%s13952_s8 + $0x298] sm:$0xff]  }
 0x1dd   : > { %v14362_v12 = vpop.f32.mrb[52].mxu0 }
 0x1de   : > { %17069 = vst [vmem:[#allocation55_spill] sm:$0xff] %v14362_v12  ;;  %v14365_v16 = vpop.f32.mrb[53].mxu0 }
 0x1df   : > { %17070 = vst [vmem:[#allocation56_spill] sm:$0xff] %v14365_v16  ;;  %v14369_v28 = vpop.f32.mrb[54].mxu0  ;;  %v13195_v16 = vld [vmem:[%s13952_s8 + $0x310] sm:$0xff]  }
 0x1e0   : > { %17071 = vst [vmem:[#allocation57_spill] sm:$0xff] %v14369_v28  ;;  %v14372_v34 = vpop.f32.mrb[55].mxu0 }
 0x1e1   : > { %17072 = vst [vmem:[#allocation58_spill] sm:$0xff] %v14372_v34 }
 0x1e2   : > { %12403 = vmatmul.mubr.msk.bf16.gmra.mrb[160].mxu0 %vm6180_vm1, %v13161_v20  ;;  %v13229_v20 = vld [vmem:[%s13952_s8 + $0x7d8] sm:$0xff]  }
 0x1e3   : > { %12406 = vmatprep.mubr.msk.bf16.mxu0 %vm6180_vm1, %v13163_v31  ;;  %12743 = vmatmul.mubr.msk.bf16.gmra.mrb[144].mxu1 %vm6180_vm1, %v13229_v20 }
 0x1e5   : > { %v14378_v52 = vpop.f32.mrb[56].mxu0 }
 0x1e6   : > { %17073 = vst [vmem:[#allocation59_spill] sm:$0xff] %v14378_v52  ;;  %v14381_v58 = vpop.f32.mrb[57].mxu0 }
 0x1e7   : > { %17074 = vst [vmem:[#allocation60_spill] sm:$0xff] %v14381_v58  ;;  %v14385_v28 = vpop.f32.mrb[58].mxu0  ;;  %v13169_v58 = vld [vmem:[%s13952_s8 + $0x2a8] sm:$0xff]  }
 0x1e8   : > { %17075 = vst [vmem:[#allocation61_spill] sm:$0xff] %v14385_v28  ;;  %v14388_v34 = vpop.f32.mrb[59].mxu0  ;;  %v13231_v28 = vld [vmem:[%s13952_s8 + $0x7e0] sm:$0xff]  }
 0x1e9   : > { %17076 = vst [vmem:[#allocation62_spill] sm:$0xff] %v14388_v34  ;;  %v13171_v34 = vld [vmem:[%s13952_s8 + $0x2b0] sm:$0xff]   ;;  %12746 = vmatprep.mubr.msk.bf16.mxu1 %vm6180_vm1, %v13231_v28  ;;  %v13173_v28 = vld [vmem:[%s13952_s8 + $0x2b8] sm:$0xff]  }
 0x1ea   : > { %12407 = vmatmul.mubr.msk.bf16.gmra.mrb[164].mxu0 %vm6180_vm1, %v13165_v0  ;;  %v13233_v0 = vld [vmem:[%s13952_s8 + $0x7e8] sm:$0xff]  }
 0x1eb   : > { %12410 = vmatprep.mubr.msk.bf16.mxu0 %vm6180_vm1, %v13167_v23  ;;  %v13235_v23 = vld [vmem:[%s16764_s1 + $0x48] sm:$0xff]   ;;  %12747 = vmatmul.mubr.msk.bf16.gmra.mrb[148].mxu1 %vm6180_vm1, %v13233_v0 }
 0x1ec   : > { %12756 = vmatprep.subr.bf16.mxu1 %v13235_v23 }
 0x1ed   : > { %v14394_v31 = vpop.f32.mrb[60].mxu0  ;;  %12757 = vmatpush3.bf16.msra.mxu1 %v13235_v23 }
 0x1ee   : > { %17077 = vst [vmem:[#allocation63_spill] sm:$0xff] %v14394_v31  ;;  %v14397_v42 = vpop.f32.mrb[61].mxu0 }
 0x1ef   : > { %17078 = vst [vmem:[#allocation64_spill] sm:$0xff] %v14397_v42  ;;  %v14401_v52 = vpop.f32.mrb[62].mxu0 }
 0x1f0   : > { %17079 = vst [vmem:[#allocation65_spill] sm:$0xff] %v14401_v52  ;;  %v14404_v10 = vpop.f32.mrb[63].mxu0 }
 0x1f1   : > { %17080 = vst [vmem:[#allocation66_spill] sm:$0xff] %v14404_v10  ;;  %v13236_v10 = vld [vmem:[%s13952_s8 + $0x7f0] sm:$0xff]  }
 0x1f2   : > { %12411 = vmatmul.mubr.msk.bf16.gmra.mrb[168].mxu0 %vm6180_vm1, %v13169_v58  ;;  %v13175_v58 = vld [vmem:[%s13952_s8 + $0x2c0] sm:$0xff]   ;;  %12750 = vmatprep.mubr.msk.bf16.mxu1 %vm6180_vm1, %v13236_v10 }
 0x1f3   : > { %12414 = vmatprep.mubr.msk.bf16.mxu0 %vm6180_vm1, %v13171_v34  ;;  %v13238_v34 = vld [vmem:[%s13952_s8 + $0x7f8] sm:$0xff]  }
 0x1f4   : > { %12751 = vmatmul.mubr.msk.bf16.gmra.mrb[152].mxu1 %vm6180_vm1, %v13238_v34 }
 0x1f5   : > { %v14413_v20 = vpop.f32.mrb[64].mxu0 }
 0x1f6   : > { %17081 = vst [vmem:[#allocation67_spill] sm:$0xff] %v14413_v20  ;;  %v14416_v52 = vpop.f32.mrb[65].mxu0 }
 0x1f7   : > { %17082 = vst [vmem:[#allocation68_spill] sm:$0xff] %v14416_v52  ;;  %v14420_v42 = vpop.f32.mrb[66].mxu0  ;;  %v13177_v52 = vld [vmem:[%s13952_s8 + $0x2c8] sm:$0xff]  }
 0x1f8   : > { %17083 = vst [vmem:[#allocation69_spill] sm:$0xff] %v14420_v42  ;;  %v14423_v31 = vpop.f32.mrb[67].mxu0 }
 0x1f9   : > { %17084 = vst [vmem:[#allocation70_spill] sm:$0xff] %v14423_v31  ;;  %v13179_v31 = vld [vmem:[%s13952_s8 + $0x2d0] sm:$0xff]  }
 0x1fa   : > { %12415 = vmatmul.mubr.msk.bf16.gmra.mrb[172].mxu0 %vm6180_vm1, %v13173_v28 }
 0x1fb   : > { %12418 = vmatprep.mubr.msk.bf16.mxu0 %vm6180_vm1, %v13175_v58  ;;  %v13181_v58 = vld [vmem:[%s13952_s8 + $0x2d8] sm:$0xff]  }
 0x1fd   : > { %v14429_v0 = vpop.f32.mrb[68].mxu0 }
 0x1fe   : > { %17085 = vst [vmem:[#allocation71_spill] sm:$0xff] %v14429_v0  ;;  %v14432_v23 = vpop.f32.mrb[69].mxu0 }
 0x1ff   : > { %17086 = vst [vmem:[#allocation72_spill] sm:$0xff] %v14432_v23  ;;  %v14435_v42 = vpop.f32.mrb[70].mxu0  ;;  %v13183_v23 = vld [vmem:[%s13952_s8 + $0x2e0] sm:$0xff]  }
 0x200   : > { %17087 = vst [vmem:[#allocation73_spill] sm:$0xff] %v14435_v42  ;;  %v14438_v20 = vpop.f32.mrb[71].mxu0 }
 0x201   : > { %17088 = vst [vmem:[#allocation74_spill] sm:$0xff] %v14438_v20 }
 0x202   : > { %12419 = vmatmul.mubr.msk.bf16.gmra.mrb[176].mxu0 %vm6180_vm1, %v13177_v52 }
 0x203   : > { %12422 = vmatprep.mubr.msk.bf16.mxu0 %vm6180_vm1, %v13179_v31  ;;  %v13185_v31 = vld [vmem:[%s13952_s8 + $0x2e8] sm:$0xff]  }
 0x205   : > { %v14442_v10 = vpop.f32.mrb[72].mxu0 }
 0x206   : > { %17089 = vst [vmem:[#allocation75_spill] sm:$0xff] %v14442_v10  ;;  %v14444_v28 = vpop.f32.mrb[73].mxu0 }
 0x207   : > { %17090 = vst [vmem:[#allocation76_spill] sm:$0xff] %v14444_v28  ;;  %v14447_v34 = vpop.f32.mrb[74].mxu0  ;;  %v13187_v28 = vld [vmem:[%s13952_s8 + $0x2f0] sm:$0xff]  }
 0x208   : > { %17091 = vst [vmem:[#allocation77_spill] sm:$0xff] %v14447_v34  ;;  %v14450_v0 = vpop.f32.mrb[75].mxu0 }
 0x209   : > { %17092 = vst [vmem:[#allocation78_spill] sm:$0xff] %v14450_v0 }
 0x20a   : > { %12423 = vmatmul.mubr.msk.bf16.gmra.mrb[180].mxu0 %vm6180_vm1, %v13181_v58 }
 0x20b   : > { %12426 = vmatprep.mubr.msk.bf16.mxu0 %vm6180_vm1, %v13183_v23  ;;  %v13189_v23 = vld [vmem:[%s13952_s8 + $0x2f8] sm:$0xff]  }
 0x20d   : > { %v14454_v20 = vpop.f32.mrb[76].mxu0 }
 0x20e   : > { %17093 = vst [vmem:[#allocation79_spill] sm:$0xff] %v14454_v20  ;;  %v14456_v52 = vpop.f32.mrb[77].mxu0 }
 0x20f   : > { %17094 = vst [vmem:[#allocation80_spill] sm:$0xff] %v14456_v52  ;;  %v14459_v10 = vpop.f32.mrb[78].mxu0  ;;  %v13191_v52 = vld [vmem:[%s13952_s8 + $0x300] sm:$0xff]  }
 0x210   : > { %17095 = vst [vmem:[#allocation81_spill] sm:$0xff] %v14459_v10  ;;  %v14462_v42 = vpop.f32.mrb[79].mxu0 }
 0x211   : > { %17096 = vst [vmem:[#allocation82_spill] sm:$0xff] %v14462_v42  ;;  %v13247_v42 = vld [vmem:[%s16764_s1 + $0x50] sm:$0xff]  }
 0x212   : > { %12427 = vmatmul.mubr.msk.bf16.gmra.mrb[184].mxu0 %vm6180_vm1, %v13185_v31  ;;  %v14480_v31 = vpop.f32.mrb[0].mxu1  ;;  %12758 = vmatprep.subr.bf16.mxu1 %v13247_v42 }
 0x213   : > { %12430 = vmatprep.mubr.msk.bf16.mxu0 %vm6180_vm1, %v13187_v28  ;;  %12759 = vmatpush3.bf16.msra.mxu1 %v13247_v42 }
 0x215   : > { %v14466_v0 = vpop.f32.mrb[80].mxu0 }
 0x216   : > { %17097 = vst [vmem:[#allocation83_spill] sm:$0xff] %v14466_v0  ;;  %v14468_v58 = vpop.f32.mrb[81].mxu0  ;;  %v13193_v0 = vld [vmem:[%s13952_s8 + $0x308] sm:$0xff]  }
 0x217   : > { %17098 = vst [vmem:[#allocation84_spill] sm:$0xff] %v14468_v58  ;;  %v14471_v20 = vpop.f32.mrb[82].mxu0  ;;  %v14485_v58 = vpop.f32.mrb[1].mxu1 }
 0x218   : > { %17099 = vst [vmem:[#allocation85_spill] sm:$0xff] %v14471_v20  ;;  %v14474_v34 = vpop.f32.mrb[83].mxu0 }
 0x219   : > { %17100 = vst [vmem:[#allocation86_spill] sm:$0xff] %v14474_v34  ;;  %v14490_v34 = vpop.f32.mrb[2].mxu1 }
 0x21a   : > { %12431 = vmatmul.mubr.msk.bf16.gmra.mrb[188].mxu0 %vm6180_vm1, %v13189_v23  ;;  %v14495_v23 = vpop.f32.mrb[3].mxu1 }
 0x21b   : > { %12434 = vmatprep.mubr.msk.bf16.mxu0 %vm6180_vm1, %v13191_v52  ;;  %v14499_v52 = vpop.f32.mrb[4].mxu1 }
 0x21c   : > { %v14501_v42 = vpop.f32.mrb[5].mxu1 }
 0x21d   : > { %v14483_v28 = vpop.f32.mrb[84].mxu0 }
 0x21e   : > { %17101 = vst [vmem:[#allocation87_spill] sm:$0xff] %v14483_v28  ;;  %v14487_v20 = vpop.f32.mrb[85].mxu0  ;;  %v14504_v28 = vpop.f32.mrb[6].mxu1 }
 0x21f   : > { %17102 = vst [vmem:[#allocation88_spill] sm:$0xff] %v14487_v20  ;;  %v14492_v10 = vpop.f32.mrb[86].mxu0  ;;  %v14507_v20 = vpop.f32.mrb[7].mxu1 }
 0x220   : > { %17103 = vst [vmem:[#allocation89_spill] sm:$0xff] %v14492_v10  ;;  %v14497_v12 = vpop.f32.mrb[87].mxu0  ;;  %v14509_v4 = vpop.f32.mrb[8].mxu1 }
 0x221   : > { %17104 = vst [vmem:[#allocation90_spill] sm:$0xff] %v14497_v12  ;;  %v14513_v60 = vpop.f32.mrb[9].mxu1  ;;  %v13197_v12 = vld [vmem:[%s13952_s8 + $0x318] sm:$0xff]  }
 0x222   : > { %12435 = vmatmul.mubr.msk.bf16.gmra.mrb[192].mxu0 %vm6180_vm1, %v13193_v0  ;;  %v14518_v44 = vpop.f32.mrb[10].mxu1  ;;  %v13199_v0 = vld [vmem:[%s13952_s8 + $0x320] sm:$0xff]  }
 0x223   : > { %12438 = vmatprep.mubr.msk.bf16.mxu0 %vm6180_vm1, %v13195_v16  ;;  %v14523_v32 = vpop.f32.mrb[11].mxu1 }
 0x224   : > { %v14527_v26 = vpop.f32.mrb[12].mxu1 }
 0x225   : > { %v14511_v10 = vpop.f32.mrb[88].mxu0  ;;  %v14529_v24 = vpop.f32.mrb[13].mxu1 }
 0x226   : > { %17105 = vst [vmem:[#allocation91_spill] sm:$0xff] %v14511_v10  ;;  %v14515_v48 = vpop.f32.mrb[89].mxu0  ;;  %v14532_v10 = vpop.f32.mrb[14].mxu1 }
 0x227   : > { %17106 = vst [vmem:[#allocation92_spill] sm:$0xff] %v14515_v48  ;;  %v14520_v36 = vpop.f32.mrb[90].mxu0  ;;  %v14535_v48 = vpop.f32.mrb[15].mxu1 }
 0x228   : > { %17107 = vst [vmem:[#allocation93_spill] sm:$0xff] %v14520_v36  ;;  %v14525_v16 = vpop.f32.mrb[91].mxu0  ;;  %v14537_v18 = vpop.f32.mrb[16].mxu1 }
 0x229   : > { %17108 = vst [vmem:[#allocation94_spill] sm:$0xff] %v14525_v16  ;;  %17109 = vst [vmem:[#allocation95_spill] sm:$0xff] %v14537_v18  ;;  %v14541_v15 = vpop.f32.mrb[17].mxu1  ;;  %v13201_v16 = vld [vmem:[%s13952_s8 + $0x328] sm:$0xff]  }
 0x22a   : > { %12439 = vmatmul.mubr.msk.bf16.gmra.mrb[196].mxu0 %vm6180_vm1, %v13197_v12  ;;  %17111 = vst [vmem:[#allocation97_spill] sm:$0xff] %v14541_v15  ;;  %v14546_v7 = vpop.f32.mrb[18].mxu1  ;;  %v13203_v12 = vld [vmem:[%s13952_s8 + $0x330] sm:$0xff]  }
 0x22b   : > { %12442 = vmatprep.mubr.msk.bf16.mxu0 %vm6180_vm1, %v13199_v0  ;;  %17113 = vst [vmem:[#allocation99_spill] sm:$0xff] %v14546_v7  ;;  %v14551_v62 = vpop.f32.mrb[19].mxu1 }
 0x22c   : > { %17115 = vst [vmem:[#allocation101_spill] sm:$0xff] %v14551_v62  ;;  %v14555_v56 = vpop.f32.mrb[20].mxu1 }
 0x22d   : > { %v14539_v36 = vpop.f32.mrb[92].mxu0  ;;  %17117 = vst [vmem:[#allocation103_spill] sm:$0xff] %v14555_v56  ;;  %v14557_v18 = vpop.f32.mrb[21].mxu1 }
 0x22e   : > { %17110 = vst [vmem:[#allocation96_spill] sm:$0xff] %v14539_v36  ;;  %v14543_v8 = vpop.f32.mrb[93].mxu0  ;;  %17118 = vst [vmem:[#allocation104_spill] sm:$0xff] %v14557_v18  ;;  %v14560_v36 = vpop.f32.mrb[22].mxu1 }
 0x22f   : > { %17112 = vst [vmem:[#allocation98_spill] sm:$0xff] %v14543_v8  ;;  %v14548_v2 = vpop.f32.mrb[94].mxu0  ;;  %17119 = vst [vmem:[#allocation105_spill] sm:$0xff] %v14560_v36  ;;  %v14563_v8 = vpop.f32.mrb[23].mxu1 }
 0x230   : > { %17114 = vst [vmem:[#allocation100_spill] sm:$0xff] %v14548_v2  ;;  %v14553_v0 = vpop.f32.mrb[95].mxu0  ;;  %17120 = vst [vmem:[#allocation106_spill] sm:$0xff] %v14563_v8  ;;  %v14565_v7 = vpop.f32.mrb[24].mxu1 }
 0x231   : > { %17116 = vst [vmem:[#allocation102_spill] sm:$0xff] %v14553_v0  ;;  %17121 = vst [vmem:[#allocation107_spill] sm:$0xff] %v14565_v7  ;;  %v14569_v15 = vpop.f32.mrb[25].mxu1  ;;  %v13205_v0 = vld [vmem:[%s13952_s8 + $0x338] sm:$0xff]   ;;  %v17302_v40 = vld [vmem:[#allocation97_spill] sm:$0xff] }
 0x232   : > { %12443 = vmatmul.mubr.msk.bf16.gmra.mrb[200].mxu0 %vm6180_vm1, %v13201_v16  ;;  %17123 = vst [vmem:[#allocation109_spill] sm:$0xff] %v14569_v15  ;;  %v14574_v56 = vpop.f32.mrb[26].mxu1  ;;  %v13207_v16 = vld [vmem:[%s13952_s8 + $0x340] sm:$0xff]  }
 0x233   : > { %12446 = vmatprep.mubr.msk.bf16.mxu0 %vm6180_vm1, %v13203_v12  ;;  %17125 = vst [vmem:[#allocation111_spill] sm:$0xff] %v14574_v56  ;;  %v14579_v36 = vpop.f32.mrb[27].mxu1 }
 0x234   : > { %17127 = vst [vmem:[#allocation113_spill] sm:$0xff] %v14579_v36  ;;  %v14583_v8 = vpop.f32.mrb[28].mxu1 }
 0x235   : > { %v14567_v2 = vpop.f32.mrb[96].mxu0  ;;  %17129 = vst [vmem:[#allocation115_spill] sm:$0xff] %v14583_v8  ;;  %v14585_v7 = vpop.f32.mrb[29].mxu1  ;;  %v17314_v63 = vld [vmem:[#allocation104_spill] sm:$0xff] }
 0x236   : > { %17122 = vst [vmem:[#allocation108_spill] sm:$0xff] %v14567_v2  ;;  %v14571_v62 = vpop.f32.mrb[97].mxu0  ;;  %17130 = vst [vmem:[#allocation116_spill] sm:$0xff] %v14585_v7  ;;  %v14588_v2 = vpop.f32.mrb[30].mxu1 }
 0x237   : > { %17124 = vst [vmem:[#allocation110_spill] sm:$0xff] %v14571_v62  ;;  %v14576_v18 = vpop.f32.mrb[98].mxu0  ;;  %17131 = vst [vmem:[#allocation117_spill] sm:$0xff] %v14588_v2  ;;  %v14591_v62 = vpop.f32.mrb[31].mxu1 }
 0x238   : > { %17126 = vst [vmem:[#allocation112_spill] sm:$0xff] %v14576_v18  ;;  %v14581_v12 = vpop.f32.mrb[99].mxu0  ;;  %17132 = vst [vmem:[#allocation118_spill] sm:$0xff] %v14591_v62  ;;  %v14593_v56 = vpop.f32.mrb[32].mxu1 }
 0x239   : > { %17128 = vst [vmem:[#allocation114_spill] sm:$0xff] %v14581_v12  ;;  %17133 = vst [vmem:[#allocation119_spill] sm:$0xff] %v14593_v56  ;;  %v14597_v15 = vpop.f32.mrb[33].mxu1  ;;  %v13209_v12 = vld [vmem:[%s13952_s8 + $0x348] sm:$0xff]  }
 0x23a   : > { %12447 = vmatmul.mubr.msk.bf16.gmra.mrb[204].mxu0 %vm6180_vm1, %v13205_v0  ;;  %17135 = vst [vmem:[#allocation121_spill] sm:$0xff] %v14597_v15  ;;  %v14602_v8 = vpop.f32.mrb[34].mxu1  ;;  %v13211_v0 = vld [vmem:[%s13952_s8 + $0x350] sm:$0xff]   ;;  %v13257_v15 = vld [vmem:[%s16764_s1 + $0x58] sm:$0xff]  }
 0x23b   : > { %12450 = vmatprep.mubr.msk.bf16.mxu0 %vm6180_vm1, %v13207_v16  ;;  %17137 = vst [vmem:[#allocation123_spill] sm:$0xff] %v14602_v8  ;;  %v14607_v2 = vpop.f32.mrb[35].mxu1  ;;  %12760 = vmatprep.subr.bf16.mxu1 %v13257_v15 }
 0x23c   : > { %17139 = vst [vmem:[#allocation125_spill] sm:$0xff] %v14607_v2  ;;  %v14611_v62 = vpop.f32.mrb[36].mxu1  ;;  %12761 = vmatpush3.bf16.msra.mxu1 %v13257_v15 }
 0x23d   : > { %v14595_v18 = vpop.f32.mrb[100].mxu0  ;;  %17141 = vst [vmem:[#allocation127_spill] sm:$0xff] %v14611_v62  ;;  %v14616_v56 = vpop.f32.mrb[37].mxu1 }
 0x23e   : > { %17134 = vst [vmem:[#allocation120_spill] sm:$0xff] %v14595_v18  ;;  %v14599_v36 = vpop.f32.mrb[101].mxu0  ;;  %17142 = vst [vmem:[#allocation128_spill] sm:$0xff] %v14616_v56  ;;  %v14619_v8 = vpop.f32.mrb[38].mxu1  ;;  %v13213_v18 = vld [vmem:[%s13952_s8 + $0x358] sm:$0xff]  }
 0x23f   : > { %17136 = vst [vmem:[#allocation122_spill] sm:$0xff] %v14599_v36  ;;  %v14604_v7 = vpop.f32.mrb[102].mxu0  ;;  %17143 = vst [vmem:[#allocation129_spill] sm:$0xff] %v14619_v8  ;;  %v13216_v8 = vld [vmem:[%s13952_s8 + $0x360] sm:$0xff]  }
 0x240   : > { %17138 = vst [vmem:[#allocation124_spill] sm:$0xff] %v14604_v7  ;;  %v14609_v16 = vpop.f32.mrb[103].mxu0  ;;  %v14622_v7 = vpop.f32.mrb[39].mxu1 }
 0x241   : > { %17140 = vst [vmem:[#allocation126_spill] sm:$0xff] %v14609_v16  ;;  %17144 = vst [vmem:[#allocation130_spill] sm:$0xff] %v14622_v7  ;;  %v14624_v2 = vpop.f32.mrb[40].mxu1 }
 0x242   : > { %12451 = vmatmul.mubr.msk.bf16.gmra.mrb[208].mxu0 %vm6180_vm1, %v13209_v12  ;;  %17145 = vst [vmem:[#allocation131_spill] sm:$0xff] %v14624_v2  ;;  %v14628_v16 = vpop.f32.mrb[41].mxu1 }
 0x243   : > { %12454 = vmatprep.mubr.msk.bf16.mxu0 %vm6180_vm1, %v13211_v0  ;;  %17147 = vst [vmem:[#allocation133_spill] sm:$0xff] %v14628_v16  ;;  %v14633_v56 = vpop.f32.mrb[42].mxu1 }
 0x244   : > { %17149 = vst [vmem:[#allocation135_spill] sm:$0xff] %v14633_v56  ;;  %v14638_v0 = vpop.f32.mrb[43].mxu1 }
 0x245   : > { %v14626_v62 = vpop.f32.mrb[104].mxu0  ;;  %17151 = vst [vmem:[#allocation137_spill] sm:$0xff] %v14638_v0  ;;  %v14642_v15 = vpop.f32.mrb[44].mxu1 }
 0x246   : > { %17146 = vst [vmem:[#allocation132_spill] sm:$0xff] %v14626_v62  ;;  %v14630_v36 = vpop.f32.mrb[105].mxu0  ;;  %17153 = vst [vmem:[#allocation139_spill] sm:$0xff] %v14642_v15  ;;  %v14644_v2 = vpop.f32.mrb[45].mxu1 }
 0x247   : > { %17148 = vst [vmem:[#allocation134_spill] sm:$0xff] %v14630_v36  ;;  %v14635_v12 = vpop.f32.mrb[106].mxu0  ;;  %17154 = vst [vmem:[#allocation140_spill] sm:$0xff] %v14644_v2  ;;  %v14647_v16 = vpop.f32.mrb[46].mxu1 }
 0x248   : > { %17150 = vst [vmem:[#allocation136_spill] sm:$0xff] %v14635_v12  ;;  %v14640_v7 = vpop.f32.mrb[107].mxu0  ;;  %17155 = vst [vmem:[#allocation141_spill] sm:$0xff] %v14647_v16  ;;  %v14650_v36 = vpop.f32.mrb[47].mxu1 }
 0x249   : > { %17152 = vst [vmem:[#allocation138_spill] sm:$0xff] %v14640_v7  ;;  %17156 = vst [vmem:[#allocation142_spill] sm:$0xff] %v14650_v36  ;;  %v14652_v56 = vpop.f32.mrb[48].mxu1  ;;  %v13218_v7 = vld [vmem:[%s13952_s8 + $0x368] sm:$0xff]  }
 0x24a   : > { %12455 = vmatmul.mubr.msk.bf16.gmra.mrb[212].mxu0 %vm6180_vm1, %v13213_v18  ;;  %17157 = vst [vmem:[#allocation143_spill] sm:$0xff] %v14652_v56  ;;  %v14656_v62 = vpop.f32.mrb[49].mxu1  ;;  %v13220_v18 = vld [vmem:[%s13952_s8 + $0x370] sm:$0xff]  }
 0x24b   : > { %12458 = vmatprep.mubr.msk.bf16.mxu0 %vm6180_vm1, %v13216_v8  ;;  %17159 = vst [vmem:[#allocation145_spill] sm:$0xff] %v14656_v62  ;;  %v14661_v15 = vpop.f32.mrb[50].mxu1 }
 0x24c   : > { %17161 = vst [vmem:[#allocation147_spill] sm:$0xff] %v14661_v15  ;;  %v14666_v16 = vpop.f32.mrb[51].mxu1 }
 0x24d   : > { %v14654_v12 = vpop.f32.mrb[108].mxu0  ;;  %17163 = vst [vmem:[#allocation149_spill] sm:$0xff] %v14666_v16  ;;  %v14670_v36 = vpop.f32.mrb[52].mxu1 }
 0x24e   : > { %17158 = vst [vmem:[#allocation144_spill] sm:$0xff] %v14654_v12  ;;  %v14658_v0 = vpop.f32.mrb[109].mxu0  ;;  %17165 = vst [vmem:[#allocation151_spill] sm:$0xff] %v14670_v36  ;;  %v14672_v56 = vpop.f32.mrb[53].mxu1 }
 0x24f   : > { %17160 = vst [vmem:[#allocation146_spill] sm:$0xff] %v14658_v0  ;;  %v14663_v2 = vpop.f32.mrb[110].mxu0  ;;  %17166 = vst [vmem:[#allocation152_spill] sm:$0xff] %v14672_v56  ;;  %v14675_v62 = vpop.f32.mrb[54].mxu1 }
 0x250   : > { %17162 = vst [vmem:[#allocation148_spill] sm:$0xff] %v14663_v2  ;;  %v14668_v8 = vpop.f32.mrb[111].mxu0  ;;  %17167 = vst [vmem:[#allocation153_spill] sm:$0xff] %v14675_v62  ;;  %v14678_v0 = vpop.f32.mrb[55].mxu1 }
 0x251   : > { %17164 = vst [vmem:[#allocation150_spill] sm:$0xff] %v14668_v8  ;;  %17168 = vst [vmem:[#allocation154_spill] sm:$0xff] %v14678_v0  ;;  %v14680_v15 = vpop.f32.mrb[56].mxu1  ;;  %v13222_v8 = vld [vmem:[%s13952_s8 + $0x378] sm:$0xff]  }
 0x252   : > { %12459 = vmatmul.mubr.msk.bf16.gmra.mrb[216].mxu0 %vm6180_vm1, %v13218_v7  ;;  %17169 = vst [vmem:[#allocation155_spill] sm:$0xff] %v14680_v15  ;;  %v14684_v12 = vpop.f32.mrb[57].mxu1  ;;  %v13224_v7 = vld [vmem:[%s13952_s8 + $0x380] sm:$0xff]  }
 0x253   : > { %12462 = vmatprep.mubr.msk.bf16.mxu0 %vm6180_vm1, %v13220_v18  ;;  %17171 = vst [vmem:[#allocation157_spill] sm:$0xff] %v14684_v12  ;;  %v14689_v36 = vpop.f32.mrb[58].mxu1 }
 0x254   : > { %17173 = vst [vmem:[#allocation159_spill] sm:$0xff] %v14689_v36  ;;  %v14694_v62 = vpop.f32.mrb[59].mxu1 }
 0x255   : > { %v14682_v2 = vpop.f32.mrb[112].mxu0  ;;  %17175 = vst [vmem:[#allocation161_spill] sm:$0xff] %v14694_v62  ;;  %v14698_v0 = vpop.f32.mrb[60].mxu1 }
 0x256   : > { %17170 = vst [vmem:[#allocation156_spill] sm:$0xff] %v14682_v2  ;;  %v14686_v16 = vpop.f32.mrb[113].mxu0  ;;  %17177 = vst [vmem:[#allocation163_spill] sm:$0xff] %v14698_v0  ;;  %v14700_v15 = vpop.f32.mrb[61].mxu1 }
 0x257   : > { %17172 = vst [vmem:[#allocation158_spill] sm:$0xff] %v14686_v16  ;;  %v14691_v56 = vpop.f32.mrb[114].mxu0  ;;  %17178 = vst [vmem:[#allocation164_spill] sm:$0xff] %v14700_v15  ;;  %v14703_v12 = vpop.f32.mrb[62].mxu1 }
 0x258   : > { %17174 = vst [vmem:[#allocation160_spill] sm:$0xff] %v14691_v56  ;;  %v14696_v18 = vpop.f32.mrb[115].mxu0  ;;  %17179 = vst [vmem:[#allocation165_spill] sm:$0xff] %v14703_v12  ;;  %v14706_v16 = vpop.f32.mrb[63].mxu1 }
 0x259   : > { %17176 = vst [vmem:[#allocation162_spill] sm:$0xff] %v14696_v18  ;;  %17180 = vst [vmem:[#allocation166_spill] sm:$0xff] %v14706_v16  ;;  %v14708_v36 = vpop.f32.mrb[64].mxu1  ;;  %v13226_v18 = vld [vmem:[%s13952_s8 + $0x388] sm:$0xff]  }
 0x25a   : > { %12463 = vmatmul.mubr.msk.bf16.gmra.mrb[220].mxu0 %vm6180_vm1, %v13222_v8  ;;  %17181 = vst [vmem:[#allocation167_spill] sm:$0xff] %v14708_v36  ;;  %v14712_v2 = vpop.f32.mrb[65].mxu1  ;;  %v13228_v8 = vld [vmem:[%s13952_s8 + $0x390] sm:$0xff]  }
 0x25b   : > { %12466 = vmatprep.mubr.msk.bf16.mxu0 %vm6180_vm1, %v13224_v7  ;;  %17183 = vst [vmem:[#allocation169_spill] sm:$0xff] %v14712_v2  ;;  %v14717_v0 = vpop.f32.mrb[66].mxu1 }
 0x25c   : > { %17185 = vst [vmem:[#allocation171_spill] sm:$0xff] %v14717_v0  ;;  %v14722_v12 = vpop.f32.mrb[67].mxu1 }
 0x25d   : > { %v14710_v56 = vpop.f32.mrb[116].mxu0  ;;  %17187 = vst [vmem:[#allocation173_spill] sm:$0xff] %v14722_v12  ;;  %v14726_v16 = vpop.f32.mrb[68].mxu1 }
 0x25e   : > { %17182 = vst [vmem:[#allocation168_spill] sm:$0xff] %v14710_v56  ;;  %v14714_v62 = vpop.f32.mrb[117].mxu0  ;;  %17189 = vst [vmem:[#allocation175_spill] sm:$0xff] %v14726_v16  ;;  %v14728_v36 = vpop.f32.mrb[69].mxu1 }
 0x25f   : > { %17184 = vst [vmem:[#allocation170_spill] sm:$0xff] %v14714_v62  ;;  %v14719_v15 = vpop.f32.mrb[118].mxu0  ;;  %17190 = vst [vmem:[#allocation176_spill] sm:$0xff] %v14728_v36  ;;  %v14731_v2 = vpop.f32.mrb[70].mxu1 }
 0x260   : > { %17186 = vst [vmem:[#allocation172_spill] sm:$0xff] %v14719_v15  ;;  %v14724_v7 = vpop.f32.mrb[119].mxu0  ;;  %17191 = vst [vmem:[#allocation177_spill] sm:$0xff] %v14731_v2  ;;  %v14734_v62 = vpop.f32.mrb[71].mxu1 }
 0x261   : > { %17188 = vst [vmem:[#allocation174_spill] sm:$0xff] %v14724_v7  ;;  %17192 = vst [vmem:[#allocation178_spill] sm:$0xff] %v14734_v62  ;;  %v14736_v0 = vpop.f32.mrb[72].mxu1  ;;  %v13230_v7 = vld [vmem:[%s13952_s8 + $0x398] sm:$0xff]  }
 0x262   : > { %12467 = vmatmul.mubr.msk.bf16.gmra.mrb[224].mxu0 %vm6180_vm1, %v13226_v18  ;;  %17193 = vst [vmem:[#allocation179_spill] sm:$0xff] %v14736_v0  ;;  %v14740_v56 = vpop.f32.mrb[73].mxu1  ;;  %v13232_v18 = vld [vmem:[%s13952_s8 + $0x3a0] sm:$0xff]  }
 0x263   : > { %12470 = vmatprep.mubr.msk.bf16.mxu0 %vm6180_vm1, %v13228_v8  ;;  %17195 = vst [vmem:[#allocation181_spill] sm:$0xff] %v14740_v56  ;;  %v14745_v16 = vpop.f32.mrb[74].mxu1  ;;  %v13268_v0 = vld [vmem:[%s16764_s1 + $0x60] sm:$0xff]  }
 0x264   : > { %17197 = vst [vmem:[#allocation183_spill] sm:$0xff] %v14745_v16  ;;  %v14750_v2 = vpop.f32.mrb[75].mxu1  ;;  %12762 = vmatprep.subr.bf16.mxu1 %v13268_v0 }
 0x265   : > { %v14738_v15 = vpop.f32.mrb[120].mxu0  ;;  %17199 = vst [vmem:[#allocation185_spill] sm:$0xff] %v14750_v2  ;;  %v14757_v62 = vpop.f32.mrb[76].mxu1  ;;  %12763 = vmatpush3.bf16.msra.mxu1 %v13268_v0 }
 0x266   : > { %17194 = vst [vmem:[#allocation180_spill] sm:$0xff] %v14738_v15  ;;  %v14742_v12 = vpop.f32.mrb[121].mxu0  ;;  %17201 = vst [vmem:[#allocation187_spill] sm:$0xff] %v14757_v62  ;;  %v14759_v56 = vpop.f32.mrb[77].mxu1  ;;  %v13234_v62 = vld [vmem:[%s13952_s8 + $0x3a8] sm:$0xff]  }
 0x267   : > { %17196 = vst [vmem:[#allocation182_spill] sm:$0xff] %v14742_v12  ;;  %v14747_v36 = vpop.f32.mrb[122].mxu0  ;;  %17202 = vst [vmem:[#allocation188_spill] sm:$0xff] %v14759_v56  ;;  %v14762_v16 = vpop.f32.mrb[78].mxu1 }
 0x268   : > { %17198 = vst [vmem:[#allocation184_spill] sm:$0xff] %v14747_v36  ;;  %v14752_v8 = vpop.f32.mrb[123].mxu0  ;;  %17203 = vst [vmem:[#allocation189_spill] sm:$0xff] %v14762_v16  ;;  %v14765_v2 = vpop.f32.mrb[79].mxu1  ;;  %v13237_v16 = vld [vmem:[%s13952_s8 + $0x3b0] sm:$0xff]  }
 0x269   : > { %17200 = vst [vmem:[#allocation186_spill] sm:$0xff] %v14752_v8  ;;  %17204 = vst [vmem:[#allocation190_spill] sm:$0xff] %v14765_v2  ;;  %v14767_v8 = vpop.f32.mrb[80].mxu1 }
 0x26a   : > { %12471 = vmatmul.mubr.msk.bf16.gmra.mrb[228].mxu0 %vm6180_vm1, %v13230_v7  ;;  %17205 = vst [vmem:[#allocation191_spill] sm:$0xff] %v14767_v8  ;;  %v14771_v12 = vpop.f32.mrb[81].mxu1 }
 0x26b   : > { %12474 = vmatprep.mubr.msk.bf16.mxu0 %vm6180_vm1, %v13232_v18  ;;  %17207 = vst [vmem:[#allocation193_spill] sm:$0xff] %v14771_v12  ;;  %v14776_v56 = vpop.f32.mrb[82].mxu1 }
 0x26c   : > { %17209 = vst [vmem:[#allocation195_spill] sm:$0xff] %v14776_v56  ;;  %v14781_v54 = vpop.f32.mrb[83].mxu1 }
 0x26d   : > { %v14769_v36 = vpop.f32.mrb[124].mxu0  ;;  %17211 = vst [vmem:[#allocation197_spill] sm:$0xff] %v14781_v54  ;;  %v14785_v18 = vpop.f32.mrb[84].mxu1 }
 0x26e   : > { %17206 = vst [vmem:[#allocation192_spill] sm:$0xff] %v14769_v36  ;;  %v14773_v15 = vpop.f32.mrb[125].mxu0  ;;  %17213 = vst [vmem:[#allocation199_spill] sm:$0xff] %v14785_v18  ;;  %v14787_v8 = vpop.f32.mrb[85].mxu1  ;;  %v17443_v36 = vld [vmem:[#allocation126_spill] sm:$0xff] }
 0x26f   : > { %17208 = vst [vmem:[#allocation194_spill] sm:$0xff] %v14773_v15  ;;  %v14778_v7 = vpop.f32.mrb[126].mxu0  ;;  %17214 = vst [vmem:[#allocation200_spill] sm:$0xff] %v14787_v8  ;;  %v14790_v12 = vpop.f32.mrb[86].mxu1  ;;  %v13239_v8 = vld [vmem:[%s13952_s8 + $0x3b8] sm:$0xff]  }
 0x270   : > { %17210 = vst [vmem:[#allocation196_spill] sm:$0xff] %v14778_v7  ;;  %v14783_v0 = vpop.f32.mrb[127].mxu0  ;;  %17215 = vst [vmem:[#allocation201_spill] sm:$0xff] %v14790_v12  ;;  %v14793_v56 = vpop.f32.mrb[87].mxu1 }
 0x271   : > { %17212 = vst [vmem:[#allocation198_spill] sm:$0xff] %v14783_v0  ;;  %17216 = vst [vmem:[#allocation202_spill] sm:$0xff] %v14793_v56  ;;  %v14795_v2 = vpop.f32.mrb[88].mxu1  ;;  %v13240_v56 = vld [vmem:[%s13952_s8 + $0x3c0] sm:$0xff]  }
 0x272   : > { %12475 = vmatmul.mubr.msk.bf16.gmra.mrb[232].mxu0 %vm6180_vm1, %v13234_v62  ;;  %17217 = vst [vmem:[#allocation203_spill] sm:$0xff] %v14795_v2  ;;  %v14799_v54 = vpop.f32.mrb[89].mxu1 }
 0x273   : > { %12478 = vmatprep.mubr.msk.bf16.mxu0 %vm6180_vm1, %v13237_v16  ;;  %17219 = vst [vmem:[#allocation205_spill] sm:$0xff] %v14799_v54  ;;  %v14806_v15 = vpop.f32.mrb[90].mxu1 }
 0x274   : > { %17221 = vst [vmem:[#allocation207_spill] sm:$0xff] %v14806_v15  ;;  %v14813_v2 = vpop.f32.mrb[91].mxu1 }
 0x275   : > { %v14797_v7 = vpop.f32.mrb[128].mxu0  ;;  %17223 = vst [vmem:[#allocation209_spill] sm:$0xff] %v14813_v2  ;;  %v14819_v0 = vpop.f32.mrb[92].mxu1 }
 0x276   : > { %17218 = vst [vmem:[#allocation204_spill] sm:$0xff] %v14797_v7  ;;  %v14803_v18 = vpop.f32.mrb[129].mxu0  ;;  %17225 = vst [vmem:[#allocation211_spill] sm:$0xff] %v14819_v0  ;;  %v14823_v7 = vpop.f32.mrb[93].mxu1 }
 0x277   : > { %17220 = vst [vmem:[#allocation206_spill] sm:$0xff] %v14803_v18  ;;  %v14810_v16 = vpop.f32.mrb[130].mxu0  ;;  %17226 = vst [vmem:[#allocation212_spill] sm:$0xff] %v14823_v7  ;;  %v14826_v62 = vpop.f32.mrb[94].mxu1  ;;  %v13241_v7 = vld [vmem:[%s13952_s8 + $0x3c8] sm:$0xff]  }
 0x278   : > { %17222 = vst [vmem:[#allocation208_spill] sm:$0xff] %v14810_v16  ;;  %v14817_v12 = vpop.f32.mrb[131].mxu0  ;;  %17227 = vst [vmem:[#allocation213_spill] sm:$0xff] %v14826_v62  ;;  %v14829_v2 = vpop.f32.mrb[95].mxu1 }
 0x279   : > { %17224 = vst [vmem:[#allocation210_spill] sm:$0xff] %v14817_v12  ;;  %17228 = vst [vmem:[#allocation214_spill] sm:$0xff] %v14829_v2  ;;  %v14831_v18 = vpop.f32.mrb[96].mxu1  ;;  %v13242_v2 = vld [vmem:[%s13952_s8 + $0x3d0] sm:$0xff]  }
 0x27a   : > { %12479 = vmatmul.mubr.msk.bf16.gmra.mrb[236].mxu0 %vm6180_vm1, %v13239_v8  ;;  %17229 = vst [vmem:[#allocation215_spill] sm:$0xff] %v14831_v18  ;;  %v14835_v16 = vpop.f32.mrb[97].mxu1 }
 0x27b   : > { %12482 = vmatprep.mubr.msk.bf16.mxu0 %vm6180_vm1, %v13240_v56  ;;  %17231 = vst [vmem:[#allocation217_spill] sm:$0xff] %v14835_v16  ;;  %v14842_v12 = vpop.f32.mrb[98].mxu1 }
 0x27c   : > { %17233 = vst [vmem:[#allocation219_spill] sm:$0xff] %v14842_v12  ;;  %v14849_v18 = vpop.f32.mrb[99].mxu1 }
 0x27d   : > { %v14833_v54 = vpop.f32.mrb[132].mxu0  ;;  %17235 = vst [vmem:[#allocation221_spill] sm:$0xff] %v14849_v18  ;;  %v14855_v0 = vpop.f32.mrb[100].mxu1 }
 0x27e   : > { %17230 = vst [vmem:[#allocation216_spill] sm:$0xff] %v14833_v54  ;;  %v14839_v15 = vpop.f32.mrb[133].mxu0  ;;  %17237 = vst [vmem:[#allocation223_spill] sm:$0xff] %v14855_v0  ;;  %v14859_v54 = vpop.f32.mrb[101].mxu1 }
 0x27f   : > { %17232 = vst [vmem:[#allocation218_spill] sm:$0xff] %v14839_v15  ;;  %v14846_v56 = vpop.f32.mrb[134].mxu0  ;;  %17238 = vst [vmem:[#allocation224_spill] sm:$0xff] %v14859_v54  ;;  %v14862_v8 = vpop.f32.mrb[102].mxu1  ;;  %v13243_v54 = vld [vmem:[%s13952_s8 + $0x3d8] sm:$0xff]  }
 0x280   : > { %17234 = vst [vmem:[#allocation220_spill] sm:$0xff] %v14846_v56  ;;  %v14853_v62 = vpop.f32.mrb[135].mxu0  ;;  %17239 = vst [vmem:[#allocation225_spill] sm:$0xff] %v14862_v8  ;;  %v14865_v18 = vpop.f32.mrb[103].mxu1 }
 0x281   : > { %17236 = vst [vmem:[#allocation222_spill] sm:$0xff] %v14853_v62  ;;  %17240 = vst [vmem:[#allocation226_spill] sm:$0xff] %v14865_v18  ;;  %v14867_v15 = vpop.f32.mrb[104].mxu1  ;;  %v13244_v18 = vld [vmem:[%s13952_s8 + $0x3e0] sm:$0xff]  }
 0x282   : > { %12483 = vmatmul.mubr.msk.bf16.gmra.mrb[240].mxu0 %vm6180_vm1, %v13241_v7  ;;  %17241 = vst [vmem:[#allocation227_spill] sm:$0xff] %v14867_v15  ;;  %v14871_v56 = vpop.f32.mrb[105].mxu1 }
 0x283   : > { %12486 = vmatprep.mubr.msk.bf16.mxu0 %vm6180_vm1, %v13242_v2  ;;  %17243 = vst [vmem:[#allocation229_spill] sm:$0xff] %v14871_v56  ;;  %v14878_v62 = vpop.f32.mrb[106].mxu1 }
 0x284   : > { %17245 = vst [vmem:[#allocation231_spill] sm:$0xff] %v14878_v62  ;;  %v14885_v15 = vpop.f32.mrb[107].mxu1 }
 0x285   : > { %v14869_v16 = vpop.f32.mrb[136].mxu0  ;;  %17247 = vst [vmem:[#allocation233_spill] sm:$0xff] %v14885_v15  ;;  %v14891_v0 = vpop.f32.mrb[108].mxu1 }
 0x286   : > { %17242 = vst [vmem:[#allocation228_spill] sm:$0xff] %v14869_v16  ;;  %v14875_v12 = vpop.f32.mrb[137].mxu0  ;;  %17249 = vst [vmem:[#allocation235_spill] sm:$0xff] %v14891_v0  ;;  %v14895_v16 = vpop.f32.mrb[109].mxu1 }
 0x287   : > { %17244 = vst [vmem:[#allocation230_spill] sm:$0xff] %v14875_v12  ;;  %v14882_v2 = vpop.f32.mrb[138].mxu0  ;;  %17250 = vst [vmem:[#allocation236_spill] sm:$0xff] %v14895_v16  ;;  %v14898_v7 = vpop.f32.mrb[110].mxu1  ;;  %v13245_v16 = vld [vmem:[%s13952_s8 + $0x3e8] sm:$0xff]  }
 0x288   : > { %17246 = vst [vmem:[#allocation232_spill] sm:$0xff] %v14882_v2  ;;  %v14889_v8 = vpop.f32.mrb[139].mxu0  ;;  %17251 = vst [vmem:[#allocation237_spill] sm:$0xff] %v14898_v7  ;;  %v14901_v15 = vpop.f32.mrb[111].mxu1 }
 0x289   : > { %17248 = vst [vmem:[#allocation234_spill] sm:$0xff] %v14889_v8  ;;  %17252 = vst [vmem:[#allocation238_spill] sm:$0xff] %v14901_v15  ;;  %v14903_v12 = vpop.f32.mrb[112].mxu1  ;;  %v13246_v15 = vld [vmem:[%s13952_s8 + $0x3f0] sm:$0xff]  }
 0x28a   : > { %12487 = vmatmul.mubr.msk.bf16.gmra.mrb[244].mxu0 %vm6180_vm1, %v13243_v54  ;;  %17253 = vst [vmem:[#allocation239_spill] sm:$0xff] %v14903_v12  ;;  %v14907_v2 = vpop.f32.mrb[113].mxu1  ;;  %v13279_v12 = vld [vmem:[%s16764_s1 + $0x68] sm:$0xff]  }
 0x28b   : > { %12490 = vmatprep.mubr.msk.bf16.mxu0 %vm6180_vm1, %v13244_v18  ;;  %17255 = vst [vmem:[#allocation241_spill] sm:$0xff] %v14907_v2  ;;  %v14914_v8 = vpop.f32.mrb[114].mxu1  ;;  %12764 = vmatprep.subr.bf16.mxu1 %v13279_v12 }
 0x28c   : > { %17257 = vst [vmem:[#allocation243_spill] sm:$0xff] %v14914_v8  ;;  %v14924_v7 = vpop.f32.mrb[115].mxu1  ;;  %12765 = vmatpush3.bf16.msra.mxu1 %v13279_v12 }
 0x28d   : > { %v14905_v56 = vpop.f32.mrb[140].mxu0  ;;  %17259 = vst [vmem:[#allocation245_spill] sm:$0xff] %v14924_v7 }
 0x28e   : > { %17254 = vst [vmem:[#allocation240_spill] sm:$0xff] %v14905_v56  ;;  %v14911_v62 = vpop.f32.mrb[141].mxu0  ;;  %v14930_v56 = vpop.f32.mrb[116].mxu1 }
 0x28f   : > { %17256 = vst [vmem:[#allocation242_spill] sm:$0xff] %v14911_v62  ;;  %v14918_v18 = vpop.f32.mrb[142].mxu0  ;;  %17261 = vst [vmem:[#allocation247_spill] sm:$0xff] %v14930_v56  ;;  %v14934_v8 = vpop.f32.mrb[117].mxu1 }
 0x290   : > { %17258 = vst [vmem:[#allocation244_spill] sm:$0xff] %v14918_v18  ;;  %v14928_v2 = vpop.f32.mrb[143].mxu0  ;;  %17262 = vst [vmem:[#allocation248_spill] sm:$0xff] %v14934_v8  ;;  %v14937_v62 = vpop.f32.mrb[118].mxu1  ;;  %v13248_v8 = vld [vmem:[%s13952_s8 + $0x3f8] sm:$0xff]  }
 0x291   : > { %17260 = vst [vmem:[#allocation246_spill] sm:$0xff] %v14928_v2  ;;  %17263 = vst [vmem:[#allocation249_spill] sm:$0xff] %v14937_v62  ;;  %v14940_v0 = vpop.f32.mrb[119].mxu1 }
 0x292   : > { %12491 = vmatmul.mubr.msk.bf16.gmra.mrb[248].mxu0 %vm6180_vm1, %v13245_v16  ;;  %17264 = vst [vmem:[#allocation250_spill] sm:$0xff] %v14940_v0  ;;  %v14942_v7 = vpop.f32.mrb[120].mxu1  ;;  %v13249_v0 = vld [vmem:[%s13952_s8 + $0x400] sm:$0xff]  }
 0x293   : > { %12494 = vmatprep.mubr.msk.bf16.mxu0 %vm6180_vm1, %v13246_v15  ;;  %17265 = vst [vmem:[#allocation251_spill] sm:$0xff] %v14942_v7  ;;  %v14946_v56 = vpop.f32.mrb[121].mxu1 }
 0x294   : > { %17267 = vst [vmem:[#allocation253_spill] sm:$0xff] %v14946_v56  ;;  %v14953_v16 = vpop.f32.mrb[122].mxu1 }
 0x295   : > { %v14944_v18 = vpop.f32.mrb[144].mxu0  ;;  %17269 = vst [vmem:[#allocation255_spill] sm:$0xff] %v14953_v16  ;;  %v14960_v7 = vpop.f32.mrb[123].mxu1  ;;  %v13252_v16 = vld [vmem:[%s13952_s8 + $0x418] sm:$0xff]  }
 0x296   : > { %17266 = vst [vmem:[#allocation252_spill] sm:$0xff] %v14944_v18  ;;  %v14950_v2 = vpop.f32.mrb[145].mxu0  ;;  %17271 = vst [vmem:[#allocation257_spill] sm:$0xff] %v14960_v7  ;;  %v14966_v54 = vpop.f32.mrb[124].mxu1 }
 0x297   : > { %17268 = vst [vmem:[#allocation254_spill] sm:$0xff] %v14950_v2  ;;  %v14957_v15 = vpop.f32.mrb[146].mxu0  ;;  %17273 = vst [vmem:[#allocation259_spill] sm:$0xff] %v14966_v54  ;;  %v14970_v18 = vpop.f32.mrb[125].mxu1  ;;  %v13250_v54 = vld [vmem:[%s13952_s8 + $0x408] sm:$0xff]  }
 0x298   : > { %17270 = vst [vmem:[#allocation256_spill] sm:$0xff] %v14957_v15  ;;  %v14964_v62 = vpop.f32.mrb[147].mxu0  ;;  %17274 = vst [vmem:[#allocation260_spill] sm:$0xff] %v14970_v18  ;;  %v14973_v12 = vpop.f32.mrb[126].mxu1 }
 0x299   : > { %17272 = vst [vmem:[#allocation258_spill] sm:$0xff] %v14964_v62  ;;  %17275 = vst [vmem:[#allocation261_spill] sm:$0xff] %v14973_v12  ;;  %v14976_v7 = vpop.f32.mrb[127].mxu1 }
 0x29a   : > { %12495 = vmatmul.mubr.msk.bf16.gmra.mrb[252].mxu0 %vm6180_vm1, %v13248_v8  ;;  %17276 = vst [vmem:[#allocation262_spill] sm:$0xff] %v14976_v7  ;;  %v13251_v8 = vld [vmem:[%s13952_s8 + $0x410] sm:$0xff]   ;;  %v14994_v7 = vpop.f32.mrb[128].mxu1 }
 0x29b   : > { %12498 = vmatprep.mubr.msk.bf16.mxu0 %vm6180_vm1, %v13249_v0  ;;  %v15000_v13 = vpop.f32.mrb[129].mxu1 }
 0x29c   : > { %v15005_v12 = vpop.f32.mrb[130].mxu1 }
 0x29d   : > { %v14978_v2 = vpop.f32.mrb[148].mxu0  ;;  %v15010_v17 = vpop.f32.mrb[131].mxu1 }
 0x29e   : > { %17277 = vst [vmem:[#allocation263_spill] sm:$0xff] %v14978_v2  ;;  %v14982_v15 = vpop.f32.mrb[149].mxu0  ;;  %v15030_v56 = vpop.f32.mrb[132].mxu1 }
 0x29f   : > { %17278 = vst [vmem:[#allocation264_spill] sm:$0xff] %v14982_v15  ;;  %v14987_v18 = vpop.f32.mrb[150].mxu0  ;;  %v13253_v15 = vld [vmem:[%s13952_s8 + $0x420] sm:$0xff]   ;;  %v15036_v21 = vpop.f32.mrb[133].mxu1 }
 0x2a0   : > { %17279 = vst [vmem:[#allocation265_spill] sm:$0xff] %v14987_v18  ;;  %v14992_v0 = vpop.f32.mrb[151].mxu0  ;;  %v15041_v18 = vpop.f32.mrb[134].mxu1 }
 0x2a1   : > { %17280 = vst [vmem:[#allocation266_spill] sm:$0xff] %v14992_v0  ;;  %v15046_v25 = vpop.f32.mrb[135].mxu1 }
 0x2a2   : > { %12499 = vmatmul.mubr.msk.bf16.gmra.mrb[0].mxu0 %vm6180_vm1, %v13250_v54  ;;  %v15066_v54 = vpop.f32.mrb[136].mxu1 }
 0x2a3   : > { %12502 = vmatprep.mubr.msk.bf16.mxu0 %vm6180_vm1, %v13251_v8  ;;  %v15072_v29 = vpop.f32.mrb[137].mxu1 }
 0x2a5   : > { %v15014_v2 = vpop.f32.mrb[152].mxu0 }
 0x2a6   : > { %17281 = vst [vmem:[#allocation267_spill] sm:$0xff] %v15014_v2  ;;  %v15018_v0 = vpop.f32.mrb[153].mxu0 }
 0x2a7   : > { %17282 = vst [vmem:[#allocation268_spill] sm:$0xff] %v15018_v0  ;;  %v15023_v8 = vpop.f32.mrb[154].mxu0  ;;  %v13255_v0 = vld [vmem:[%s13952_s8 + $0x430] sm:$0xff]  }
 0x2a8   : > { %17283 = vst [vmem:[#allocation269_spill] sm:$0xff] %v15023_v8  ;;  %v15028_v14 = vpop.f32.mrb[155].mxu0  ;;  %v15077_v8 = vpop.f32.mrb[138].mxu1 }
 0x2a9   : > { %17284 = vst [vmem:[#allocation270_spill] sm:$0xff] %v15028_v14  ;;  %v15082_v33 = vpop.f32.mrb[139].mxu1 }
 0x2aa   : > { %12503 = vmatmul.mubr.msk.bf16.gmra.mrb[4].mxu0 %vm6180_vm1, %v13252_v16  ;;  %v15105_v62 = vpop.f32.mrb[140].mxu1  ;;  %v13259_v16 = vld [vmem:[%s13952_s8 + $0x448] sm:$0xff]  }
 0x2ab   : > { %12506 = vmatprep.mubr.msk.bf16.mxu0 %vm6180_vm1, %v13253_v15 }
 0x2ad   : > { %v15050_v2 = vpop.f32.mrb[156].mxu0 }
 0x2ae   : > { %17285 = vst [vmem:[#allocation271_spill] sm:$0xff] %v15050_v2  ;;  %v15054_v14 = vpop.f32.mrb[157].mxu0 }
 0x2af   : > { %17286 = vst [vmem:[#allocation272_spill] sm:$0xff] %v15054_v14  ;;  %v15059_v15 = vpop.f32.mrb[158].mxu0  ;;  %v13258_v14 = vld [vmem:[%s13952_s8 + $0x440] sm:$0xff]  }
 0x2b0   : > { %17287 = vst [vmem:[#allocation273_spill] sm:$0xff] %v15059_v15  ;;  %v15064_v22 = vpop.f32.mrb[159].mxu0  ;;  %v15111_v15 = vpop.f32.mrb[141].mxu1 }
 0x2b1   : > { %17288 = vst [vmem:[#allocation274_spill] sm:$0xff] %v15064_v22 }
 0x2b2   : > { %12507 = vmatmul.mubr.msk.bf16.gmra.mrb[8].mxu0 %vm6180_vm1, %v13254_v19 }
 0x2b3   : > { %12510 = vmatprep.mubr.msk.bf16.mxu0 %vm6180_vm1, %v13255_v0  ;;  %v13290_v0 = vld [vmem:[%s16764_s1 + $0x70] sm:$0xff]  }
 0x2b4   : > { %12766 = vmatprep.subr.bf16.mxu1 %v13290_v0 }
 0x2b5   : > { %v15086_v2 = vpop.f32.mrb[160].mxu0  ;;  %12767 = vmatpush3.bf16.msra.mxu1 %v13290_v0 }
 0x2b6   : > { %17289 = vst [vmem:[#allocation275_spill] sm:$0xff] %v15086_v2  ;;  %v15090_v22 = vpop.f32.mrb[161].mxu0 }
 0x2b7   : > { %17290 = vst [vmem:[#allocation276_spill] sm:$0xff] %v15090_v22  ;;  %v15098_v35 = vpop.f32.mrb[162].mxu0 }
 0x2b8   : > { %17291 = vst [vmem:[#allocation277_spill] sm:$0xff] %v15098_v35  ;;  %v15103_v30 = vpop.f32.mrb[163].mxu0  ;;  %v15116_v35 = vpop.f32.mrb[142].mxu1 }
 0x2b9   : > { %17292 = vst [vmem:[#allocation278_spill] sm:$0xff] %v15103_v30  ;;  %v15121_v19 = vpop.f32.mrb[143].mxu1 }
 0x2ba   : > { %12511 = vmatmul.mubr.msk.bf16.gmra.mrb[12].mxu0 %vm6180_vm1, %v13256_v27  ;;  %v15141_v2 = vpop.f32.mrb[144].mxu1  ;;  %v17304_v27 = vld [vmem:[#allocation101_spill] sm:$0xff] }
 0x2bb   : > { %12514 = vmatprep.mubr.msk.bf16.mxu0 %vm6180_vm1, %v13258_v14  ;;  %v15147_v5 = vpop.f32.mrb[145].mxu1 }
 0x2bc   : > { %v15152_v11 = vpop.f32.mrb[146].mxu1 }
 0x2bd   : > { %v15125_v30 = vpop.f32.mrb[164].mxu0  ;;  %v15157_v22 = vpop.f32.mrb[147].mxu1 }
 0x2be   : > { %17293 = vst [vmem:[#allocation279_spill] sm:$0xff] %v15125_v30  ;;  %v15129_v50 = vpop.f32.mrb[165].mxu0  ;;  %v17301_v30 = vld [vmem:[#allocation95_spill] sm:$0xff] }
 0x2bf   : > { %17295 = vst [vmem:[#allocation280_spill] sm:$0xff] %v15129_v50  ;;  %v15134_v14 = vpop.f32.mrb[166].mxu0  ;;  %v13261_v50 = vld [vmem:[%s13952_s8 + $0x458] sm:$0xff]  }
 0x2c0   : > { %17297 = vst [vmem:[#allocation281_spill] sm:$0xff] %v15134_v14  ;;  %v15139_v9 = vpop.f32.mrb[167].mxu0  ;;  %v17303_v14 = vld [vmem:[#allocation99_spill] sm:$0xff] }
 0x2c1   : > { %17299 = vst [vmem:[#allocation282_spill] sm:$0xff] %v15139_v9  ;;  %v15177_v9 = vpop.f32.mrb[148].mxu1 }
 0x2c2   : > { %12515 = vmatmul.mubr.msk.bf16.gmra.mrb[16].mxu0 %vm6180_vm1, %v13259_v16  ;;  %v15183_v53 = vpop.f32.mrb[149].mxu1 }
 0x2c3   : > { %12518 = vmatprep.mubr.msk.bf16.mxu0 %vm6180_vm1, %v13260_v38  ;;  %v15188_v59 = vpop.f32.mrb[150].mxu1 }
 0x2c4   : > { %v15193_v1 = vpop.f32.mrb[151].mxu1 }
 0x2c5   : > { %v15161_v0 = vpop.f32.mrb[168].mxu0 }
 0x2c6   : > { %17305 = vst [vmem:[#allocation95_spill] sm:$0xff] %v15161_v0  ;;  %v15165_v3 = vpop.f32.mrb[169].mxu0  ;;  %v17313_v0 = vld [vmem:[#allocation103_spill] sm:$0xff] }
 0x2c7   : > { %17307 = vst [vmem:[#allocation97_spill] sm:$0xff] %v15165_v3  ;;  %v15170_v38 = vpop.f32.mrb[170].mxu0  ;;  %17316 = vst [vmem:[#allocation103_spill] sm:$0xff] %v15193_v1  ;;  %v13263_v3 = vld [vmem:[%s13952_s8 + $0x468] sm:$0xff]  }
 0x2c8   : > { %17309 = vst [vmem:[#allocation99_spill] sm:$0xff] %v15170_v38  ;;  %v15175_v57 = vpop.f32.mrb[171].mxu0  ;;  %v17315_v38 = vld [vmem:[#allocation105_spill] sm:$0xff] }
 0x2c9   : > { %17311 = vst [vmem:[#allocation101_spill] sm:$0xff] %v15175_v57  ;;  %v15213_v57 = vpop.f32.mrb[152].mxu1 }
 0x2ca   : > { %12519 = vmatmul.mubr.msk.bf16.gmra.mrb[20].mxu0 %vm6180_vm1, %v13261_v50  ;;  %17325 = vst [vmem:[#allocation285_spill] sm:$0xff] %v15213_v57  ;;  %v15219_v37 = vpop.f32.mrb[153].mxu1  ;;  %v13269_v50 = vld [vmem:[%s13952_s8 + $0x490] sm:$0xff]  }
 0x2cb   : > { %12522 = vmatprep.mubr.msk.bf16.mxu0 %vm6180_vm1, %v13262_v61  ;;  %17328 = vst [vmem:[#allocation286_spill] sm:$0xff] %v15219_v37  ;;  %v15224_v43 = vpop.f32.mrb[154].mxu1  ;;  %v13301_v37 = vld [vmem:[%s16764_s1 + $0x78] sm:$0xff]  }
 0x2cc   : > { %17330 = vst [vmem:[#allocation287_spill] sm:$0xff] %v15224_v43  ;;  %v15229_v49 = vpop.f32.mrb[155].mxu1  ;;  %12768 = vmatprep.subr.bf16.mxu1 %v13301_v37 }
 0x2cd   : > { %v15197_v6 = vpop.f32.mrb[172].mxu0  ;;  %17332 = vst [vmem:[#allocation288_spill] sm:$0xff] %v15229_v49  ;;  %12769 = vmatpush3.bf16.msra.mxu1 %v13301_v37  ;;  %v13277_v49 = vld [vmem:[%s13952_s8 + $0x4d0] sm:$0xff]  }
 0x2ce   : > { %17318 = vst [vmem:[#allocation104_spill] sm:$0xff] %v15197_v6  ;;  %v15201_v51 = vpop.f32.mrb[173].mxu0 }
 0x2cf   : > { %17320 = vst [vmem:[#allocation105_spill] sm:$0xff] %v15201_v51  ;;  %v15206_v61 = vpop.f32.mrb[174].mxu0  ;;  %v13265_v51 = vld [vmem:[%s13952_s8 + $0x478] sm:$0xff]  }
 0x2d0   : > { %17322 = vst [vmem:[#allocation283_spill] sm:$0xff] %v15206_v61  ;;  %v15211_v41 = vpop.f32.mrb[175].mxu0 }
 0x2d1   : > { %17324 = vst [vmem:[#allocation284_spill] sm:$0xff] %v15211_v41 }
 0x2d2   : > { %12523 = vmatmul.mubr.msk.bf16.gmra.mrb[24].mxu0 %vm6180_vm1, %v13263_v3  ;;  %v13273_v3 = vld [vmem:[%s13952_s8 + $0x4b0] sm:$0xff]  }
 0x2d3   : > { %12526 = vmatprep.mubr.msk.bf16.mxu0 %vm6180_vm1, %v13264_v45  ;;  %v13267_v45 = vld [vmem:[%s13952_s8 + $0x488] sm:$0xff]  }
 0x2d5   : > { %v15233_v55 = vpop.f32.mrb[176].mxu0 }
 0x2d6   : > { %17334 = vst [vmem:[#allocation289_spill] sm:$0xff] %v15233_v55  ;;  %v15237_v57 = vpop.f32.mrb[177].mxu0 }
 0x2d7   : > { %17336 = vst [vmem:[#allocation290_spill] sm:$0xff] %v15237_v57  ;;  %v15242_v47 = vpop.f32.mrb[178].mxu0 }
 0x2d8   : > { %17338 = vst [vmem:[#allocation291_spill] sm:$0xff] %v15242_v47  ;;  %v15247_v41 = vpop.f32.mrb[179].mxu0 }
 0x2d9   : > { %17340 = vst [vmem:[#allocation292_spill] sm:$0xff] %v15247_v41  ;;  %v13275_v41 = vld [vmem:[%s13952_s8 + $0x4c0] sm:$0xff]  }
 0x2da   : > { %12527 = vmatmul.mubr.msk.bf16.gmra.mrb[28].mxu0 %vm6180_vm1, %v13265_v51 }
 0x2db   : > { %12530 = vmatprep.mubr.msk.bf16.mxu0 %vm6180_vm1, %v13266_v46 }
 0x2dd   : > { %v15253_v39 = vpop.f32.mrb[180].mxu0 }
 0x2de   : > { %17342 = vst [vmem:[#allocation293_spill] sm:$0xff] %v15253_v39  ;;  %v15257_v57 = vpop.f32.mrb[181].mxu0 }
 0x2df   : > { %17344 = vst [vmem:[#allocation294_spill] sm:$0xff] %v15257_v57  ;;  %v15262_v43 = vpop.f32.mrb[182].mxu0  ;;  %v13270_v57 = vld [vmem:[%s13952_s8 + $0x498] sm:$0xff]  }
 0x2e0   : > { %17346 = vst [vmem:[#allocation295_spill] sm:$0xff] %v15262_v43  ;;  %v15267_v46 = vpop.f32.mrb[183].mxu0 }
 0x2e1   : > { %17348 = vst [vmem:[#allocation296_spill] sm:$0xff] %v15267_v46 }
 0x2e2   : > { %12531 = vmatmul.mubr.msk.bf16.gmra.mrb[32].mxu0 %vm6180_vm1, %v13267_v45  ;;  %v13271_v45 = vld [vmem:[%s13952_s8 + $0x4a0] sm:$0xff]  }
 0x2e3   : > { %12534 = vmatprep.mubr.msk.bf16.mxu0 %vm6180_vm1, %v13269_v50 }
 0x2e5   : > { %v15276_v47 = vpop.f32.mrb[184].mxu0 }
 0x2e6   : > { %17350 = vst [vmem:[#allocation297_spill] sm:$0xff] %v15276_v47  ;;  %v15280_v51 = vpop.f32.mrb[185].mxu0  ;;  %v13272_v47 = vld [vmem:[%s13952_s8 + $0x4a8] sm:$0xff]  }
 0x2e7   : > { %17352 = vst [vmem:[#allocation298_spill] sm:$0xff] %v15280_v51  ;;  %v15285_v55 = vpop.f32.mrb[186].mxu0 }
 0x2e8   : > { %17354 = vst [vmem:[#allocation299_spill] sm:$0xff] %v15285_v55  ;;  %v15290_v37 = vpop.f32.mrb[187].mxu0  ;;  %v13280_v55 = vld [vmem:[%s13952_s8 + $0x4e0] sm:$0xff]  }
 0x2e9   : > { %17356 = vst [vmem:[#allocation300_spill] sm:$0xff] %v15290_v37 }
 0x2ea   : > { %12535 = vmatmul.mubr.msk.bf16.gmra.mrb[36].mxu0 %vm6180_vm1, %v13270_v57 }
 0x2eb   : > { %12538 = vmatprep.mubr.msk.bf16.mxu0 %vm6180_vm1, %v13271_v45 }
 0x2ed   : > { %v15296_v43 = vpop.f32.mrb[188].mxu0 }
 0x2ee   : > { %17358 = vst [vmem:[#allocation301_spill] sm:$0xff] %v15296_v43  ;;  %v15300_v61 = vpop.f32.mrb[189].mxu0  ;;  %v13274_v43 = vld [vmem:[%s13952_s8 + $0x4b8] sm:$0xff]  }
 0x2ef   : > { %17360 = vst [vmem:[#allocation302_spill] sm:$0xff] %v15300_v61  ;;  %v15305_v46 = vpop.f32.mrb[190].mxu0 }
 0x2f0   : > { %17362 = vst [vmem:[#allocation303_spill] sm:$0xff] %v15305_v46  ;;  %v15310_v45 = vpop.f32.mrb[191].mxu0  ;;  %v13282_v46 = vld [vmem:[%s13952_s8 + $0x4f0] sm:$0xff]  }
 0x2f1   : > { %17364 = vst [vmem:[#allocation304_spill] sm:$0xff] %v15310_v45 }
 0x2f2   : > { %12539 = vmatmul.mubr.msk.bf16.gmra.mrb[40].mxu0 %vm6180_vm1, %v13272_v47 }
 0x2f3   : > { %12542 = vmatprep.mubr.msk.bf16.mxu0 %vm6180_vm1, %v13273_v3 }
 0x2f5   : > { %v15316_v51 = vpop.f32.mrb[192].mxu0 }
 0x2f6   : > { %17366 = vst [vmem:[#allocation305_spill] sm:$0xff] %v15316_v51  ;;  %v15320_v50 = vpop.f32.mrb[193].mxu0  ;;  %v13276_v51 = vld [vmem:[%s13952_s8 + $0x4c8] sm:$0xff]  }
 0x2f7   : > { %17368 = vst [vmem:[#allocation306_spill] sm:$0xff] %v15320_v50  ;;  %v15325_v57 = vpop.f32.mrb[194].mxu0 }
 0x2f8   : > { %17370 = vst [vmem:[#allocation307_spill] sm:$0xff] %v15325_v57  ;;  %v15330_v3 = vpop.f32.mrb[195].mxu0  ;;  %v13284_v57 = vld [vmem:[%s13952_s8 + $0x500] sm:$0xff]  }
 0x2f9   : > { %17372 = vst [vmem:[#allocation308_spill] sm:$0xff] %v15330_v3 }
 0x2fa   : > { %12543 = vmatmul.mubr.msk.bf16.gmra.mrb[44].mxu0 %vm6180_vm1, %v13274_v43 }
 0x2fb   : > { %12546 = vmatprep.mubr.msk.bf16.mxu0 %vm6180_vm1, %v13275_v41 }
 0x2fd   : > { %v15336_v61 = vpop.f32.mrb[196].mxu0 }
 0x2fe   : > { %17374 = vst [vmem:[#allocation309_spill] sm:$0xff] %v15336_v61  ;;  %v15340_v37 = vpop.f32.mrb[197].mxu0  ;;  %v13278_v61 = vld [vmem:[%s13952_s8 + $0x4d8] sm:$0xff]  }
 0x2ff   : > { %17376 = vst [vmem:[#allocation310_spill] sm:$0xff] %v15340_v37  ;;  %v15345_v47 = vpop.f32.mrb[198].mxu0 }
 0x300   : > { %17378 = vst [vmem:[#allocation311_spill] sm:$0xff] %v15345_v47  ;;  %v15350_v41 = vpop.f32.mrb[199].mxu0  ;;  %v13286_v47 = vld [vmem:[%s13952_s8 + $0x510] sm:$0xff]  }
 0x301   : > { %17380 = vst [vmem:[#allocation312_spill] sm:$0xff] %v15350_v41 }
 0x302   : > { %12547 = vmatmul.mubr.msk.bf16.gmra.mrb[48].mxu0 %vm6180_vm1, %v13276_v51 }
 0x303   : > { %12550 = vmatprep.mubr.msk.bf16.mxu0 %vm6180_vm1, %v13277_v49 }
 0x305   : > { %v15356_v50 = vpop.f32.mrb[200].mxu0 }
 0x306   : > { %17382 = vst [vmem:[#allocation313_spill] sm:$0xff] %v15356_v50  ;;  %v15360_v45 = vpop.f32.mrb[201].mxu0  ;;  %v13281_v50 = vld [vmem:[%s13952_s8 + $0x4e8] sm:$0xff]  }
 0x307   : > { %17384 = vst [vmem:[#allocation314_spill] sm:$0xff] %v15360_v45  ;;  %v15365_v43 = vpop.f32.mrb[202].mxu0 }
 0x308   : > { %17386 = vst [vmem:[#allocation315_spill] sm:$0xff] %v15365_v43  ;;  %v15370_v49 = vpop.f32.mrb[203].mxu0  ;;  %v13288_v43 = vld [vmem:[%s13952_s8 + $0x520] sm:$0xff]  }
 0x309   : > { %17388 = vst [vmem:[#allocation316_spill] sm:$0xff] %v15370_v49 }
 0x30a   : > { %12551 = vmatmul.mubr.msk.bf16.gmra.mrb[52].mxu0 %vm6180_vm1, %v13278_v61 }
 0x30b   : > { %12554 = vmatprep.mubr.msk.bf16.mxu0 %vm6180_vm1, %v13280_v55 }
 0x30d   : > { %v15376_v37 = vpop.f32.mrb[204].mxu0 }
 0x30e   : > { %17390 = vst [vmem:[#allocation317_spill] sm:$0xff] %v15376_v37  ;;  %v15380_v3 = vpop.f32.mrb[205].mxu0  ;;  %v13283_v37 = vld [vmem:[%s13952_s8 + $0x4f8] sm:$0xff]  }
 0x30f   : > { %17392 = vst [vmem:[#allocation318_spill] sm:$0xff] %v15380_v3  ;;  %v15385_v51 = vpop.f32.mrb[206].mxu0 }
 0x310   : > { %17394 = vst [vmem:[#allocation319_spill] sm:$0xff] %v15385_v51  ;;  %v15390_v55 = vpop.f32.mrb[207].mxu0  ;;  %v13291_v51 = vld [vmem:[%s13952_s8 + $0x530] sm:$0xff]  }
 0x311   : > { %17396 = vst [vmem:[#allocation320_spill] sm:$0xff] %v15390_v55 }
 0x312   : > { %12555 = vmatmul.mubr.msk.bf16.gmra.mrb[56].mxu0 %vm6180_vm1, %v13281_v50 }
 0x313   : > { %12558 = vmatprep.mubr.msk.bf16.mxu0 %vm6180_vm1, %v13282_v46 }
 0x315   : > { %v15396_v45 = vpop.f32.mrb[208].mxu0 }
 0x316   : > { %17398 = vst [vmem:[#allocation321_spill] sm:$0xff] %v15396_v45  ;;  %v15400_v41 = vpop.f32.mrb[209].mxu0  ;;  %v13285_v45 = vld [vmem:[%s13952_s8 + $0x508] sm:$0xff]  }
 0x317   : > { %17400 = vst [vmem:[#allocation322_spill] sm:$0xff] %v15400_v41  ;;  %v15405_v61 = vpop.f32.mrb[210].mxu0 }
 0x318   : > { %17402 = vst [vmem:[#allocation323_spill] sm:$0xff] %v15405_v61  ;;  %v15410_v46 = vpop.f32.mrb[211].mxu0  ;;  %v13293_v61 = vld [vmem:[%s13952_s8 + $0x540] sm:$0xff]  }
 0x319   : > { %17404 = vst [vmem:[#allocation324_spill] sm:$0xff] %v15410_v46 }
 0x31a   : > { %12559 = vmatmul.mubr.msk.bf16.gmra.mrb[60].mxu0 %vm6180_vm1, %v13283_v37 }
 0x31b   : > { %12562 = vmatprep.mubr.msk.bf16.mxu0 %vm6180_vm1, %v13284_v57 }
 0x31d   : > { %v15416_v3 = vpop.f32.mrb[212].mxu0 }
 0x31e   : > { %17406 = vst [vmem:[#allocation325_spill] sm:$0xff] %v15416_v3  ;;  %v15420_v49 = vpop.f32.mrb[213].mxu0  ;;  %v13287_v3 = vld [vmem:[%s13952_s8 + $0x518] sm:$0xff]  }
 0x31f   : > { %17408 = vst [vmem:[#allocation326_spill] sm:$0xff] %v15420_v49  ;;  %v15425_v50 = vpop.f32.mrb[214].mxu0 }
 0x320   : > { %17410 = vst [vmem:[#allocation327_spill] sm:$0xff] %v15425_v50  ;;  %v15430_v57 = vpop.f32.mrb[215].mxu0  ;;  %v17440_v50 = vmax.f32 %v14480_v31, %v14994_v7  ;;  %v17445_v7 = vmax.f32 %v14495_v23, %v15010_v17  ;;  %v13297_v17 = vld [vmem:[%s13952_s8 + $0x560] sm:$0xff]   ;;  %v17448_v23 = vmax.f32 %v14499_v52, %v15030_v56 }
 0x321   : > { %17412 = vst [vmem:[#allocation328_spill] sm:$0xff] %v15430_v57 }
 0x322   : > { %12563 = vmatmul.mubr.msk.bf16.gmra.mrb[64].mxu0 %vm6180_vm1, %v13285_v45 }
 0x323   : > { %12566 = vmatprep.mubr.msk.bf16.mxu0 %vm6180_vm1, %v13286_v47 }
 0x325   : > { %v15436_v41 = vpop.f32.mrb[216].mxu0 }
 0x326   : > { %17414 = vst [vmem:[#allocation329_spill] sm:$0xff] %v15436_v41  ;;  %v15440_v55 = vpop.f32.mrb[217].mxu0  ;;  %v13289_v41 = vld [vmem:[%s13952_s8 + $0x528] sm:$0xff]  }
 0x327   : > { %17416 = vst [vmem:[#allocation330_spill] sm:$0xff] %v15440_v55  ;;  %v15445_v37 = vpop.f32.mrb[218].mxu0 }
 0x328   : > { %17418 = vst [vmem:[#allocation331_spill] sm:$0xff] %v15445_v37  ;;  %v15450_v47 = vpop.f32.mrb[219].mxu0 }
 0x329   : > { %17420 = vst [vmem:[#allocation332_spill] sm:$0xff] %v15450_v47  ;;  %v13295_v47 = vld [vmem:[%s13952_s8 + $0x550] sm:$0xff]  }
 0x32a   : > { %12567 = vmatmul.mubr.msk.bf16.gmra.mrb[68].mxu0 %vm6180_vm1, %v13287_v3 }
 0x32b   : > { %12570 = vmatprep.mubr.msk.bf16.mxu0 %vm6180_vm1, %v13288_v43 }
 0x32d   : > { %v15456_v49 = vpop.f32.mrb[220].mxu0 }
 0x32e   : > { %17422 = vst [vmem:[#allocation333_spill] sm:$0xff] %v15456_v49  ;;  %v15460_v46 = vpop.f32.mrb[221].mxu0  ;;  %v13292_v49 = vld [vmem:[%s13952_s8 + $0x538] sm:$0xff]  }
 0x32f   : > { %17424 = vst [vmem:[#allocation334_spill] sm:$0xff] %v15460_v46  ;;  %v15465_v45 = vpop.f32.mrb[222].mxu0 }
 0x330   : > { %17426 = vst [vmem:[#allocation335_spill] sm:$0xff] %v15465_v45  ;;  %v15470_v43 = vpop.f32.mrb[223].mxu0  ;;  %v13294_v45 = vld [vmem:[%s13952_s8 + $0x548] sm:$0xff]  }
 0x331   : > { %17428 = vst [vmem:[#allocation336_spill] sm:$0xff] %v15470_v43  ;;  %v17439_v43 = vld [vmem:[#allocation122_spill] sm:$0xff] }
 0x332   : > { %12571 = vmatmul.mubr.msk.bf16.gmra.mrb[72].mxu0 %vm6180_vm1, %v13289_v41 }
 0x333   : > { %12574 = vmatprep.mubr.msk.bf16.mxu0 %vm6180_vm1, %v13291_v51 }
 0x335   : > { %v15476_v55 = vpop.f32.mrb[224].mxu0 }
 0x336   : > { %17430 = vst [vmem:[#allocation337_spill] sm:$0xff] %v15476_v55  ;;  %v15480_v57 = vpop.f32.mrb[225].mxu0  ;;  %v17438_v55 = vld [vmem:[#allocation120_spill] sm:$0xff] }
 0x337   : > { %17432 = vst [vmem:[#allocation338_spill] sm:$0xff] %v15480_v57  ;;  %v15485_v3 = vpop.f32.mrb[226].mxu0  ;;  %v15501_v57 = vld [vmem:[%s16765_s2] ss:$0 sm:$0xff] }
 0x338   : > { %17434 = vst [vmem:[#allocation339_spill] sm:$0xff] %v15485_v3  ;;  %v15490_v51 = vpop.f32.mrb[227].mxu0 }
 0x339   : > { %17436 = vst [vmem:[#allocation340_spill] sm:$0xff] %v15490_v51  ;;  %v17441_v51 = vld [vmem:[#allocation124_spill] sm:$0xff] }
 0x33a   : > { %12575 = vmatmul.mubr.msk.bf16.gmra.mrb[76].mxu0 %vm6180_vm1, %v13292_v49 }
 0x33b   : > { %12578 = vmatprep.mubr.msk.bf16.mxu0 %vm6180_vm1, %v13293_v61 }
 0x33d   : > { %v12472_v46 = vpop.f32.mrb[228].mxu0 }
 0x33e   : > { %v9136_v37 = vmax.f32 %v17438_v55, %v12472_v46  ;;  %v7899_v6 = vpop.f32.mrb[229].mxu0  ;;  %v17442_v55 = vmax.f32 %v14485_v58, %v15000_v13 }
 0x33f   : > { %v9134_v3 = vmax.f32 %v17439_v43, %v7899_v6  ;;  %v12473_v41 = vpop.f32.mrb[230].mxu0  ;;  %v17444_v6 = vmax.f32 %v14490_v34, %v15005_v12  ;;  %v17446_v34 = vld [vmem:[#allocation132_spill] sm:$0xff] }
 0x340   : > { %v9392_v49 = vmax.f32 %v9136_v37, %v17440_v50  ;;  %v9137_v61 = vmax.f32 %v17441_v51, %v12473_v41  ;;  %v7902_v39 = vpop.f32.mrb[231].mxu0 }
 0x341   : > { %v9390_v46 = vmax.f32 %v9134_v3, %v17442_v55  ;;  %v9135_v1 = vmax.f32 %v17443_v36, %v7902_v39 }
 0x342   : > { %v9525_v16 = vadd.f32 %v15501_v57, %v9392_v49  ;;  %v9393_v43 = vmax.f32 %v9137_v61, %v17444_v6  ;;  %12579 = vmatmul.mubr.msk.bf16.gmra.mrb[80].mxu0 %vm6180_vm1, %v13294_v45  ;;  %v13296_v45 = vld [vmem:[%s13952_s8 + $0x558] sm:$0xff]  }
 0x343   : > { %v9523_v31 = vadd.f32 %v15501_v57, %v9390_v46  ;;  %v9391_v50 = vmax.f32 %v9135_v1, %v17445_v7  ;;  %12582 = vmatprep.mubr.msk.bf16.mxu0 %vm6180_vm1, %v13295_v47  ;;  %v17447_v49 = vld [vmem:[#allocation134_spill] sm:$0xff]  ;;  %v17449_v46 = vld [vmem:[#allocation136_spill] sm:$0xff] }
 0x344   : > { %v9526_v13 = vadd.f32 %v15501_v57, %v9393_v43  ;;  %v9653_v58 = vmax.f32 %v9525_v16, 0.0  ;;  %v17450_v43 = vmax.f32 %v14501_v42, %v15036_v21  ;;  %v17453_v21 = vmax.f32 %v14507_v20, %v15046_v25  ;;  %v13299_v25 = vld [vmem:[%s13952_s8 + $0x570] sm:$0xff]  }
 0x345   : > { %v9524_v39 = vadd.f32 %v15501_v57, %v9391_v50  ;;  %v12476_v36 = vpop.f32.mrb[232].mxu0  ;;  %v9651_v41 = vmax.f32 %v9523_v31, 0.0  ;;  %v17451_v50 = vld [vmem:[#allocation138_spill] sm:$0xff] }
 0x346   : > { %v9654_v37 = vmax.f32 %v9526_v13, 0.0  ;;  %v9140_v12 = vmax.f32 %v17446_v34, %v12476_v36  ;;  %v7915_v3 = vpop.f32.mrb[233].mxu0  ;;  %v17452_v36 = vmax.f32 %v14504_v28, %v15041_v18  ;;  %v17454_v28 = vld [vmem:[#allocation144_spill] sm:$0xff] }
 0x347   : > { %v9652_v51 = vmax.f32 %v9524_v39, 0.0  ;;  %v9138_v61 = vmax.f32 %v17447_v49, %v7915_v3  ;;  %v12477_v55 = vpop.f32.mrb[234].mxu0 }
 0x348   : > { %v15529_v1 = vpack.c.bf16 %v9654_v37, %v9653_v58  ;;  %v9396_v47 = vmax.f32 %v9140_v12, %v17448_v23  ;;  %v9141_v6 = vmax.f32 %v17449_v46, %v12477_v55  ;;  %v7918_v16 = vpop.f32.mrb[235].mxu0  ;;  %v17457_v46 = vld [vmem:[#allocation148_spill] sm:$0xff] }
 0x349   : > { %v9394_v7 = vmax.f32 %v9138_v61, %v17450_v43  ;;  %v9139_v31 = vmax.f32 %v17451_v50, %v7918_v16  ;;  %v15539_v13 = vpack.c.bf16 %v9652_v51, %v9651_v41  ;;  %v17455_v61 = vld [vmem:[#allocation146_spill] sm:$0xff]  ;;  %v17458_v43 = vmax.f32 %v14513_v60, %v15072_v29 }
 0x34a   : > { %v9529_v39 = vadd.f32 %v15501_v57, %v9396_v47  ;;  %v9397_v58 = vmax.f32 %v9141_v6, %v17452_v36  ;;  %12583 = vmatmul.mubr.msk.bf16.gmra.mrb[84].mxu0 %vm6180_vm1, %v13296_v45  ;;  %v13298_v45 = vld [vmem:[%s13952_s8 + $0x568] sm:$0xff]   ;;  %v17459_v50 = vld [vmem:[#allocation150_spill] sm:$0xff]  ;;  %v17461_v29 = vmax.f32 %v14523_v32, %v15082_v33  ;;  %v13302_v33 = vld [vmem:[%s13952_s8 + $0x580] sm:$0xff]  }
 0x34b   : > { %v9527_v52 = vadd.f32 %v15501_v57, %v9394_v7  ;;  %v9395_v42 = vmax.f32 %v9139_v31, %v17453_v21  ;;  %12586 = vmatprep.mubr.msk.bf16.mxu0 %vm6180_vm1, %v13297_v17  ;;  %v17456_v17 = vmax.f32 %v14509_v4, %v15066_v54 }
 0x34c   : > { %v9530_v56 = vadd.f32 %v15501_v57, %v9397_v58  ;;  %v9657_v12 = vmax.f32 %v9529_v39, 0.0  ;;  %v17460_v58 = vmax.f32 %v14518_v44, %v15077_v8  ;;  %v17462_v44 = vld [vmem:[#allocation156_spill] sm:$0xff] }
 0x34d   : > { %v9528_v37 = vadd.f32 %v15501_v57, %v9395_v42  ;;  %v12480_v34 = vpop.f32.mrb[236].mxu0  ;;  %v9655_v51 = vmax.f32 %v9527_v52, 0.0 }
 0x34e   : > { %v9658_v3 = vmax.f32 %v9530_v56, 0.0  ;;  %v9144_v18 = vmax.f32 %v17454_v28, %v12480_v34  ;;  %v7931_v41 = vpop.f32.mrb[237].mxu0 }
 0x34f   : > { %v9656_v49 = vmax.f32 %v9528_v37, 0.0  ;;  %v9142_v55 = vmax.f32 %v17455_v61, %v7931_v41  ;;  %v12481_v23 = vpop.f32.mrb[238].mxu0  ;;  %v17465_v61 = vld [vmem:[#allocation160_spill] sm:$0xff] }
 0x350   : > { %v15557_v20 = vpack.c.bf16 %v9658_v3, %v9657_v12  ;;  %v9400_v47 = vmax.f32 %v9144_v18, %v17456_v17  ;;  %v9145_v6 = vmax.f32 %v17457_v46, %v12481_v23  ;;  %v7934_v16 = vpop.f32.mrb[239].mxu0  ;;  %v13300_v12 = vld [vmem:[%s13952_s8 + $0x578] sm:$0xff]  }
 0x351   : > { %v9398_v7 = vmax.f32 %v9142_v55, %v17458_v43  ;;  %v9143_v31 = vmax.f32 %v17459_v50, %v7934_v16  ;;  %v15567_v39 = vpack.c.bf16 %v9656_v49, %v9655_v51  ;;  %v17463_v18 = vld [vmem:[#allocation158_spill] sm:$0xff]  ;;  %v17464_v51 = vmax.f32 %v14527_v26, %v15105_v62 }
 0x352   : > { %v9533_v36 = vadd.f32 %v15501_v57, %v9400_v47  ;;  %v9401_v52 = vmax.f32 %v9145_v6, %v17460_v58  ;;  %12587 = vmatmul.mubr.msk.bf16.gmra.mrb[88].mxu0 %vm6180_vm1, %v13298_v45  ;;  %v17467_v47 = vld [vmem:[#allocation162_spill] sm:$0xff]  ;;  %v17468_v43 = vmax.f32 %v14532_v10, %v15116_v35  ;;  %v17469_v62 = vmax.f32 %v14535_v48, %v15121_v19 }
 0x353   : > { %v9531_v4 = vadd.f32 %v15501_v57, %v9398_v7  ;;  %v9399_v60 = vmax.f32 %v9143_v31, %v17461_v29  ;;  %12590 = vmatprep.mubr.msk.bf16.mxu0 %vm6180_vm1, %v13299_v25  ;;  %v17466_v25 = vmax.f32 %v14529_v24, %v15111_v15  ;;  %v17472_v19 = vmax.f32 %v17301_v30, %v15141_v2 }
 0x354   : > { %v9534_v54 = vadd.f32 %v15501_v57, %v9401_v52  ;;  %v9661_v56 = vmax.f32 %v9533_v36, 0.0  ;;  %v17470_v52 = vld [vmem:[#allocation168_spill] sm:$0xff]  ;;  %v17477_v2 = vmax.f32 %v17304_v27, %v15157_v22  ;;  %v17480_v22 = vmax.f32 %v17313_v0, %v15177_v9  ;;  %v17485_v0 = vld [vmem:[#allocation106_spill] sm:$0xff] }
 0x355   : > { %v9532_v21 = vadd.f32 %v15501_v57, %v9399_v60  ;;  %v12484_v42 = vpop.f32.mrb[240].mxu0  ;;  %v9659_v3 = vmax.f32 %v9531_v4, 0.0  ;;  %v13303_v4 = vld [vmem:[%s13952_s8 + $0x588] sm:$0xff]  }
 0x356   : > { %v9662_v37 = vmax.f32 %v9534_v54, 0.0  ;;  %v9148_v8 = vmax.f32 %v17462_v44, %v12484_v42  ;;  %v7947_v34 = vpop.f32.mrb[241].mxu0  ;;  %v17471_v54 = vld [vmem:[#allocation170_spill] sm:$0xff] }
 0x357   : > { %v9660_v28 = vmax.f32 %v9532_v21, 0.0  ;;  %v9146_v41 = vmax.f32 %v17463_v18, %v7947_v34  ;;  %v12485_v45 = vpop.f32.mrb[242].mxu0  ;;  %v17474_v34 = vmax.f32 %v17302_v40, %v15147_v5 }
 0x358   : > { %v15585_v32 = vpack.c.bf16 %v9662_v37, %v9661_v56  ;;  %v9404_v49 = vmax.f32 %v9148_v8, %v17464_v51  ;;  %v9149_v55 = vmax.f32 %v17465_v61, %v12485_v45  ;;  %v7950_v23 = vpop.f32.mrb[243].mxu0  ;;  %v17473_v37 = vld [vmem:[#allocation172_spill] sm:$0xff]  ;;  %v17476_v45 = vmax.f32 %v17303_v14, %v15152_v11 }
 0x359   : > { %v9402_v17 = vmax.f32 %v9146_v41, %v17466_v25  ;;  %v9147_v46 = vmax.f32 %v17467_v47, %v7950_v23  ;;  %v15595_v6 = vpack.c.bf16 %v9660_v28, %v9659_v3  ;;  %v17475_v3 = vld [vmem:[#allocation174_spill] sm:$0xff]  ;;  %v17478_v23 = vld [vmem:[#allocation180_spill] sm:$0xff] }
 0x35a   : > { %v9537_v16 = vadd.f32 %v15501_v57, %v9404_v49  ;;  %v9405_v7 = vmax.f32 %v9149_v55, %v17468_v43  ;;  %12591 = vmatmul.mubr.msk.bf16.gmra.mrb[92].mxu0 %vm6180_vm1, %v13300_v12  ;;  %v17479_v47 = vld [vmem:[#allocation182_spill] sm:$0xff] }
 0x35b   : > { %v9535_v26 = vadd.f32 %v15501_v57, %v9402_v17  ;;  %v9403_v24 = vmax.f32 %v9147_v46, %v17469_v62  ;;  %12594 = vmatprep.mubr.msk.bf16.mxu0 %vm6180_vm1, %v13302_v33 }
 0x35c   : > { %v9538_v15 = vadd.f32 %v15501_v57, %v9405_v7  ;;  %v9665_v36 = vmax.f32 %v9537_v16, 0.0  ;;  %v17481_v7 = vld [vmem:[#allocation184_spill] sm:$0xff] }
 0x35d   : > { %v9536_v50 = vadd.f32 %v15501_v57, %v9403_v24  ;;  %v12488_v31 = vpop.f32.mrb[244].mxu0  ;;  %v9663_v29 = vmax.f32 %v9535_v26, 0.0  ;;  %v17482_v24 = vmax.f32 %v17314_v63, %v15183_v53 }
 0x35e   : > { %v9666_v58 = vmax.f32 %v9538_v15, 0.0  ;;  %v9152_v35 = vmax.f32 %v17470_v52, %v12488_v31  ;;  %v7963_v10 = vpop.f32.mrb[245].mxu0  ;;  %v17484_v52 = vmax.f32 %v17315_v38, %v15188_v59  ;;  %v17489_v59 = vld [vmem:[#allocation194_spill] sm:$0xff] }
 0x35f   : > { %v9664_v60 = vmax.f32 %v9536_v50, 0.0  ;;  %v9150_v21 = vmax.f32 %v17471_v54, %v7963_v10  ;;  %v12489_v42 = vpop.f32.mrb[246].mxu0  ;;  %v17483_v50 = vld [vmem:[#allocation186_spill] sm:$0xff]  ;;  %v17486_v10 = vld [vmem:[#allocation103_spill] sm:$0xff] }
 0x360   : > { %v15612_v48 = vpack.c.bf16 %v9666_v58, %v9665_v36  ;;  %v9408_v56 = vmax.f32 %v9152_v35, %v17472_v19  ;;  %v9153_v44 = vmax.f32 %v17473_v37, %v12489_v42  ;;  %v7966_v8 = vpop.f32.mrb[247].mxu0  ;;  %v17488_v42 = vld [vmem:[#allocation192_spill] sm:$0xff] }
 0x361   : > { %v9406_v12 = vmax.f32 %v9150_v21, %v17474_v34  ;;  %v9151_v28 = vmax.f32 %v17475_v3, %v7966_v8  ;;  %v15622_v18 = vpack.c.bf16 %v9664_v60, %v9663_v29  ;;  %v17491_v3 = vld [vmem:[#allocation285_spill] sm:$0xff] }
 0x362   : > { %v9541_v41 = vadd.f32 %v15501_v57, %v9408_v56  ;;  %v9409_v33 = vmax.f32 %v9153_v44, %v17476_v45  ;;  %12595 = vmatmul.mubr.msk.bf16.gmra.mrb[96].mxu0 %vm6180_vm1, %v13303_v4  ;;  %v17487_v4 = vmax.f32 %v17485_v0, %v17486_v10  ;;  %v17493_v45 = vld [vmem:[#allocation196_spill] sm:$0xff] }
 0x363   : > { %v9539_v30 = vadd.f32 %v15501_v57, %v9406_v12  ;;  %v9407_v51 = vmax.f32 %v9151_v28, %v17477_v2  ;;  %v17490_v12 = vld [vmem:[#allocation107_spill] sm:$0xff]  ;;  %v17494_v2 = vld [vmem:[#allocation109_spill] sm:$0xff] }
 0x364   : > { %v9542_v5 = vadd.f32 %v15501_v57, %v9409_v33  ;;  %v9669_v61 = vmax.f32 %v9541_v41, 0.0  ;;  %v17492_v28 = vmax.f32 %v17490_v12, %v17491_v3  ;;  %v17514_v3 = vld [vmem:[#allocation5_spill] sm:$0xff] }
 0x365   : > { %v9540_v40 = vadd.f32 %v15501_v57, %v9407_v51  ;;  %v12492_v49 = vpop.f32.mrb[248].mxu0  ;;  %v9667_v11 = vmax.f32 %v9539_v30, 0.0  ;;  %v17495_v51 = vld [vmem:[#allocation286_spill] sm:$0xff] }
 0x366   : > { %v9670_v55 = vmax.f32 %v9542_v5, 0.0  ;;  %v9156_v25 = vmax.f32 %v17478_v23, %v12492_v49  ;;  %v7979_v17 = vpop.f32.mrb[249].mxu0  ;;  %v17496_v5 = vmax.f32 %v17494_v2, %v17495_v51  ;;  %v17497_v49 = vld [vmem:[#allocation198_spill] sm:$0xff] }
 0x367   : > { %v9668_v14 = vmax.f32 %v9540_v40, 0.0  ;;  %v9154_v46 = vmax.f32 %v17479_v47, %v7979_v17  ;;  %v12493_v16 = vpop.f32.mrb[250].mxu0  ;;  %v17499_v17 = vld [vmem:[#allocation287_spill] sm:$0xff]  ;;  %v17518_v2 = vld [vmem:[#allocation210_spill] sm:$0xff] }
 0x368   : > { %v15637_v43 = vpack.c.bf16 %v9670_v55, %v9669_v61  ;;  %v9412_v27 = vmax.f32 %v9156_v25, %v17480_v22  ;;  %v9157_v26 = vmax.f32 %v17481_v7, %v12493_v16  ;;  %v7982_v62 = vpop.f32.mrb[251].mxu0  ;;  %v17498_v25 = vld [vmem:[#allocation111_spill] sm:$0xff]  ;;  %v17502_v16 = vld [vmem:[#allocation288_spill] sm:$0xff] }
 0x369   : > { %v9410_v15 = vmax.f32 %v9154_v46, %v17482_v24  ;;  %v9155_v31 = vmax.f32 %v17483_v50, %v7982_v62  ;;  %v15647_v36 = vpack.c.bf16 %v9668_v14, %v9667_v11  ;;  %v17500_v11 = vmax.f32 %v17498_v25, %v17499_v17  ;;  %v17501_v46 = vld [vmem:[#allocation113_spill] sm:$0xff]  ;;  %v17504_v50 = vld [vmem:[#allocation115_spill] sm:$0xff] }
 0x36a   : > { %v9545_v58 = vadd.f32 %v15501_v57, %v9412_v27  ;;  %v9413_v35 = vmax.f32 %v9157_v26, %v17484_v52  ;;  %v17503_v22 = vmax.f32 %v17501_v46, %v17502_v16  ;;  %v17520_v17 = vld [vmem:[#allocation119_spill] sm:$0xff]  ;;  %v17521_v16 = vld [vmem:[#allocation121_spill] sm:$0xff] }
 0x36b   : > { %v9543_v9 = vadd.f32 %v15501_v57, %v9410_v15  ;;  %v9411_v29 = vmax.f32 %v9155_v31, %v17487_v4 }
 0x36c   : > { %v9546_v60 = vadd.f32 %v15501_v57, %v9413_v35  ;;  %v9673_v54 = vmax.f32 %v9545_v58, 0.0 }
 0x36d   : > { %v9544_v53 = vadd.f32 %v15501_v57, %v9411_v29  ;;  %v12496_v63 = vpop.f32.mrb[252].mxu0  ;;  %v9671_v37 = vmax.f32 %v9543_v9, 0.0  ;;  %v17505_v9 = vld [vmem:[#allocation116_spill] sm:$0xff]  ;;  %v17506_v29 = vld [vmem:[#allocation3_spill] sm:$0xff] }
 0x36e   : > { %v9674_v21 = vmax.f32 %v9546_v60, 0.0  ;;  %v9160_v19 = vmax.f32 %v17488_v42, %v12496_v63  ;;  %v7995_v56 = vpop.f32.mrb[253].mxu0  ;;  %v17507_v60 = vld [vmem:[#allocation204_spill] sm:$0xff] }
 0x36f   : > { %v9672_v44 = vmax.f32 %v9544_v53, 0.0  ;;  %v9158_v38 = vmax.f32 %v17489_v59, %v7995_v56  ;;  %v12497_v8 = vpop.f32.mrb[254].mxu0  ;;  %v17508_v53 = vmax.f32 %v17506_v29, %v17507_v60  ;;  %v17511_v56 = vld [vmem:[#allocation206_spill] sm:$0xff] }
 0x370   : > { %v15661_v34 = vpack.c.bf16 %v9674_v21, %v9673_v54  ;;  %v9416_v41 = vmax.f32 %v9160_v19, %v17492_v28  ;;  %v9161_v33 = vmax.f32 %v17493_v45, %v12497_v8  ;;  %v7998_v30 = vpop.f32.mrb[255].mxu0  ;;  %v17509_v54 = vld [vmem:[#allocation117_spill] sm:$0xff]  ;;  %v17510_v19 = vld [vmem:[#allocation4_spill] sm:$0xff]  ;;  %v17513_v59 = vld [vmem:[#allocation118_spill] sm:$0xff] }
 0x371   : > { %v9414_v40 = vmax.f32 %v9158_v38, %v17496_v5  ;;  %v9159_v61 = vmax.f32 %v17497_v49, %v7998_v30  ;;  %v15671_v55 = vpack.c.bf16 %v9672_v44, %v9671_v37  ;;  %v17512_v37 = vmax.f32 %v17510_v19, %v17511_v56  ;;  %v17515_v28 = vld [vmem:[#allocation208_spill] sm:$0xff]  ;;  %v17517_v30 = vld [vmem:[#allocation6_spill] sm:$0xff] }
 0x372   : > { %v9549_v23 = vadd.f32 %v15501_v57, %v9416_v41  ;;  %v9417_v14 = vmax.f32 %v9161_v33, %v17500_v11  ;;  %v17516_v41 = vmax.f32 %v17514_v3, %v17515_v28  ;;  %v17519_v51 = vmax.f32 %v17517_v30, %v17518_v2  ;;  %v17533_v56 = vld [vmem:[#allocation10_spill] sm:$0xff] }
 0x373   : > { %v9547_v47 = vadd.f32 %v15501_v57, %v9414_v40  ;;  %v9415_v27 = vmax.f32 %v9159_v61, %v17503_v22 }
 0x374   : > { %v9550_v7 = vadd.f32 %v15501_v57, %v9417_v14  ;;  %v9677_v24 = vmax.f32 %v9549_v23, 0.0 }
 0x375   : > { %v9548_v26 = vadd.f32 %v15501_v57, %v9415_v27  ;;  %v12500_v62 = vpop.f32.mrb[0].mxu0  ;;  %v9675_v52 = vmax.f32 %v9547_v47, 0.0 }
 0x376   : > { %v9678_v15 = vmax.f32 %v9550_v7, 0.0  ;;  %v9164_v31 = vmax.f32 %v12500_v62, %v17504_v50  ;;  %v8011_v58 = vpop.f32.mrb[1].mxu0  ;;  %v17523_v62 = vld [vmem:[#allocation216_spill] sm:$0xff]  ;;  %v17525_v50 = vld [vmem:[#allocation123_spill] sm:$0xff] }
 0x377   : > { %v9676_v35 = vmax.f32 %v9548_v26, 0.0  ;;  %v9162_v0 = vmax.f32 %v8011_v58, %v17505_v9  ;;  %v12501_v10 = vpop.f32.mrb[2].mxu0  ;;  %v17522_v26 = vld [vmem:[#allocation7_spill] sm:$0xff] }
 0x378   : > { %v15685_v4 = vpack.c.bf16 %v9678_v15, %v9677_v24  ;;  %v9292_v63 = vmax.f32 %v17508_v53, %v9164_v31  ;;  %v9165_v21 = vmax.f32 %v12501_v10, %v17509_v54  ;;  %v8014_v42 = vpop.f32.mrb[3].mxu0  ;;  %v17524_v24 = vmax.f32 %v17522_v26, %v17523_v62  ;;  %v17529_v10 = vld [vmem:[#allocation125_spill] sm:$0xff]  ;;  %v17531_v54 = vld [vmem:[#allocation220_spill] sm:$0xff]  ;;  %v17545_v26 = vld [vmem:[#allocation130_spill] sm:$0xff] }
 0x379   : > { %v9290_v44 = vmax.f32 %v17512_v37, %v9162_v0  ;;  %v9163_v38 = vmax.f32 %v8014_v42, %v17513_v59  ;;  %v15695_v8 = vpack.c.bf16 %v9676_v35, %v9675_v52  ;;  %v17526_v52 = vld [vmem:[#allocation8_spill] sm:$0xff]  ;;  %v17527_v35 = vld [vmem:[#allocation218_spill] sm:$0xff] }
 0x37a   : > { %v9425_v12 = vadd.f32 %v15501_v57, %v9292_v63  ;;  %v9293_v45 = vmax.f32 %v17516_v41, %v9165_v21  ;;  %v17528_v9 = vmax.f32 %v17526_v52, %v17527_v35  ;;  %v17530_v63 = vld [vmem:[#allocation9_spill] sm:$0xff]  ;;  %v17534_v37 = vld [vmem:[#allocation222_spill] sm:$0xff] }
 0x37b   : > { %v9423_v33 = vadd.f32 %v15501_v57, %v9290_v44  ;;  %v9291_v5 = vmax.f32 %v17519_v51, %v9163_v38  ;;  %v17532_v21 = vmax.f32 %v17530_v63, %v17531_v54  ;;  %v17535_v44 = vmax.f32 %v17533_v56, %v17534_v37 }
 0x37c   : > { %v9426_v40 = vadd.f32 %v15501_v57, %v9293_v45  ;;  %v9553_v23 = vmax.f32 %v9425_v12, 0.0  ;;  %v17536_v45 = vld [vmem:[#allocation127_spill] sm:$0xff] }
 0x37d   : > { %v9424_v49 = vadd.f32 %v15501_v57, %v9291_v5  ;;  %v12504_v61 = vpop.f32.mrb[4].mxu0  ;;  %v9551_v47 = vmax.f32 %v9423_v33, 0.0  ;;  %v17537_v5 = vld [vmem:[#allocation128_spill] sm:$0xff] }
 0x37e   : > { %v9554_v25 = vmax.f32 %v9426_v40, 0.0  ;;  %v9168_v11 = vmax.f32 %v12504_v61, %v17520_v17  ;;  %v8027_v14 = vpop.f32.mrb[5].mxu0  ;;  %v17538_v61 = vld [vmem:[#allocation11_spill] sm:$0xff] }
 0x37f   : > { %v9552_v46 = vmax.f32 %v9424_v49, 0.0  ;;  %v9166_v22 = vmax.f32 %v8027_v14, %v17521_v16  ;;  %v12505_v27 = vpop.f32.mrb[6].mxu0  ;;  %v17542_v16 = vld [vmem:[#allocation12_spill] sm:$0xff] }
 0x380   : > { %v9680_v7 = vpack.c.bf16 %v9554_v25, %v9553_v23  ;;  %v9296_v15 = vmax.f32 %v17524_v24, %v9168_v11  ;;  %v9169_v31 = vmax.f32 %v12505_v27, %v17525_v50  ;;  %v8030_v58 = vpop.f32.mrb[7].mxu0  ;;  %v17539_v23 = vld [vmem:[#allocation228_spill] sm:$0xff]  ;;  %v17541_v11 = vld [vmem:[#allocation129_spill] sm:$0xff] }
 0x381   : > { %v9294_v0 = vmax.f32 %v17528_v9, %v9166_v22  ;;  %v9167_v29 = vmax.f32 %v8030_v58, %v17529_v10  ;;  %v9679_v60 = vpack.c.bf16 %v9552_v46, %v9551_v47  ;;  %v17540_v25 = vmax.f32 %v17538_v61, %v17539_v23  ;;  %v17543_v22 = vld [vmem:[#allocation230_spill] sm:$0xff]  ;;  %v17546_v50 = vld [vmem:[#allocation13_spill] sm:$0xff] }
 0x382   : > { %v9429_v53 = vadd.f32 %v15501_v57, %v9296_v15  ;;  %v9297_v42 = vmax.f32 %v17532_v21, %v9169_v31  ;;  %v17544_v27 = vmax.f32 %v17542_v16, %v17543_v22  ;;  %v17547_v31 = vld [vmem:[#allocation232_spill] sm:$0xff]  ;;  %v17549_v9 = vld [vmem:[#allocation14_spill] sm:$0xff]  ;;  %v17561_v23 = vld [vmem:[#allocation137_spill] sm:$0xff] }
 0x383   : > { %v9427_v19 = vadd.f32 %v15501_v57, %v9294_v0  ;;  %v9295_v59 = vmax.f32 %v17535_v44, %v9167_v29  ;;  %12770 = vmatprep.mubr.bf16.mxu1 %v9679_v60  ;;  %v17548_v58 = vmax.f32 %v17546_v50, %v17547_v31  ;;  %v17550_v0 = vld [vmem:[#allocation234_spill] sm:$0xff] }
 0x384   : > { %v9430_v38 = vadd.f32 %v15501_v57, %v9297_v42  ;;  %12771 = vmatmul.mubr.bf16.vlgmr.msra.gmra.mrb[156].mxu1 %v9680_v7  ;;  %v9557_v28 = vmax.f32 %v9429_v53, 0.0  ;;  %v17551_v10 = vmax.f32 %v17549_v9, %v17550_v0  ;;  %v17552_v42 = vld [vmem:[#allocation131_spill] sm:$0xff] }
 0x385   : > { %v9428_v12 = vadd.f32 %v15501_v57, %v9295_v59  ;;  %v12508_v3 = vpop.f32.mrb[8].mxu0  ;;  %v9555_v2 = vmax.f32 %v9427_v19, 0.0  ;;  %v17553_v59 = vld [vmem:[#allocation133_spill] sm:$0xff] }
 0x386   : > { %v9558_v41 = vmax.f32 %v9430_v38, 0.0  ;;  %v9172_v33 = vmax.f32 %v12508_v3, %v17536_v45  ;;  %v8043_v30 = vpop.f32.mrb[9].mxu0  ;;  %v17554_v3 = vld [vmem:[#allocation15_spill] sm:$0xff] }
 0x387   : > { %v9556_v51 = vmax.f32 %v9428_v12, 0.0  ;;  %v9170_v40 = vmax.f32 %v8043_v30, %v17537_v5  ;;  %v12509_v49 = vpop.f32.mrb[10].mxu0  ;;  %v17558_v5 = vld [vmem:[#allocation16_spill] sm:$0xff] }
 0x388   : > { %v9300_v17 = vmax.f32 %v17540_v25, %v9172_v33  ;;  %v9173_v14 = vmax.f32 %v12509_v49, %v17541_v11  ;;  %v8046_v47 = vpop.f32.mrb[11].mxu0  ;;  %v9682_v46 = vpack.c.bf16 %v9558_v41, %v9557_v28  ;;  %v17555_v28 = vld [vmem:[#allocation240_spill] sm:$0xff]  ;;  %v17557_v33 = vld [vmem:[#allocation135_spill] sm:$0xff] }
 0x389   : > { %v9298_v7 = vmax.f32 %v17544_v27, %v9170_v40  ;;  %v9171_v62 = vmax.f32 %v8046_v47, %v17545_v26  ;;  %v9681_v24 = vpack.c.bf16 %v9556_v51, %v9555_v2  ;;  %v17556_v41 = vmax.f32 %v17554_v3, %v17555_v28  ;;  %v17559_v40 = vld [vmem:[#allocation242_spill] sm:$0xff]  ;;  %v17563_v47 = vld [vmem:[#allocation244_spill] sm:$0xff] }
 0x38a   : > { %v9433_v15 = vadd.f32 %v15501_v57, %v9300_v17  ;;  %v9301_v52 = vmax.f32 %v17548_v58, %v9173_v14  ;;  %v17560_v49 = vmax.f32 %v17558_v5, %v17559_v40  ;;  %v17562_v14 = vld [vmem:[#allocation17_spill] sm:$0xff]  ;;  %v17565_v27 = vld [vmem:[#allocation18_spill] sm:$0xff] }
 0x38b   : > { %v9431_v35 = vadd.f32 %v15501_v57, %v9298_v7  ;;  %v9299_v29 = vmax.f32 %v17551_v10, %v9171_v62  ;;  %12774 = vmatprep.mubr.bf16.mxu1 %v9681_v24  ;;  %v17566_v7 = vld [vmem:[#allocation246_spill] sm:$0xff] }
 0x38c   : > { %v9434_v60 = vadd.f32 %v15501_v57, %v9301_v52  ;;  %12775 = vmatmul.mubr.bf16.gmra.mrb[160].mxu1 %v9682_v46  ;;  %v9561_v54 = vmax.f32 %v9433_v15, 0.0  ;;  %v17564_v46 = vmax.f32 %v17562_v14, %v17563_v47  ;;  %v17567_v26 = vmax.f32 %v17565_v27, %v17566_v7  ;;  %v17568_v52 = vld [vmem:[#allocation139_spill] sm:$0xff]  ;;  %v17577_v28 = vld [vmem:[#allocation142_spill] sm:$0xff] }
 0x38d   : > { %v9432_v53 = vadd.f32 %v15501_v57, %v9299_v29  ;;  %v12512_v63 = vpop.f32.mrb[12].mxu0  ;;  %v9559_v37 = vmax.f32 %v9431_v35, 0.0  ;;  %v17569_v29 = vld [vmem:[#allocation140_spill] sm:$0xff] }
 0x38e   : > { %v9562_v21 = vmax.f32 %v9434_v60, 0.0  ;;  %v9176_v19 = vmax.f32 %v12512_v63, %v17552_v42  ;;  %v8059_v56 = vpop.f32.mrb[13].mxu0  ;;  %v17570_v63 = vld [vmem:[#allocation19_spill] sm:$0xff] }
 0x38f   : > { %v9560_v44 = vmax.f32 %v9432_v53, 0.0  ;;  %v9174_v38 = vmax.f32 %v8059_v56, %v17553_v59  ;;  %v12513_v12 = vpop.f32.mrb[14].mxu0  ;;  %v17574_v59 = vld [vmem:[#allocation20_spill] sm:$0xff] }
 0x390   : > { %v9304_v45 = vmax.f32 %v17556_v41, %v9176_v19  ;;  %v9177_v30 = vmax.f32 %v12513_v12, %v17557_v33  ;;  %v8062_v2 = vpop.f32.mrb[15].mxu0  ;;  %v9684_v51 = vpack.c.bf16 %v9562_v21, %v9561_v54  ;;  %v17571_v54 = vld [vmem:[#allocation252_spill] sm:$0xff]  ;;  %v17573_v19 = vld [vmem:[#allocation141_spill] sm:$0xff] }
 0x391   : > { %v9302_v61 = vmax.f32 %v17560_v49, %v9174_v38  ;;  %v9175_v25 = vmax.f32 %v8062_v2, %v17561_v23  ;;  %v9683_v17 = vpack.c.bf16 %v9560_v44, %v9559_v37  ;;  %v17572_v21 = vmax.f32 %v17570_v63, %v17571_v54  ;;  %v17575_v38 = vld [vmem:[#allocation254_spill] sm:$0xff]  ;;  %v17579_v2 = vld [vmem:[#allocation256_spill] sm:$0xff]  ;;  %v17593_v54 = vld [vmem:[#allocation149_spill] sm:$0xff] }
 0x392   : > { %v9437_v11 = vadd.f32 %v15501_v57, %v9304_v45  ;;  %v9305_v16 = vmax.f32 %v17564_v46, %v9177_v30  ;;  %v17576_v12 = vmax.f32 %v17574_v59, %v17575_v38  ;;  %v17578_v30 = vld [vmem:[#allocation21_spill] sm:$0xff]  ;;  %v17581_v49 = vld [vmem:[#allocation22_spill] sm:$0xff] }
 0x393   : > { %v9435_v22 = vadd.f32 %v15501_v57, %v9302_v61  ;;  %v9303_v62 = vmax.f32 %v17567_v26, %v9175_v25  ;;  %12778 = vmatprep.mubr.bf16.mxu1 %v9683_v17  ;;  %v17582_v61 = vld [vmem:[#allocation258_spill] sm:$0xff] }
 0x394   : > { %v9438_v24 = vadd.f32 %v15501_v57, %v9305_v16  ;;  %12779 = vmatmul.mubr.bf16.gmra.mrb[164].mxu1 %v9684_v51  ;;  %v9565_v31 = vmax.f32 %v9437_v11, 0.0  ;;  %v17580_v51 = vmax.f32 %v17578_v30, %v17579_v2  ;;  %v17583_v23 = vmax.f32 %v17581_v49, %v17582_v61  ;;  %v17584_v16 = vld [vmem:[#allocation143_spill] sm:$0xff] }
 0x395   : > { %v9436_v15 = vadd.f32 %v15501_v57, %v9303_v62  ;;  %v12516_v50 = vpop.f32.mrb[16].mxu0  ;;  %v9563_v0 = vmax.f32 %v9435_v22, 0.0  ;;  %v17585_v62 = vld [vmem:[#allocation145_spill] sm:$0xff] }
 0x396   : > { %v9566_v58 = vmax.f32 %v9438_v24, 0.0  ;;  %v9180_v35 = vmax.f32 %v12516_v50, %v17568_v52  ;;  %v8075_v9 = vpop.f32.mrb[17].mxu0  ;;  %v17586_v50 = vld [vmem:[#allocation23_spill] sm:$0xff] }
 0x397   : > { %v9564_v10 = vmax.f32 %v9436_v15, 0.0  ;;  %v9178_v60 = vmax.f32 %v8075_v9, %v17569_v29  ;;  %v12517_v53 = vpop.f32.mrb[18].mxu0  ;;  %v17590_v29 = vld [vmem:[#allocation24_spill] sm:$0xff] }
 0x398   : > { %v9308_v42 = vmax.f32 %v17572_v21, %v9180_v35  ;;  %v9181_v56 = vmax.f32 %v12517_v53, %v17573_v19  ;;  %v8078_v37 = vpop.f32.mrb[19].mxu0  ;;  %v9686_v44 = vpack.c.bf16 %v9566_v58, %v9565_v31  ;;  %v17587_v31 = vld [vmem:[#allocation263_spill] sm:$0xff] }
 0x399   : > { %v9306_v3 = vmax.f32 %v17576_v12, %v9178_v60  ;;  %v9179_v41 = vmax.f32 %v8078_v37, %v17577_v28  ;;  %v9685_v45 = vpack.c.bf16 %v9564_v10, %v9563_v0  ;;  %v17588_v58 = vmax.f32 %v17586_v50, %v17587_v31  ;;  %v17589_v35 = vld [vmem:[#allocation147_spill] sm:$0xff]  ;;  %v17591_v60 = vld [vmem:[#allocation264_spill] sm:$0xff]  ;;  %v17595_v37 = vld [vmem:[#allocation265_spill] sm:$0xff] }
 0x39a   : > { %v9441_v33 = vadd.f32 %v15501_v57, %v9308_v42  ;;  %v9309_v5 = vmax.f32 %v17580_v51, %v9181_v56  ;;  %v17592_v53 = vmax.f32 %v17590_v29, %v17591_v60  ;;  %v17594_v56 = vld [vmem:[#allocation25_spill] sm:$0xff]  ;;  %v17597_v12 = vld [vmem:[#allocation26_spill] sm:$0xff] }
 0x39b   : > { %v9439_v40 = vadd.f32 %v15501_v57, %v9306_v3  ;;  %v9307_v25 = vmax.f32 %v17583_v23, %v9179_v41  ;;  %12782 = vmatprep.mubr.bf16.mxu1 %v9685_v45  ;;  %v17598_v3 = vld [vmem:[#allocation266_spill] sm:$0xff] }
 0x39c   : > { %v9442_v17 = vadd.f32 %v15501_v57, %v9309_v5  ;;  %12783 = vmatmul.mubr.bf16.gmra.mrb[168].mxu1 %v9686_v44  ;;  %v9569_v47 = vmax.f32 %v9441_v33, 0.0  ;;  %v17596_v44 = vmax.f32 %v17594_v56, %v17595_v37  ;;  %v17599_v28 = vmax.f32 %v17597_v12, %v17598_v3  ;;  %v17600_v5 = vld [vmem:[#allocation151_spill] sm:$0xff]  ;;  %v17609_v31 = vld [vmem:[#allocation154_spill] sm:$0xff] }
 0x39d   : > { %v9440_v11 = vadd.f32 %v15501_v57, %v9307_v25  ;;  %v12520_v14 = vpop.f32.mrb[20].mxu0  ;;  %v9567_v7 = vmax.f32 %v9439_v40, 0.0  ;;  %v17601_v25 = vld [vmem:[#allocation152_spill] sm:$0xff] }
 0x39e   : > { %v9570_v46 = vmax.f32 %v9442_v17, 0.0  ;;  %v9184_v22 = vmax.f32 %v12520_v14, %v17584_v16  ;;  %v8091_v27 = vpop.f32.mrb[21].mxu0  ;;  %v17602_v14 = vld [vmem:[#allocation27_spill] sm:$0xff] }
 0x39f   : > { %v9568_v26 = vmax.f32 %v9440_v11, 0.0  ;;  %v9182_v24 = vmax.f32 %v8091_v27, %v17585_v62  ;;  %v12521_v15 = vpop.f32.mrb[22].mxu0  ;;  %v17606_v62 = vld [vmem:[#allocation28_spill] sm:$0xff] }
 0x3a0   : > { %v9312_v52 = vmax.f32 %v17588_v58, %v9184_v22  ;;  %v9185_v9 = vmax.f32 %v12521_v15, %v17589_v35  ;;  %v8094_v0 = vpop.f32.mrb[23].mxu0  ;;  %v9688_v10 = vpack.c.bf16 %v9570_v46, %v9569_v47  ;;  %v17603_v47 = vld [vmem:[#allocation267_spill] sm:$0xff]  ;;  %v17605_v22 = vld [vmem:[#allocation153_spill] sm:$0xff] }
 0x3a1   : > { %v9310_v63 = vmax.f32 %v17592_v53, %v9182_v24  ;;  %v9183_v21 = vmax.f32 %v8094_v0, %v17593_v54  ;;  %v9687_v42 = vpack.c.bf16 %v9568_v26, %v9567_v7  ;;  %v17604_v46 = vmax.f32 %v17602_v14, %v17603_v47  ;;  %v17607_v24 = vld [vmem:[#allocation268_spill] sm:$0xff]  ;;  %v17611_v0 = vld [vmem:[#allocation269_spill] sm:$0xff]  ;;  %v17613_v53 = vld [vmem:[#allocation30_spill] sm:$0xff] }
 0x3a2   : > { %v9445_v19 = vadd.f32 %v15501_v57, %v9312_v52  ;;  %v9313_v59 = vmax.f32 %v17596_v44, %v9185_v9  ;;  %v17608_v15 = vmax.f32 %v17606_v62, %v17607_v24  ;;  %v17610_v9 = vld [vmem:[#allocation29_spill] sm:$0xff] }
 0x3a3   : > { %v9443_v38 = vadd.f32 %v15501_v57, %v9310_v63  ;;  %v9311_v41 = vmax.f32 %v17599_v28, %v9183_v21  ;;  %12786 = vmatprep.mubr.bf16.mxu1 %v9687_v42  ;;  %v17614_v63 = vld [vmem:[#allocation270_spill] sm:$0xff] }
 0x3a4   : > { %v9446_v45 = vadd.f32 %v15501_v57, %v9313_v59  ;;  %12787 = vmatmul.mubr.bf16.gmra.mrb[172].mxu1 %v9688_v10  ;;  %v9573_v2 = vmax.f32 %v9445_v19, 0.0  ;;  %v17612_v10 = vmax.f32 %v17610_v9, %v17611_v0  ;;  %v17615_v54 = vmax.f32 %v17613_v53, %v17614_v63  ;;  %v13304_v19 = vld [vmem:[%s16764_s1 + $0x80] sm:$0xff]  }
 0x3a5   : > { %v9444_v33 = vadd.f32 %v15501_v57, %v9311_v41  ;;  %v12524_v30 = vpop.f32.mrb[24].mxu0  ;;  %v9571_v61 = vmax.f32 %v9443_v38, 0.0  ;;  %v17616_v38 = vld [vmem:[#allocation155_spill] sm:$0xff]  ;;  %12898 = vmatprep.subr.bf16.mxu1 %v13304_v19 }
 0x3a6   : > { %v9574_v51 = vmax.f32 %v9446_v45, 0.0  ;;  %v9188_v40 = vmax.f32 %v12524_v30, %v17600_v5  ;;  %v8107_v49 = vpop.f32.mrb[25].mxu0  ;;  %v17617_v45 = vld [vmem:[#allocation157_spill] sm:$0xff]  ;;  %12899 = vmatpush3.bf16.msra.mxu1 %v13304_v19 }
 0x3a7   : > { %v9572_v23 = vmax.f32 %v9444_v33, 0.0  ;;  %v9186_v17 = vmax.f32 %v8107_v49, %v17601_v25  ;;  %v12525_v11 = vpop.f32.mrb[26].mxu0  ;;  %v17621_v49 = vld [vmem:[#allocation159_spill] sm:$0xff] }
 0x3a8   : > { %v9316_v16 = vmax.f32 %v17604_v46, %v9188_v40  ;;  %v9189_v27 = vmax.f32 %v12525_v11, %v17605_v22  ;;  %v8110_v7 = vpop.f32.mrb[27].mxu0  ;;  %v9690_v26 = vpack.c.bf16 %v9574_v51, %v9573_v2  ;;  %v17618_v2 = vld [vmem:[#allocation31_spill] sm:$0xff]  ;;  %v17623_v11 = vld [vmem:[#allocation272_spill] sm:$0xff]  ;;  %v17625_v46 = vld [vmem:[#allocation161_spill] sm:$0xff] }
 0x3a9   : > { %v9314_v50 = vmax.f32 %v17608_v15, %v9186_v17  ;;  %v9187_v58 = vmax.f32 %v8110_v7, %v17609_v31  ;;  %v9689_v52 = vpack.c.bf16 %v9572_v23, %v9571_v61  ;;  %v17619_v51 = vld [vmem:[#allocation271_spill] sm:$0xff]  ;;  %v17622_v17 = vld [vmem:[#allocation32_spill] sm:$0xff]  ;;  %v17626_v7 = vld [vmem:[#allocation33_spill] sm:$0xff] }
 0x3aa   : > { %v9449_v35 = vadd.f32 %v15501_v57, %v9316_v16  ;;  %v9317_v29 = vmax.f32 %v17612_v10, %v9189_v27  ;;  %v17620_v5 = vmax.f32 %v17618_v2, %v17619_v51  ;;  %v17624_v14 = vmax.f32 %v17622_v17, %v17623_v11  ;;  %v17630_v31 = vld [vmem:[#allocation274_spill] sm:$0xff] }
 0x3ab   : > { %v9447_v60 = vadd.f32 %v15501_v57, %v9314_v50  ;;  %v9315_v21 = vmax.f32 %v17615_v54, %v9187_v58  ;;  %12790 = vmatprep.mubr.bf16.mxu1 %v9689_v52  ;;  %v17629_v50 = vld [vmem:[#allocation34_spill] sm:$0xff] }
 0x3ac   : > { %v9450_v42 = vadd.f32 %v15501_v57, %v9317_v29  ;;  %12791 = vmatmul.mubr.bf16.gmra.mrb[176].mxu1 %v9690_v26  ;;  %v9577_v44 = vmax.f32 %v9449_v35, 0.0  ;;  %v17627_v26 = vld [vmem:[#allocation273_spill] sm:$0xff]  ;;  %v17631_v58 = vmax.f32 %v17629_v50, %v17630_v31  ;;  %v17641_v51 = vld [vmem:[#allocation166_spill] sm:$0xff] }
 0x3ad   : > { %v9448_v56 = vadd.f32 %v15501_v57, %v9315_v21  ;;  %v12528_v37 = vpop.f32.mrb[28].mxu0  ;;  %v9575_v28 = vmax.f32 %v9447_v60, 0.0  ;;  %v17628_v62 = vmax.f32 %v17626_v7, %v17627_v26  ;;  %v17632_v60 = vld [vmem:[#allocation163_spill] sm:$0xff] }
 0x3ae   : > { %v9578_v59 = vmax.f32 %v9450_v42, 0.0  ;;  %v9192_v12 = vmax.f32 %v12528_v37, %v17616_v38  ;;  %v8123_v3 = vpop.f32.mrb[29].mxu0  ;;  %v17633_v42 = vld [vmem:[#allocation164_spill] sm:$0xff]  ;;  %v17634_v37 = vld [vmem:[#allocation35_spill] sm:$0xff] }
 0x3af   : > { %v9576_v41 = vmax.f32 %v9448_v56, 0.0  ;;  %v9190_v33 = vmax.f32 %v8123_v3, %v17617_v45  ;;  %v12529_v30 = vpop.f32.mrb[30].mxu0  ;;  %v17638_v45 = vld [vmem:[#allocation36_spill] sm:$0xff] }
 0x3b0   : > { %v9320_v40 = vmax.f32 %v17620_v5, %v9192_v12  ;;  %v9193_v61 = vmax.f32 %v12529_v30, %v17621_v49  ;;  %v8126_v23 = vpop.f32.mrb[31].mxu0  ;;  %v9692_v25 = vpack.c.bf16 %v9578_v59, %v9577_v44  ;;  %v17635_v44 = vld [vmem:[#allocation275_spill] sm:$0xff]  ;;  %v17637_v12 = vld [vmem:[#allocation165_spill] sm:$0xff] }
 0x3b1   : > { %v9318_v47 = vmax.f32 %v17624_v14, %v9190_v33  ;;  %v9191_v16 = vmax.f32 %v8126_v23, %v17625_v46  ;;  %v9691_v22 = vpack.c.bf16 %v9576_v41, %v9575_v28  ;;  %v17636_v59 = vmax.f32 %v17634_v37, %v17635_v44  ;;  %v17639_v33 = vld [vmem:[#allocation276_spill] sm:$0xff]  ;;  %v17643_v23 = vld [vmem:[#allocation277_spill] sm:$0xff]  ;;  %v17645_v14 = vld [vmem:[#allocation38_spill] sm:$0xff] }
 0x3b2   : > { %v9453_v27 = vadd.f32 %v15501_v57, %v9320_v40  ;;  %v9321_v24 = vmax.f32 %v17628_v62, %v9193_v61  ;;  %v17640_v30 = vmax.f32 %v17638_v45, %v17639_v33  ;;  %v17642_v61 = vld [vmem:[#allocation37_spill] sm:$0xff] }
 0x3b3   : > { %v9451_v15 = vadd.f32 %v15501_v57, %v9318_v47  ;;  %v9319_v52 = vmax.f32 %v17631_v58, %v9191_v16  ;;  %12794 = vmatprep.mubr.bf16.mxu1 %v9691_v22  ;;  %v17646_v47 = vld [vmem:[#allocation278_spill] sm:$0xff]  ;;  %v17657_v44 = vld [vmem:[#allocation173_spill] sm:$0xff] }
 0x3b4   : > { %v9454_v35 = vadd.f32 %v15501_v57, %v9321_v24  ;;  %12795 = vmatmul.mubr.bf16.gmra.mrb[180].mxu1 %v9692_v25  ;;  %v9581_v10 = vmax.f32 %v9453_v27, 0.0  ;;  %v17644_v25 = vmax.f32 %v17642_v61, %v17643_v23  ;;  %v17647_v46 = vmax.f32 %v17645_v14, %v17646_v47  ;;  %v17648_v24 = vld [vmem:[#allocation167_spill] sm:$0xff]  ;;  %v13305_v23 = vld [vmem:[%s16764_s1 + $0x88] sm:$0xff]  }
 0x3b5   : > { %v9452_v9 = vadd.f32 %v15501_v57, %v9319_v52  ;;  %v12532_v0 = vpop.f32.mrb[32].mxu0  ;;  %v9579_v54 = vmax.f32 %v9451_v15, 0.0  ;;  %v17649_v52 = vld [vmem:[#allocation169_spill] sm:$0xff]  ;;  %12900 = vmatprep.subr.bf16.mxu1 %v13305_v23 }
 0x3b6   : > { %v9582_v29 = vmax.f32 %v9454_v35, 0.0  ;;  %v9196_v53 = vmax.f32 %v12532_v0, %v17632_v60  ;;  %v8139_v63 = vpop.f32.mrb[33].mxu0  ;;  %v17650_v0 = vld [vmem:[#allocation39_spill] sm:$0xff]  ;;  %12901 = vmatpush3.bf16.msra.mxu1 %v13305_v23 }
 0x3b7   : > { %v9580_v21 = vmax.f32 %v9452_v9, 0.0  ;;  %v9194_v19 = vmax.f32 %v8139_v63, %v17633_v42  ;;  %v12533_v56 = vpop.f32.mrb[34].mxu0  ;;  %v17654_v42 = vld [vmem:[#allocation40_spill] sm:$0xff]  ;;  %v17682_v23 = vld [vmem:[#allocation47_spill] sm:$0xff] }
 0x3b8   : > { %v9324_v38 = vmax.f32 %v17636_v59, %v9196_v53  ;;  %v9197_v3 = vmax.f32 %v12533_v56, %v17637_v12  ;;  %v8142_v28 = vpop.f32.mrb[35].mxu0  ;;  %v9694_v41 = vpack.c.bf16 %v9582_v29, %v9581_v10  ;;  %v17651_v10 = vld [vmem:[#allocation279_spill] sm:$0xff] }
 0x3b9   : > { %v9322_v2 = vmax.f32 %v17640_v30, %v9194_v19  ;;  %v9195_v5 = vmax.f32 %v8142_v28, %v17641_v51  ;;  %v9693_v40 = vpack.c.bf16 %v9580_v21, %v9579_v54  ;;  %v17652_v29 = vmax.f32 %v17650_v0, %v17651_v10  ;;  %v17653_v53 = vld [vmem:[#allocation171_spill] sm:$0xff]  ;;  %v17655_v19 = vld [vmem:[#allocation280_spill] sm:$0xff]  ;;  %v17659_v28 = vld [vmem:[#allocation281_spill] sm:$0xff] }
 0x3ba   : > { %v9457_v49 = vadd.f32 %v15501_v57, %v9324_v38  ;;  %v9325_v17 = vmax.f32 %v17644_v25, %v9197_v3  ;;  %v17656_v56 = vmax.f32 %v17654_v42, %v17655_v19  ;;  %v17658_v3 = vld [vmem:[#allocation41_spill] sm:$0xff]  ;;  %v17661_v30 = vld [vmem:[#allocation42_spill] sm:$0xff] }
 0x3bb   : > { %v9455_v11 = vadd.f32 %v15501_v57, %v9322_v2  ;;  %v9323_v16 = vmax.f32 %v17647_v46, %v9195_v5  ;;  %12798 = vmatprep.mubr.bf16.mxu1 %v9693_v40  ;;  %v17662_v2 = vld [vmem:[#allocation282_spill] sm:$0xff] }
 0x3bc   : > { %v9458_v22 = vadd.f32 %v15501_v57, %v9325_v17  ;;  %12799 = vmatmul.mubr.bf16.gmra.mrb[184].mxu1 %v9694_v41  ;;  %v9585_v26 = vmax.f32 %v9457_v49, 0.0  ;;  %v17660_v41 = vmax.f32 %v17658_v3, %v17659_v28  ;;  %v17663_v51 = vmax.f32 %v17661_v30, %v17662_v2 }
 0x3bd   : > { %v9456_v27 = vadd.f32 %v15501_v57, %v9323_v16  ;;  %v12536_v7 = vpop.f32.mrb[36].mxu0  ;;  %v9583_v31 = vmax.f32 %v9455_v11, 0.0  ;;  %v17664_v11 = vld [vmem:[#allocation175_spill] sm:$0xff] }
 0x3be   : > { %v9586_v62 = vmax.f32 %v9458_v22, 0.0  ;;  %v9200_v15 = vmax.f32 %v12536_v7, %v17648_v24  ;;  %v8155_v50 = vpop.f32.mrb[37].mxu0  ;;  %v17665_v22 = vld [vmem:[#allocation176_spill] sm:$0xff] }
 0x3bf   : > { %v9584_v58 = vmax.f32 %v9456_v27, 0.0  ;;  %v9198_v35 = vmax.f32 %v8155_v50, %v17649_v52  ;;  %v12537_v9 = vpop.f32.mrb[38].mxu0  ;;  %v17669_v50 = vld [vmem:[#allocation177_spill] sm:$0xff] }
 0x3c0   : > { %v9328_v60 = vmax.f32 %v17652_v29, %v9200_v15  ;;  %v9201_v63 = vmax.f32 %v12537_v9, %v17653_v53  ;;  %v8158_v54 = vpop.f32.mrb[39].mxu0  ;;  %v9696_v21 = vpack.c.bf16 %v9586_v62, %v9585_v26  ;;  %v17666_v26 = vld [vmem:[#allocation43_spill] sm:$0xff]  ;;  %v17671_v9 = vld [vmem:[#allocation97_spill] sm:$0xff]  ;;  %v17673_v29 = vld [vmem:[#allocation178_spill] sm:$0xff] }
 0x3c1   : > { %v9326_v37 = vmax.f32 %v17656_v56, %v9198_v35  ;;  %v9199_v59 = vmax.f32 %v8158_v54, %v17657_v44  ;;  %v9695_v38 = vpack.c.bf16 %v9584_v58, %v9583_v31  ;;  %v17667_v62 = vld [vmem:[#allocation95_spill] sm:$0xff]  ;;  %v17670_v35 = vld [vmem:[#allocation44_spill] sm:$0xff]  ;;  %v17674_v54 = vld [vmem:[#allocation45_spill] sm:$0xff] }
 0x3c2   : > { %v9461_v12 = vadd.f32 %v15501_v57, %v9328_v60  ;;  %v9329_v45 = vmax.f32 %v17660_v41, %v9201_v63  ;;  %v17668_v24 = vmax.f32 %v17666_v26, %v17667_v62  ;;  %v17672_v0 = vmax.f32 %v17670_v35, %v17671_v9  ;;  %v17678_v44 = vld [vmem:[#allocation101_spill] sm:$0xff] }
 0x3c3   : > { %v9459_v33 = vadd.f32 %v15501_v57, %v9326_v37  ;;  %v9327_v5 = vmax.f32 %v17663_v51, %v9199_v59  ;;  %12802 = vmatprep.mubr.bf16.mxu1 %v9695_v38  ;;  %v17677_v37 = vld [vmem:[#allocation46_spill] sm:$0xff]  ;;  %v17689_v62 = vld [vmem:[#allocation185_spill] sm:$0xff] }
 0x3c4   : > { %v9462_v40 = vadd.f32 %v15501_v57, %v9329_v45  ;;  %12803 = vmatmul.mubr.bf16.gmra.mrb[188].mxu1 %v9696_v21  ;;  %v9589_v25 = vmax.f32 %v9461_v12, 0.0  ;;  %v17675_v21 = vld [vmem:[#allocation99_spill] sm:$0xff]  ;;  %v17679_v59 = vmax.f32 %v17677_v37, %v17678_v44 }
 0x3c5   : > { %v9460_v49 = vadd.f32 %v15501_v57, %v9327_v5  ;;  %v12540_v61 = vpop.f32.mrb[40].mxu0  ;;  %v9587_v46 = vmax.f32 %v9459_v33, 0.0  ;;  %v17676_v42 = vmax.f32 %v17674_v54, %v17675_v21  ;;  %v17680_v33 = vld [vmem:[#allocation179_spill] sm:$0xff] }
 0x3c6   : > { %v9590_v17 = vmax.f32 %v9462_v40, 0.0  ;;  %v9204_v14 = vmax.f32 %v12540_v61, %v17664_v11  ;;  %v8171_v47 = vpop.f32.mrb[41].mxu0  ;;  %v17681_v40 = vld [vmem:[#allocation181_spill] sm:$0xff] }
 0x3c7   : > { %v9588_v16 = vmax.f32 %v9460_v49, 0.0  ;;  %v9202_v27 = vmax.f32 %v8171_v47, %v17665_v22  ;;  %v12541_v7 = vpop.f32.mrb[42].mxu0  ;;  %v17686_v22 = vld [vmem:[#allocation48_spill] sm:$0xff] }
 0x3c8   : > { %v9332_v15 = vmax.f32 %v17668_v24, %v9204_v14  ;;  %v9205_v31 = vmax.f32 %v12541_v7, %v17669_v50  ;;  %v8174_v58 = vpop.f32.mrb[43].mxu0  ;;  %v9698_v52 = vpack.c.bf16 %v9590_v17, %v9589_v25  ;;  %v17683_v25 = vld [vmem:[#allocation104_spill] sm:$0xff]  ;;  %v17685_v14 = vld [vmem:[#allocation183_spill] sm:$0xff] }
 0x3c9   : > { %v9330_v10 = vmax.f32 %v17672_v0, %v9202_v27  ;;  %v9203_v60 = vmax.f32 %v8174_v58, %v17673_v29  ;;  %v9697_v53 = vpack.c.bf16 %v9588_v16, %v9587_v46  ;;  %v17684_v17 = vmax.f32 %v17682_v23, %v17683_v25  ;;  %v17687_v27 = vld [vmem:[#allocation105_spill] sm:$0xff]  ;;  %v17691_v58 = vld [vmem:[#allocation283_spill] sm:$0xff]  ;;  %v17693_v0 = vld [vmem:[#allocation50_spill] sm:$0xff] }
 0x3ca   : > { %v9465_v63 = vadd.f32 %v15501_v57, %v9332_v15  ;;  %v9333_v19 = vmax.f32 %v17676_v42, %v9205_v31  ;;  %v17688_v7 = vmax.f32 %v17686_v22, %v17687_v27  ;;  %v17690_v31 = vld [vmem:[#allocation49_spill] sm:$0xff]  ;;  %v17705_v25 = vld [vmem:[#allocation190_spill] sm:$0xff] }
 0x3cb   : > { %v9463_v56 = vadd.f32 %v15501_v57, %v9330_v10  ;;  %v9331_v38 = vmax.f32 %v17679_v59, %v9203_v60  ;;  %12806 = vmatprep.mubr.bf16.mxu1 %v9697_v53  ;;  %v17694_v10 = vld [vmem:[#allocation284_spill] sm:$0xff] }
 0x3cc   : > { %v9466_v12 = vadd.f32 %v15501_v57, %v9333_v19  ;;  %12807 = vmatmul.mubr.bf16.gmra.mrb[192].mxu1 %v9698_v52  ;;  %v9593_v41 = vmax.f32 %v9465_v63, 0.0  ;;  %v17692_v52 = vmax.f32 %v17690_v31, %v17691_v58  ;;  %v17695_v29 = vmax.f32 %v17693_v0, %v17694_v10  ;;  %v17696_v19 = vld [vmem:[#allocation187_spill] sm:$0xff] }
 0x3cd   : > { %v9464_v3 = vadd.f32 %v15501_v57, %v9331_v38  ;;  %v12544_v28 = vpop.f32.mrb[44].mxu0  ;;  %v9591_v51 = vmax.f32 %v9463_v56, 0.0  ;;  %v17697_v38 = vld [vmem:[#allocation188_spill] sm:$0xff] }
 0x3ce   : > { %v9594_v45 = vmax.f32 %v9466_v12, 0.0  ;;  %v9208_v30 = vmax.f32 %v12544_v28, %v17680_v33  ;;  %v8187_v2 = vpop.f32.mrb[45].mxu0  ;;  %v17698_v28 = vld [vmem:[#allocation51_spill] sm:$0xff] }
 0x3cf   : > { %v9592_v5 = vmax.f32 %v9464_v3, 0.0  ;;  %v9206_v49 = vmax.f32 %v8187_v2, %v17681_v40  ;;  %v12545_v61 = vpop.f32.mrb[46].mxu0  ;;  %v17702_v40 = vld [vmem:[#allocation52_spill] sm:$0xff] }
 0x3d0   : > { %v9336_v11 = vmax.f32 %v17684_v17, %v9208_v30  ;;  %v9209_v47 = vmax.f32 %v12545_v61, %v17685_v14  ;;  %v8190_v46 = vpop.f32.mrb[47].mxu0  ;;  %v9700_v16 = vpack.c.bf16 %v9594_v45, %v9593_v41  ;;  %v17699_v41 = vld [vmem:[#allocation289_spill] sm:$0xff] }
 0x3d1   : > { %v9334_v26 = vmax.f32 %v17688_v7, %v9206_v49  ;;  %v9207_v24 = vmax.f32 %v8190_v46, %v17689_v62  ;;  %v9699_v15 = vpack.c.bf16 %v9592_v5, %v9591_v51  ;;  %v17700_v45 = vmax.f32 %v17698_v28, %v17699_v41  ;;  %v17701_v30 = vld [vmem:[#allocation189_spill] sm:$0xff]  ;;  %v17703_v49 = vld [vmem:[#allocation290_spill] sm:$0xff]  ;;  %v17707_v46 = vld [vmem:[#allocation291_spill] sm:$0xff] }
 0x3d2   : > { %v9469_v50 = vadd.f32 %v15501_v57, %v9336_v11  ;;  %v9337_v35 = vmax.f32 %v17692_v52, %v9209_v47  ;;  %v17704_v61 = vmax.f32 %v17702_v40, %v17703_v49  ;;  %v17706_v47 = vld [vmem:[#allocation53_spill] sm:$0xff]  ;;  %v17709_v7 = vld [vmem:[#allocation54_spill] sm:$0xff] }
 0x3d3   : > { %v9467_v9 = vadd.f32 %v15501_v57, %v9334_v26  ;;  %v9335_v60 = vmax.f32 %v17695_v29, %v9207_v24  ;;  %12810 = vmatprep.mubr.bf16.mxu1 %v9699_v15  ;;  %v17710_v26 = vld [vmem:[#allocation292_spill] sm:$0xff]  ;;  %v17721_v41 = vld [vmem:[#allocation197_spill] sm:$0xff] }
 0x3d4   : > { %v9470_v53 = vadd.f32 %v15501_v57, %v9337_v35  ;;  %12811 = vmatmul.mubr.bf16.gmra.mrb[196].mxu1 %v9700_v16  ;;  %v9597_v21 = vmax.f32 %v9469_v50, 0.0  ;;  %v17708_v16 = vmax.f32 %v17706_v47, %v17707_v46  ;;  %v17711_v62 = vmax.f32 %v17709_v7, %v17710_v26  ;;  %v17712_v35 = vld [vmem:[#allocation191_spill] sm:$0xff]  ;;  %v13306_v46 = vld [vmem:[%s16764_s1 + $0x90] sm:$0xff]  }
 0x3d5   : > { %v9468_v63 = vadd.f32 %v15501_v57, %v9335_v60  ;;  %v12548_v54 = vpop.f32.mrb[48].mxu0  ;;  %v9595_v44 = vmax.f32 %v9467_v9, 0.0  ;;  %v17713_v60 = vld [vmem:[#allocation193_spill] sm:$0xff]  ;;  %12902 = vmatprep.subr.bf16.mxu1 %v13306_v46 }
 0x3d6   : > { %v9598_v42 = vmax.f32 %v9470_v53, 0.0  ;;  %v9212_v56 = vmax.f32 %v12548_v54, %v17696_v19  ;;  %v8203_v37 = vpop.f32.mrb[49].mxu0  ;;  %v17714_v54 = vld [vmem:[#allocation55_spill] sm:$0xff]  ;;  %12903 = vmatpush3.bf16.msra.mxu1 %v13306_v46 }
 0x3d7   : > { %v9596_v59 = vmax.f32 %v9468_v63, 0.0  ;;  %v9210_v12 = vmax.f32 %v8203_v37, %v17697_v38  ;;  %v12549_v3 = vpop.f32.mrb[50].mxu0  ;;  %v17718_v38 = vld [vmem:[#allocation56_spill] sm:$0xff]  ;;  %v17746_v46 = vld [vmem:[#allocation63_spill] sm:$0xff] }
 0x3d8   : > { %v9340_v33 = vmax.f32 %v17700_v45, %v9212_v56  ;;  %v9213_v2 = vmax.f32 %v12549_v3, %v17701_v30  ;;  %v8206_v51 = vpop.f32.mrb[51].mxu0  ;;  %v9702_v5 = vpack.c.bf16 %v9598_v42, %v9597_v21  ;;  %v17715_v21 = vld [vmem:[#allocation293_spill] sm:$0xff]  ;;  %v17717_v56 = vld [vmem:[#allocation195_spill] sm:$0xff] }
 0x3d9   : > { %v9338_v23 = vmax.f32 %v17704_v61, %v9210_v12  ;;  %v9211_v17 = vmax.f32 %v8206_v51, %v17705_v25  ;;  %v9701_v11 = vpack.c.bf16 %v9596_v59, %v9595_v44  ;;  %v17716_v42 = vmax.f32 %v17714_v54, %v17715_v21  ;;  %v17719_v12 = vld [vmem:[#allocation294_spill] sm:$0xff]  ;;  %v17723_v51 = vld [vmem:[#allocation295_spill] sm:$0xff] }
 0x3da   : > { %v9473_v14 = vadd.f32 %v15501_v57, %v9340_v33  ;;  %v9341_v22 = vmax.f32 %v17708_v16, %v9213_v2  ;;  %v17720_v3 = vmax.f32 %v17718_v38, %v17719_v12  ;;  %v17722_v2 = vld [vmem:[#allocation57_spill] sm:$0xff]  ;;  %v17725_v61 = vld [vmem:[#allocation58_spill] sm:$0xff] }
 0x3db   : > { %v9471_v27 = vadd.f32 %v15501_v57, %v9338_v23  ;;  %v9339_v24 = vmax.f32 %v17711_v62, %v9211_v17  ;;  %12814 = vmatprep.mubr.bf16.mxu1 %v9701_v11  ;;  %v17726_v23 = vld [vmem:[#allocation296_spill] sm:$0xff]  ;;  %v17737_v21 = vld [vmem:[#allocation202_spill] sm:$0xff] }
 0x3dc   : > { %v9474_v15 = vadd.f32 %v15501_v57, %v9341_v22  ;;  %12815 = vmatmul.mubr.bf16.gmra.mrb[200].mxu1 %v9702_v5  ;;  %v9601_v58 = vmax.f32 %v9473_v14, 0.0  ;;  %v17724_v5 = vmax.f32 %v17722_v2, %v17723_v51  ;;  %v17727_v25 = vmax.f32 %v17725_v61, %v17726_v23 }
 0x3dd   : > { %v9472_v50 = vadd.f32 %v15501_v57, %v9339_v24  ;;  %v12552_v31 = vpop.f32.mrb[52].mxu0  ;;  %v9599_v10 = vmax.f32 %v9471_v27, 0.0  ;;  %v17728_v27 = vld [vmem:[#allocation199_spill] sm:$0xff] }
 0x3de   : > { %v9602_v52 = vmax.f32 %v9474_v15, 0.0  ;;  %v9216_v9 = vmax.f32 %v12552_v31, %v17712_v35  ;;  %v8219_v0 = vpop.f32.mrb[53].mxu0  ;;  %v17729_v15 = vld [vmem:[#allocation200_spill] sm:$0xff] }
 0x3df   : > { %v9600_v29 = vmax.f32 %v9472_v50, 0.0  ;;  %v9214_v53 = vmax.f32 %v8219_v0, %v17713_v60  ;;  %v12553_v63 = vpop.f32.mrb[54].mxu0  ;;  %v17734_v60 = vld [vmem:[#allocation60_spill] sm:$0xff] }
 0x3e0   : > { %v9344_v19 = vmax.f32 %v17716_v42, %v9216_v9  ;;  %v9217_v37 = vmax.f32 %v12553_v63, %v17717_v56  ;;  %v8222_v44 = vpop.f32.mrb[55].mxu0  ;;  %v9704_v59 = vpack.c.bf16 %v9602_v52, %v9601_v58  ;;  %v17730_v58 = vld [vmem:[#allocation59_spill] sm:$0xff]  ;;  %v17731_v52 = vld [vmem:[#allocation297_spill] sm:$0xff] }
 0x3e1   : > { %v9342_v28 = vmax.f32 %v17720_v3, %v9214_v53  ;;  %v9215_v45 = vmax.f32 %v8222_v44, %v17721_v41  ;;  %v9703_v33 = vpack.c.bf16 %v9600_v29, %v9599_v10  ;;  %v17732_v35 = vmax.f32 %v17730_v58, %v17731_v52  ;;  %v17733_v9 = vld [vmem:[#allocation201_spill] sm:$0xff]  ;;  %v17735_v53 = vld [vmem:[#allocation298_spill] sm:$0xff]  ;;  %v15989_v56 = vld [vmem:[%s16765_s2] ss:$0 sm:$0xff] }
 0x3e2   : > { %v9477_v30 = vadd.f32 %v15501_v57, %v9344_v19  ;;  %v9345_v40 = vmax.f32 %v17724_v5, %v9217_v37  ;;  %v17736_v63 = vmax.f32 %v17734_v60, %v17735_v53  ;;  %v17738_v44 = vld [vmem:[#allocation61_spill] sm:$0xff]  ;;  %v17742_v41 = vld [vmem:[#allocation300_spill] sm:$0xff] }
 0x3e3   : > { %v9475_v49 = vadd.f32 %v15501_v57, %v9342_v28  ;;  %v9343_v17 = vmax.f32 %v17727_v25, %v9215_v45  ;;  %12818 = vmatprep.mubr.bf16.mxu1 %v9703_v33  ;;  %v17741_v28 = vld [vmem:[#allocation62_spill] sm:$0xff]  ;;  %v17753_v52 = vld [vmem:[#allocation209_spill] sm:$0xff] }
 0x3e4   : > { %v9478_v11 = vadd.f32 %v15501_v57, %v9345_v40  ;;  %12819 = vmatmul.mubr.bf16.gmra.mrb[204].mxu1 %v9704_v59  ;;  %v9605_v16 = vmax.f32 %v9477_v30, 0.0  ;;  %v17739_v59 = vld [vmem:[#allocation299_spill] sm:$0xff]  ;;  %v17743_v45 = vmax.f32 %v17741_v28, %v17742_v41 }
 0x3e5   : > { %v9476_v14 = vadd.f32 %v15501_v57, %v9343_v17  ;;  %v12556_v47 = vpop.f32.mrb[56].mxu0  ;;  %v9603_v62 = vmax.f32 %v9475_v49, 0.0  ;;  %v17740_v38 = vmax.f32 %v17738_v44, %v17739_v59  ;;  %v17744_v49 = vld [vmem:[#allocation203_spill] sm:$0xff] }
 0x3e6   : > { %v9606_v22 = vmax.f32 %v9478_v11, 0.0  ;;  %v9220_v7 = vmax.f32 %v12556_v47, %v17728_v27  ;;  %v8235_v26 = vpop.f32.mrb[57].mxu0  ;;  %v17745_v11 = vld [vmem:[#allocation205_spill] sm:$0xff] }
 0x3e7   : > { %v9604_v24 = vmax.f32 %v9476_v14, 0.0  ;;  %v9218_v50 = vmax.f32 %v8235_v26, %v17729_v15  ;;  %v12557_v31 = vpop.f32.mrb[58].mxu0  ;;  %v17750_v15 = vld [vmem:[#allocation64_spill] sm:$0xff] }
 0x3e8   : > { %v9348_v57 = vmax.f32 %v17732_v35, %v9220_v7  ;;  %v9221_v0 = vmax.f32 %v12557_v31, %v17733_v9  ;;  %v8238_v10 = vpop.f32.mrb[59].mxu0  ;;  %v9706_v29 = vpack.c.bf16 %v9606_v22, %v9605_v16  ;;  %v17747_v16 = vld [vmem:[#allocation301_spill] sm:$0xff]  ;;  %v17749_v7 = vld [vmem:[#allocation207_spill] sm:$0xff] }
 0x3e9   : > { %v9346_v54 = vmax.f32 %v17736_v63, %v9218_v50  ;;  %v9219_v42 = vmax.f32 %v8238_v10, %v17737_v21  ;;  %v9705_v19 = vpack.c.bf16 %v9604_v24, %v9603_v62  ;;  %v17748_v22 = vmax.f32 %v17746_v46, %v17747_v16  ;;  %v17751_v50 = vld [vmem:[#allocation302_spill] sm:$0xff]  ;;  %v17755_v10 = vld [vmem:[#allocation303_spill] sm:$0xff] }
 0x3ea   : > { %v9481_v37 = vadd.f32 %v15989_v56, %v9348_v57  ;;  %v9349_v12 = vmax.f32 %v17740_v38, %v9221_v0  ;;  %v17752_v31 = vmax.f32 %v17750_v15, %v17751_v50  ;;  %v17754_v0 = vld [vmem:[#allocation65_spill] sm:$0xff]  ;;  %v17757_v63 = vld [vmem:[#allocation66_spill] sm:$0xff] }
 0x3eb   : > { %v9479_v3 = vadd.f32 %v15989_v56, %v9346_v54  ;;  %v9347_v33 = vmax.f32 %v17743_v45, %v9219_v42  ;;  %12822 = vmatprep.mubr.bf16.mxu1 %v9705_v19  ;;  %v17758_v54 = vld [vmem:[#allocation304_spill] sm:$0xff]  ;;  %v17769_v16 = vld [vmem:[#allocation214_spill] sm:$0xff] }
 0x3ec   : > { %v9482_v30 = vadd.f32 %v15989_v56, %v9349_v12  ;;  %12823 = vmatmul.mubr.bf16.gmra.mrb[208].mxu1 %v9706_v29  ;;  %v9609_v5 = vmax.f32 %v9481_v37, 0.0  ;;  %v17756_v29 = vmax.f32 %v17754_v0, %v17755_v10  ;;  %v17759_v21 = vmax.f32 %v17757_v63, %v17758_v54  ;;  %v17760_v12 = vld [vmem:[#allocation211_spill] sm:$0xff] }
 0x3ed   : > { %v9480_v2 = vadd.f32 %v15989_v56, %v9347_v33  ;;  %v12560_v51 = vpop.f32.mrb[60].mxu0  ;;  %v9607_v25 = vmax.f32 %v9479_v3, 0.0  ;;  %v17761_v33 = vld [vmem:[#allocation212_spill] sm:$0xff] }
 0x3ee   : > { %v9610_v40 = vmax.f32 %v9482_v30, 0.0  ;;  %v9224_v61 = vmax.f32 %v12560_v51, %v17744_v49  ;;  %v8251_v23 = vpop.f32.mrb[61].mxu0  ;;  %v17762_v51 = vld [vmem:[#allocation67_spill] sm:$0xff] }
 0x3ef   : > { %v9608_v17 = vmax.f32 %v9480_v2, 0.0  ;;  %v9222_v14 = vmax.f32 %v8251_v23, %v17745_v11  ;;  %v12561_v47 = vpop.f32.mrb[62].mxu0  ;;  %v17766_v11 = vld [vmem:[#allocation68_spill] sm:$0xff] }
 0x3f0   : > { %v9352_v27 = vmax.f32 %v17748_v22, %v9224_v61  ;;  %v9225_v26 = vmax.f32 %v12561_v47, %v17749_v7  ;;  %v8254_v62 = vpop.f32.mrb[63].mxu0  ;;  %v9708_v24 = vpack.c.bf16 %v9610_v40, %v9609_v5  ;;  %v17763_v5 = vld [vmem:[#allocation305_spill] sm:$0xff] }
 0x3f1   : > { %v9350_v58 = vmax.f32 %v17752_v31, %v9222_v14  ;;  %v9223_v35 = vmax.f32 %v8254_v62, %v17753_v52  ;;  %v9707_v57 = vpack.c.bf16 %v9608_v17, %v9607_v25  ;;  %v17764_v40 = vmax.f32 %v17762_v51, %v17763_v5  ;;  %v17765_v61 = vld [vmem:[#allocation213_spill] sm:$0xff]  ;;  %v17767_v14 = vld [vmem:[#allocation306_spill] sm:$0xff]  ;;  %v17771_v62 = vld [vmem:[#allocation307_spill] sm:$0xff] }
 0x3f2   : > { %v9485_v9 = vadd.f32 %v15989_v56, %v9352_v27  ;;  %v9353_v60 = vmax.f32 %v17756_v29, %v9225_v26  ;;  %v17768_v47 = vmax.f32 %v17766_v11, %v17767_v14  ;;  %v17770_v26 = vld [vmem:[#allocation69_spill] sm:$0xff]  ;;  %v17773_v31 = vld [vmem:[#allocation70_spill] sm:$0xff] }
 0x3f3   : > { %v9483_v53 = vadd.f32 %v15989_v56, %v9350_v58  ;;  %v9351_v42 = vmax.f32 %v17759_v21, %v9223_v35  ;;  %12826 = vmatprep.mubr.bf16.mxu1 %v9707_v57  ;;  %v17774_v58 = vld [vmem:[#allocation308_spill] sm:$0xff]  ;;  %v17785_v5 = vld [vmem:[#allocation221_spill] sm:$0xff]  ;;  %v13307_v14 = vld [vmem:[%s16764_s1 + $0x98] sm:$0xff]  }
 0x3f4   : > { %v9486_v19 = vadd.f32 %v15989_v56, %v9353_v60  ;;  %12827 = vmatmul.mubr.bf16.gmra.mrb[212].mxu1 %v9708_v24  ;;  %v9613_v59 = vmax.f32 %v9485_v9, 0.0  ;;  %v17772_v24 = vmax.f32 %v17770_v26, %v17771_v62  ;;  %v17775_v52 = vmax.f32 %v17773_v31, %v17774_v58  ;;  %v17776_v60 = vld [vmem:[#allocation215_spill] sm:$0xff]  ;;  %12904 = vmatprep.subr.bf16.mxu1 %v13307_v14 }
 0x3f5   : > { %v9484_v37 = vadd.f32 %v15989_v56, %v9351_v42  ;;  %v12564_v44 = vpop.f32.mrb[64].mxu0  ;;  %v9611_v41 = vmax.f32 %v9483_v53, 0.0  ;;  %v17777_v42 = vld [vmem:[#allocation217_spill] sm:$0xff]  ;;  %12905 = vmatpush3.bf16.msra.mxu1 %v13307_v14  ;;  %v17808_v14 = vld [vmem:[#allocation227_spill] sm:$0xff] }
 0x3f6   : > { %v9614_v38 = vmax.f32 %v9486_v19, 0.0  ;;  %v9228_v3 = vmax.f32 %v12564_v44, %v17760_v12  ;;  %v8267_v28 = vpop.f32.mrb[65].mxu0  ;;  %v17778_v44 = vld [vmem:[#allocation71_spill] sm:$0xff] }
 0x3f7   : > { %v9612_v45 = vmax.f32 %v9484_v37, 0.0  ;;  %v9226_v30 = vmax.f32 %v8267_v28, %v17761_v33  ;;  %v12565_v2 = vpop.f32.mrb[66].mxu0  ;;  %v17782_v33 = vld [vmem:[#allocation72_spill] sm:$0xff] }
 0x3f8   : > { %v9356_v49 = vmax.f32 %v17764_v40, %v9228_v3  ;;  %v9229_v23 = vmax.f32 %v12565_v2, %v17765_v61  ;;  %v8270_v25 = vpop.f32.mrb[67].mxu0  ;;  %v9710_v17 = vpack.c.bf16 %v9614_v38, %v9613_v59  ;;  %v17779_v59 = vld [vmem:[#allocation309_spill] sm:$0xff]  ;;  %v17781_v3 = vld [vmem:[#allocation219_spill] sm:$0xff] }
 0x3f9   : > { %v9354_v46 = vmax.f32 %v17768_v47, %v9226_v30  ;;  %v9227_v22 = vmax.f32 %v8270_v25, %v17769_v16  ;;  %v9709_v27 = vpack.c.bf16 %v9612_v45, %v9611_v41  ;;  %v17780_v38 = vmax.f32 %v17778_v44, %v17779_v59  ;;  %v17783_v30 = vld [vmem:[#allocation310_spill] sm:$0xff]  ;;  %v17787_v25 = vld [vmem:[#allocation311_spill] sm:$0xff]  ;;  %v17790_v16 = vld [vmem:[#allocation312_spill] sm:$0xff] }
 0x3fa   : > { %v9489_v7 = vadd.f32 %v15989_v56, %v9356_v49  ;;  %v9357_v15 = vmax.f32 %v17772_v24, %v9229_v23  ;;  %v17784_v2 = vmax.f32 %v17782_v33, %v17783_v30  ;;  %v17786_v23 = vld [vmem:[#allocation73_spill] sm:$0xff] }
 0x3fb   : > { %v9487_v50 = vadd.f32 %v15989_v56, %v9354_v46  ;;  %v9355_v35 = vmax.f32 %v17775_v52, %v9227_v22  ;;  %12830 = vmatprep.mubr.bf16.mxu1 %v9709_v27  ;;  %v17789_v46 = vld [vmem:[#allocation74_spill] sm:$0xff] }
 0x3fc   : > { %v9490_v57 = vadd.f32 %v15989_v56, %v9357_v15  ;;  %12831 = vmatmul.mubr.bf16.gmra.mrb[216].mxu1 %v9710_v17  ;;  %v9617_v10 = vmax.f32 %v9489_v7, 0.0  ;;  %v17788_v17 = vmax.f32 %v17786_v23, %v17787_v25  ;;  %v17791_v22 = vmax.f32 %v17789_v46, %v17790_v16 }
 0x3fd   : > { %v9488_v9 = vadd.f32 %v15989_v56, %v9355_v35  ;;  %v12568_v0 = vpop.f32.mrb[68].mxu0  ;;  %v9615_v54 = vmax.f32 %v9487_v50, 0.0  ;;  %v17792_v50 = vld [vmem:[#allocation223_spill] sm:$0xff] }
 0x3fe   : > { %v9618_v29 = vmax.f32 %v9490_v57, 0.0  ;;  %v9232_v53 = vmax.f32 %v12568_v0, %v17776_v60  ;;  %v8283_v63 = vpop.f32.mrb[69].mxu0  ;;  %v17793_v57 = vld [vmem:[#allocation224_spill] sm:$0xff] }
 0x3ff   : > { %v9616_v21 = vmax.f32 %v9488_v9, 0.0  ;;  %v9230_v19 = vmax.f32 %v8283_v63, %v17777_v42  ;;  %v12569_v37 = vpop.f32.mrb[70].mxu0  ;;  %v17797_v63 = vld [vmem:[#allocation225_spill] sm:$0xff] }
 0x400   : > { %v9360_v12 = vmax.f32 %v17780_v38, %v9232_v53  ;;  %v9233_v28 = vmax.f32 %v12569_v37, %v17781_v3  ;;  %v8286_v41 = vpop.f32.mrb[71].mxu0  ;;  %v9712_v45 = vpack.c.bf16 %v9618_v29, %v9617_v10  ;;  %v17794_v10 = vld [vmem:[#allocation75_spill] sm:$0xff]  ;;  %v17795_v29 = vld [vmem:[#allocation313_spill] sm:$0xff]  ;;  %v17799_v37 = vld [vmem:[#allocation314_spill] sm:$0xff] }
 0x401   : > { %v9358_v51 = vmax.f32 %v17784_v2, %v9230_v19  ;;  %v9231_v40 = vmax.f32 %v8286_v41, %v17785_v5  ;;  %v9711_v49 = vpack.c.bf16 %v9616_v21, %v9615_v54  ;;  %v17796_v60 = vmax.f32 %v17794_v10, %v17795_v29  ;;  %v17798_v19 = vld [vmem:[#allocation76_spill] sm:$0xff]  ;;  %v17801_v38 = vld [vmem:[#allocation226_spill] sm:$0xff]  ;;  %v17802_v41 = vld [vmem:[#allocation77_spill] sm:$0xff] }
 0x402   : > { %v9493_v61 = vadd.f32 %v15989_v56, %v9360_v12  ;;  %v9361_v11 = vmax.f32 %v17788_v17, %v9233_v28  ;;  %v17800_v44 = vmax.f32 %v17798_v19, %v17799_v37  ;;  %v17806_v5 = vld [vmem:[#allocation316_spill] sm:$0xff]  ;;  %v17817_v29 = vld [vmem:[#allocation233_spill] sm:$0xff] }
 0x403   : > { %v9491_v47 = vadd.f32 %v15989_v56, %v9358_v51  ;;  %v9359_v27 = vmax.f32 %v17791_v22, %v9231_v40  ;;  %12834 = vmatprep.mubr.bf16.mxu1 %v9711_v49  ;;  %v17805_v51 = vld [vmem:[#allocation78_spill] sm:$0xff] }
 0x404   : > { %v9494_v7 = vadd.f32 %v15989_v56, %v9361_v11  ;;  %12835 = vmatmul.mubr.bf16.gmra.mrb[220].mxu1 %v9712_v45  ;;  %v9621_v24 = vmax.f32 %v9493_v61, 0.0  ;;  %v17803_v45 = vld [vmem:[#allocation315_spill] sm:$0xff]  ;;  %v17807_v40 = vmax.f32 %v17805_v51, %v17806_v5 }
 0x405   : > { %v9492_v26 = vadd.f32 %v15989_v56, %v9359_v27  ;;  %v12572_v62 = vpop.f32.mrb[72].mxu0  ;;  %v9619_v52 = vmax.f32 %v9491_v47, 0.0  ;;  %v17804_v33 = vmax.f32 %v17802_v41, %v17803_v45  ;;  %v17809_v27 = vld [vmem:[#allocation229_spill] sm:$0xff] }
 0x406   : > { %v9622_v15 = vmax.f32 %v9494_v7, 0.0  ;;  %v9236_v31 = vmax.f32 %v12572_v62, %v17792_v50  ;;  %v8299_v58 = vpop.f32.mrb[73].mxu0  ;;  %v17810_v62 = vld [vmem:[#allocation79_spill] sm:$0xff] }
 0x407   : > { %v9620_v35 = vmax.f32 %v9492_v26, 0.0  ;;  %v9234_v9 = vmax.f32 %v8299_v58, %v17793_v57  ;;  %v12573_v0 = vpop.f32.mrb[74].mxu0  ;;  %v17814_v57 = vld [vmem:[#allocation80_spill] sm:$0xff] }
 0x408   : > { %v9364_v53 = vmax.f32 %v17796_v60, %v9236_v31  ;;  %v9237_v54 = vmax.f32 %v12573_v0, %v17797_v63  ;;  %v8302_v21 = vpop.f32.mrb[75].mxu0  ;;  %v9714_v42 = vpack.c.bf16 %v9622_v15, %v9621_v24  ;;  %v17811_v24 = vld [vmem:[#allocation317_spill] sm:$0xff]  ;;  %v17813_v31 = vld [vmem:[#allocation231_spill] sm:$0xff] }
 0x409   : > { %v9362_v59 = vmax.f32 %v17800_v44, %v9234_v9  ;;  %v9235_v12 = vmax.f32 %v8302_v21, %v17801_v38  ;;  %v9713_v3 = vpack.c.bf16 %v9620_v35, %v9619_v52  ;;  %v17812_v15 = vmax.f32 %v17810_v62, %v17811_v24  ;;  %v17815_v9 = vld [vmem:[#allocation318_spill] sm:$0xff]  ;;  %v17819_v21 = vld [vmem:[#allocation319_spill] sm:$0xff] }
 0x40a   : > { %v9497_v28 = vadd.f32 %v15989_v56, %v9364_v53  ;;  %v9365_v30 = vmax.f32 %v17804_v33, %v9237_v54  ;;  %v17816_v0 = vmax.f32 %v17814_v57, %v17815_v9  ;;  %v17818_v54 = vld [vmem:[#allocation81_spill] sm:$0xff]  ;;  %v17821_v44 = vld [vmem:[#allocation82_spill] sm:$0xff] }
 0x40b   : > { %v9495_v2 = vadd.f32 %v15989_v56, %v9362_v59  ;;  %v9363_v49 = vmax.f32 %v17807_v40, %v9235_v12  ;;  %12838 = vmatprep.mubr.bf16.mxu1 %v9713_v3  ;;  %v17822_v59 = vld [vmem:[#allocation320_spill] sm:$0xff]  ;;  %v17833_v24 = vld [vmem:[#allocation238_spill] sm:$0xff] }
 0x40c   : > { %v9498_v61 = vadd.f32 %v15989_v56, %v9365_v30  ;;  %12839 = vmatmul.mubr.bf16.gmra.mrb[224].mxu1 %v9714_v42  ;;  %v9625_v17 = vmax.f32 %v9497_v28, 0.0  ;;  %v17820_v42 = vmax.f32 %v17818_v54, %v17819_v21  ;;  %v17823_v38 = vmax.f32 %v17821_v44, %v17822_v59  ;;  %v17824_v30 = vld [vmem:[#allocation235_spill] sm:$0xff] }
 0x40d   : > { %v9496_v23 = vadd.f32 %v15989_v56, %v9363_v49  ;;  %v12576_v25 = vpop.f32.mrb[76].mxu0  ;;  %v9623_v16 = vmax.f32 %v9495_v2, 0.0  ;;  %v17825_v49 = vld [vmem:[#allocation236_spill] sm:$0xff] }
 0x40e   : > { %v9626_v11 = vmax.f32 %v9498_v61, 0.0  ;;  %v9240_v47 = vmax.f32 %v12576_v25, %v17808_v14  ;;  %v8315_v46 = vpop.f32.mrb[77].mxu0  ;;  %v17826_v25 = vld [vmem:[#allocation83_spill] sm:$0xff] }
 0x40f   : > { %v9624_v22 = vmax.f32 %v9496_v23, 0.0  ;;  %v9238_v7 = vmax.f32 %v8315_v46, %v17809_v27  ;;  %v12577_v26 = vpop.f32.mrb[78].mxu0  ;;  %v17830_v27 = vld [vmem:[#allocation84_spill] sm:$0xff] }
 0x410   : > { %v9368_v50 = vmax.f32 %v17812_v15, %v9240_v47  ;;  %v9241_v58 = vmax.f32 %v12577_v26, %v17813_v31  ;;  %v8318_v52 = vpop.f32.mrb[79].mxu0  ;;  %v9716_v35 = vpack.c.bf16 %v9626_v11, %v9625_v17  ;;  %v17827_v17 = vld [vmem:[#allocation321_spill] sm:$0xff] }
 0x411   : > { %v9366_v10 = vmax.f32 %v17816_v0, %v9238_v7  ;;  %v9239_v60 = vmax.f32 %v8318_v52, %v17817_v29  ;;  %v9715_v53 = vpack.c.bf16 %v9624_v22, %v9623_v16  ;;  %v17828_v11 = vmax.f32 %v17826_v25, %v17827_v17  ;;  %v17829_v47 = vld [vmem:[#allocation237_spill] sm:$0xff]  ;;  %v17831_v7 = vld [vmem:[#allocation322_spill] sm:$0xff]  ;;  %v17835_v52 = vld [vmem:[#allocation323_spill] sm:$0xff] }
 0x412   : > { %v9501_v63 = vadd.f32 %v15989_v56, %v9368_v50  ;;  %v9369_v19 = vmax.f32 %v17820_v42, %v9241_v58  ;;  %v17832_v26 = vmax.f32 %v17830_v27, %v17831_v7  ;;  %v17834_v58 = vld [vmem:[#allocation85_spill] sm:$0xff]  ;;  %v17837_v0 = vld [vmem:[#allocation86_spill] sm:$0xff] }
 0x413   : > { %v9499_v37 = vadd.f32 %v15989_v56, %v9366_v10  ;;  %v9367_v12 = vmax.f32 %v17823_v38, %v9239_v60  ;;  %12842 = vmatprep.mubr.bf16.mxu1 %v9715_v53  ;;  %v17838_v10 = vld [vmem:[#allocation324_spill] sm:$0xff]  ;;  %v17849_v17 = vld [vmem:[#allocation245_spill] sm:$0xff] }
 0x414   : > { %v9502_v3 = vadd.f32 %v15989_v56, %v9369_v19  ;;  %12843 = vmatmul.mubr.bf16.gmra.mrb[228].mxu1 %v9716_v35  ;;  %v9629_v45 = vmax.f32 %v9501_v63, 0.0  ;;  %v17836_v35 = vmax.f32 %v17834_v58, %v17835_v52  ;;  %v17839_v29 = vmax.f32 %v17837_v0, %v17838_v10  ;;  %v17840_v19 = vld [vmem:[#allocation239_spill] sm:$0xff] }
 0x415   : > { %v9500_v28 = vadd.f32 %v15989_v56, %v9367_v12  ;;  %v12580_v41 = vpop.f32.mrb[80].mxu0  ;;  %v9627_v5 = vmax.f32 %v9499_v37, 0.0  ;;  %v17841_v12 = vld [vmem:[#allocation241_spill] sm:$0xff] }
 0x416   : > { %v9630_v33 = vmax.f32 %v9502_v3, 0.0  ;;  %v9244_v2 = vmax.f32 %v12580_v41, %v17824_v30  ;;  %v8331_v51 = vpop.f32.mrb[81].mxu0  ;;  %v17842_v41 = vld [vmem:[#allocation87_spill] sm:$0xff] }
 0x417   : > { %v9628_v40 = vmax.f32 %v9500_v28, 0.0  ;;  %v9242_v61 = vmax.f32 %v8331_v51, %v17825_v49  ;;  %v12581_v23 = vpop.f32.mrb[82].mxu0  ;;  %v17846_v49 = vld [vmem:[#allocation88_spill] sm:$0xff] }
 0x418   : > { %v9372_v14 = vmax.f32 %v17828_v11, %v9244_v2  ;;  %v9245_v46 = vmax.f32 %v12581_v23, %v17829_v47  ;;  %v8334_v16 = vpop.f32.mrb[83].mxu0  ;;  %v9718_v22 = vpack.c.bf16 %v9630_v33, %v9629_v45  ;;  %v17843_v45 = vld [vmem:[#allocation325_spill] sm:$0xff]  ;;  %v17845_v2 = vld [vmem:[#allocation243_spill] sm:$0xff] }
 0x419   : > { %v9370_v62 = vmax.f32 %v17832_v26, %v9242_v61  ;;  %v9243_v15 = vmax.f32 %v8334_v16, %v17833_v24  ;;  %v9717_v50 = vpack.c.bf16 %v9628_v40, %v9627_v5  ;;  %v17844_v33 = vmax.f32 %v17842_v41, %v17843_v45  ;;  %v17847_v61 = vld [vmem:[#allocation326_spill] sm:$0xff]  ;;  %v17851_v16 = vld [vmem:[#allocation327_spill] sm:$0xff] }
 0x41a   : > { %v9505_v31 = vadd.f32 %v15989_v56, %v9372_v14  ;;  %v9373_v57 = vmax.f32 %v17836_v35, %v9245_v46  ;;  %v17848_v23 = vmax.f32 %v17846_v49, %v17847_v61  ;;  %v17850_v46 = vld [vmem:[#allocation89_spill] sm:$0xff]  ;;  %v17853_v26 = vld [vmem:[#allocation90_spill] sm:$0xff] }
 0x41b   : > { %v9503_v9 = vadd.f32 %v15989_v56, %v9370_v62  ;;  %v9371_v60 = vmax.f32 %v17839_v29, %v9243_v15  ;;  %12846 = vmatprep.mubr.bf16.mxu1 %v9717_v50  ;;  %v17854_v62 = vld [vmem:[#allocation328_spill] sm:$0xff]  ;;  %v13308_v50 = vld [vmem:[%s16764_s1 + $0xa0] sm:$0xff]  }
 0x41c   : > { %v9506_v53 = vadd.f32 %v15989_v56, %v9373_v57  ;;  %12847 = vmatmul.mubr.bf16.gmra.mrb[232].mxu1 %v9718_v22  ;;  %v9633_v21 = vmax.f32 %v9505_v31, 0.0  ;;  %v17852_v22 = vmax.f32 %v17850_v46, %v17851_v16  ;;  %v17855_v24 = vmax.f32 %v17853_v26, %v17854_v62  ;;  %12906 = vmatprep.subr.bf16.mxu1 %v13308_v50 }
 0x41d   : > { %v9504_v63 = vadd.f32 %v15989_v56, %v9371_v60  ;;  %v12584_v54 = vpop.f32.mrb[84].mxu0  ;;  %v9631_v59 = vmax.f32 %v9503_v9, 0.0  ;;  %v17856_v9 = vld [vmem:[#allocation247_spill] sm:$0xff]  ;;  %12907 = vmatpush3.bf16.msra.mxu1 %v13308_v50  ;;  %v17873_v50 = vld [vmem:[#allocation253_spill] sm:$0xff] }
 0x41e   : > { %v9634_v42 = vmax.f32 %v9506_v53, 0.0  ;;  %v9248_v37 = vmax.f32 %v12584_v54, %v17840_v19  ;;  %v8347_v44 = vpop.f32.mrb[85].mxu0  ;;  %v17857_v53 = vld [vmem:[#allocation248_spill] sm:$0xff] }
 0x41f   : > { %v9632_v38 = vmax.f32 %v9504_v63, 0.0  ;;  %v9246_v3 = vmax.f32 %v8347_v44, %v17841_v12  ;;  %v12585_v28 = vpop.f32.mrb[86].mxu0  ;;  %v17861_v44 = vld [vmem:[#allocation249_spill] sm:$0xff] }
 0x420   : > { %v9376_v30 = vmax.f32 %v17844_v33, %v9248_v37  ;;  %v9249_v51 = vmax.f32 %v12585_v28, %v17845_v2  ;;  %v8350_v5 = vpop.f32.mrb[87].mxu0  ;;  %v9720_v40 = vpack.c.bf16 %v9634_v42, %v9633_v21  ;;  %v17858_v21 = vld [vmem:[#allocation91_spill] sm:$0xff]  ;;  %v17859_v42 = vld [vmem:[#allocation329_spill] sm:$0xff]  ;;  %v17863_v28 = vld [vmem:[#allocation330_spill] sm:$0xff] }
 0x421   : > { %v9374_v25 = vmax.f32 %v17848_v23, %v9246_v3  ;;  %v9247_v11 = vmax.f32 %v8350_v5, %v17849_v17  ;;  %v9719_v14 = vpack.c.bf16 %v9632_v38, %v9631_v59  ;;  %v17860_v19 = vmax.f32 %v17858_v21, %v17859_v42  ;;  %v17862_v3 = vld [vmem:[#allocation92_spill] sm:$0xff]  ;;  %v17865_v33 = vld [vmem:[#allocation250_spill] sm:$0xff]  ;;  %v17866_v5 = vld [vmem:[#allocation93_spill] sm:$0xff] }
 0x422   : > { %v9509_v47 = vadd.f32 %v15989_v56, %v9376_v30  ;;  %v9377_v27 = vmax.f32 %v17852_v22, %v9249_v51  ;;  %v17864_v41 = vmax.f32 %v17862_v3, %v17863_v28  ;;  %v17870_v17 = vld [vmem:[#allocation332_spill] sm:$0xff]  ;;  %v17881_v42 = vld [vmem:[#allocation257_spill] sm:$0xff] }
 0x423   : > { %v9507_v7 = vadd.f32 %v15989_v56, %v9374_v25  ;;  %v9375_v15 = vmax.f32 %v17855_v24, %v9247_v11  ;;  %12850 = vmatprep.mubr.bf16.mxu1 %v9719_v14  ;;  %v17869_v25 = vld [vmem:[#allocation94_spill] sm:$0xff] }
 0x424   : > { %v9510_v31 = vadd.f32 %v15989_v56, %v9377_v27  ;;  %12851 = vmatmul.mubr.bf16.gmra.mrb[236].mxu1 %v9720_v40  ;;  %v9637_v35 = vmax.f32 %v9509_v47, 0.0  ;;  %v17867_v40 = vld [vmem:[#allocation331_spill] sm:$0xff]  ;;  %v17871_v11 = vmax.f32 %v17869_v25, %v17870_v17 }
 0x425   : > { %v9508_v58 = vadd.f32 %v15989_v56, %v9375_v15  ;;  %v12588_v52 = vpop.f32.mrb[88].mxu0  ;;  %v9635_v29 = vmax.f32 %v9507_v7, 0.0  ;;  %v17868_v49 = vmax.f32 %v17866_v5, %v17867_v40  ;;  %v17872_v7 = vld [vmem:[#allocation251_spill] sm:$0xff] }
 0x426   : > { %v9638_v57 = vmax.f32 %v9510_v31, 0.0  ;;  %v9252_v0 = vmax.f32 %v12588_v52, %v17856_v9  ;;  %v8363_v10 = vpop.f32.mrb[89].mxu0  ;;  %v17874_v52 = vld [vmem:[#allocation96_spill] sm:$0xff] }
 0x427   : > { %v9636_v60 = vmax.f32 %v9508_v58, 0.0  ;;  %v9250_v63 = vmax.f32 %v8363_v10, %v17857_v53  ;;  %v12589_v54 = vpop.f32.mrb[90].mxu0  ;;  %v17878_v53 = vld [vmem:[#allocation98_spill] sm:$0xff] }
 0x428   : > { %v9380_v37 = vmax.f32 %v17860_v19, %v9252_v0  ;;  %v9253_v59 = vmax.f32 %v12589_v54, %v17861_v44  ;;  %v8366_v38 = vpop.f32.mrb[91].mxu0  ;;  %v9722_v12 = vpack.c.bf16 %v9638_v57, %v9637_v35  ;;  %v17875_v35 = vld [vmem:[#allocation333_spill] sm:$0xff]  ;;  %v17877_v0 = vld [vmem:[#allocation255_spill] sm:$0xff] }
 0x429   : > { %v9378_v45 = vmax.f32 %v17864_v41, %v9250_v63  ;;  %v9251_v30 = vmax.f32 %v8366_v38, %v17865_v33  ;;  %v9721_v2 = vpack.c.bf16 %v9636_v60, %v9635_v29  ;;  %v17876_v57 = vmax.f32 %v17874_v52, %v17875_v35  ;;  %v17879_v63 = vld [vmem:[#allocation334_spill] sm:$0xff]  ;;  %v17883_v38 = vld [vmem:[#allocation335_spill] sm:$0xff] }
 0x42a   : > { %v9513_v51 = vadd.f32 %v15989_v56, %v9380_v37  ;;  %v9381_v61 = vmax.f32 %v17868_v49, %v9253_v59  ;;  %v17880_v54 = vmax.f32 %v17878_v53, %v17879_v63  ;;  %v17882_v59 = vld [vmem:[#allocation100_spill] sm:$0xff]  ;;  %v17885_v41 = vld [vmem:[#allocation102_spill] sm:$0xff] }
 0x42b   : > { %v9511_v23 = vadd.f32 %v15989_v56, %v9378_v45  ;;  %v9379_v14 = vmax.f32 %v17871_v11, %v9251_v30  ;;  %12854 = vmatprep.mubr.bf16.mxu1 %v9721_v2  ;;  %v17886_v45 = vld [vmem:[#allocation336_spill] sm:$0xff]  ;;  %v17897_v35 = vld [vmem:[#allocation262_spill] sm:$0xff] }
 0x42c   : > { %v9514_v47 = vadd.f32 %v15989_v56, %v9381_v61  ;;  %12855 = vmatmul.mubr.bf16.gmra.mrb[240].mxu1 %v9722_v12  ;;  %v9641_v22 = vmax.f32 %v9513_v51, 0.0  ;;  %v17884_v12 = vmax.f32 %v17882_v59, %v17883_v38  ;;  %v17887_v33 = vmax.f32 %v17885_v41, %v17886_v45  ;;  %v17888_v61 = vld [vmem:[#allocation259_spill] sm:$0xff]  ;;  %v13309_v45 = vld [vmem:[%s16764_s1 + $0xa8] sm:$0xff]  }
 0x42d   : > { %v9512_v46 = vadd.f32 %v15989_v56, %v9379_v14  ;;  %v12592_v16 = vpop.f32.mrb[92].mxu0  ;;  %v9639_v24 = vmax.f32 %v9511_v23, 0.0  ;;  %v17889_v14 = vld [vmem:[#allocation260_spill] sm:$0xff]  ;;  %12908 = vmatprep.subr.bf16.mxu1 %v13309_v45 }
 0x42e   : > { %v9642_v27 = vmax.f32 %v9514_v47, 0.0  ;;  %v9256_v26 = vmax.f32 %v12592_v16, %v17872_v7  ;;  %v8379_v62 = vpop.f32.mrb[93].mxu0  ;;  %v17890_v16 = vld [vmem:[#allocation108_spill] sm:$0xff]  ;;  %12909 = vmatpush3.bf16.msra.mxu1 %v13309_v45 }
 0x42f   : > { %v9640_v15 = vmax.f32 %v9512_v46, 0.0  ;;  %v9254_v31 = vmax.f32 %v8379_v62, %v17873_v50  ;;  %v12593_v58 = vpop.f32.mrb[94].mxu0  ;;  %v17894_v50 = vld [vmem:[#allocation110_spill] sm:$0xff] }
 0x430   : > { %v9384_v9 = vmax.f32 %v17876_v57, %v9256_v26  ;;  %v9257_v10 = vmax.f32 %v12593_v58, %v17877_v0  ;;  %v8382_v29 = vpop.f32.mrb[95].mxu0  ;;  %v9724_v60 = vpack.c.bf16 %v9642_v27, %v9641_v22  ;;  %v17891_v22 = vld [vmem:[#allocation337_spill] sm:$0xff] }
 0x431   : > { %v9382_v21 = vmax.f32 %v17880_v54, %v9254_v31  ;;  %v9255_v19 = vmax.f32 %v8382_v29, %v17881_v42  ;;  %v9723_v37 = vpack.c.bf16 %v9640_v15, %v9639_v24  ;;  %v17892_v27 = vmax.f32 %v17890_v16, %v17891_v22  ;;  %v17893_v26 = vld [vmem:[#allocation261_spill] sm:$0xff]  ;;  %v17895_v31 = vld [vmem:[#allocation338_spill] sm:$0xff]  ;;  %v17899_v29 = vld [vmem:[#allocation339_spill] sm:$0xff] }
 0x432   : > { %v9517_v44 = vadd.f32 %v15989_v56, %v9384_v9  ;;  %v9385_v3 = vmax.f32 %v17884_v12, %v9257_v10  ;;  %v17896_v58 = vmax.f32 %v17894_v50, %v17895_v31  ;;  %v17898_v10 = vld [vmem:[#allocation112_spill] sm:$0xff]  ;;  %v17901_v54 = vld [vmem:[#allocation114_spill] sm:$0xff] }
 0x433   : > { %v9515_v28 = vadd.f32 %v15989_v56, %v9382_v21  ;;  %v9383_v30 = vmax.f32 %v17887_v33, %v9255_v19  ;;  %12858 = vmatprep.mubr.bf16.mxu1 %v9723_v37  ;;  %v17902_v21 = vld [vmem:[#allocation340_spill] sm:$0xff] }
 0x434   : > { %v9518_v2 = vadd.f32 %v15989_v56, %v9385_v3  ;;  %12859 = vmatmul.mubr.bf16.gmra.mrb[244].mxu1 %v9724_v60  ;;  %v9645_v40 = vmax.f32 %v9517_v44, 0.0  ;;  %v17900_v60 = vmax.f32 %v17898_v10, %v17899_v29  ;;  %v17903_v42 = vmax.f32 %v17901_v54, %v17902_v21 }
 0x435   : > { %v9516_v51 = vadd.f32 %v15989_v56, %v9383_v30  ;;  %v12596_v5 = vpop.f32.mrb[96].mxu0  ;;  %v9643_v17 = vmax.f32 %v9515_v28, 0.0 }
 0x436   : > { %v9646_v49 = vmax.f32 %v9518_v2, 0.0  ;;  %v9260_v23 = vmax.f32 %v12596_v5, %v17888_v61  ;;  %v8395_v25 = vpop.f32.mrb[97].mxu0 }
 0x437   : > { %v9644_v11 = vmax.f32 %v9516_v51, 0.0  ;;  %v9258_v47 = vmax.f32 %v8395_v25, %v17889_v14  ;;  %v12597_v46 = vpop.f32.mrb[98].mxu0 }
 0x438   : > { %v9388_v7 = vmax.f32 %v17892_v27, %v9260_v23  ;;  %v9261_v62 = vmax.f32 %v12597_v46, %v17893_v26  ;;  %v8398_v24 = vpop.f32.mrb[99].mxu0  ;;  %v9726_v15 = vpack.c.bf16 %v9646_v49, %v9645_v40 }
 0x439   : > { %v9386_v52 = vmax.f32 %v17896_v58, %v9258_v47  ;;  %v9259_v57 = vmax.f32 %v8398_v24, %v17897_v35  ;;  %v9725_v9 = vpack.c.bf16 %v9644_v11, %v9643_v17 }
 0x43a   : > { %v9521_v0 = vadd.f32 %v15989_v56, %v9388_v7  ;;  %v9389_v53 = vmax.f32 %v17900_v60, %v9261_v62 }
 0x43b   : > { %v9519_v63 = vadd.f32 %v15989_v56, %v9386_v52  ;;  %v9387_v19 = vmax.f32 %v17903_v42, %v9259_v57  ;;  %12862 = vmatprep.mubr.bf16.mxu1 %v9725_v9 }
 0x43c   : > { %v9522_v37 = vadd.f32 %v15989_v56, %v9389_v53  ;;  %12863 = vmatmul.mubr.bf16.gmra.mrb[248].mxu1 %v9726_v15  ;;  %v9649_v59 = vmax.f32 %v9521_v0, 0.0 }
 0x43d   : > { %v9520_v44 = vadd.f32 %v15989_v56, %v9387_v19  ;;  %v9647_v12 = vmax.f32 %v9519_v63, 0.0 }
 0x43e   : > { %v9650_v38 = vmax.f32 %v9522_v37, 0.0 }
 0x43f   : > { %v9648_v3 = vmax.f32 %v9520_v44, 0.0 }
 0x440   : > { %v9728_v28 = vpack.c.bf16 %v9650_v38, %v9649_v59 }
 0x441   : > { %v9727_v41 = vpack.c.bf16 %v9648_v3, %v9647_v12  ;;  %v16425_v12 = vld [vmem:[%s16764_s1 + $0xc0] sm:$0xff]  }
 0x443   : > { %12866 = vmatprep.mubr.bf16.mxu1 %v9727_v41 }
 0x444   : > { %12867 = vmatmul.mubr.bf16.gmra.mrb[252].mxu1 %v9728_v28 }
 0x445   : > { %12870 = vmatprep.mubr.bf16.mxu1 %v15539_v13 }
 0x44c   : > { %12871 = vmatmul.mubr.bf16.gmra.mrb[0].mxu1 %v15529_v1 }
 0x44d   : > { %12874 = vmatprep.mubr.bf16.mxu1 %v15567_v39 }
 0x454   : > { %12875 = vmatmul.mubr.bf16.gmra.mrb[4].mxu1 %v15557_v20 }
 0x455   : > { %12878 = vmatprep.mubr.bf16.mxu1 %v15595_v6  ;;  %v13310_v6 = vld [vmem:[%s16764_s1 + $0xb0] sm:$0xff]  }
 0x456   : > { %12910 = vmatprep.subr.bf16.mxu1 %v13310_v6 }
 0x457   : > { %v16215_v56 = vpop.f32.mrb[156].mxu1  ;;  %12911 = vmatpush3.bf16.msra.mxu1 %v13310_v6 }
 0x458   : > { %v16217_v33 = vpop.f32.mrb[157].mxu1 }
 0x459   : > { %v16219_v30 = vpop.f32.mrb[158].mxu1 }
 0x45a   : > { %v16221_v2 = vpop.f32.mrb[159].mxu1 }
 0x45c   : > { %12879 = vmatmul.mubr.bf16.gmra.mrb[8].mxu1 %v15585_v32 }
 0x45d   : > { %12882 = vmatprep.mubr.bf16.mxu1 %v15622_v18 }
 0x45f   : > { %v16225_v13 = vpop.f32.mrb[160].mxu1 }
 0x460   : > { %v16227_v1 = vpop.f32.mrb[161].mxu1 }
 0x461   : > { %v16229_v39 = vpop.f32.mrb[162].mxu1 }
 0x462   : > { %v16231_v20 = vpop.f32.mrb[163].mxu1 }
 0x464   : > { %12883 = vmatmul.mubr.bf16.gmra.mrb[12].mxu1 %v15612_v48 }
 0x465   : > { %12886 = vmatprep.mubr.bf16.mxu1 %v15647_v36 }
 0x467   : > { %v16238_v32 = vpop.f32.mrb[164].mxu1 }
 0x468   : > { %v16240_v18 = vpop.f32.mrb[165].mxu1 }
 0x469   : > { %v16242_v51 = vpop.f32.mrb[166].mxu1 }
 0x46a   : > { %v16244_v5 = vpop.f32.mrb[167].mxu1 }
 0x46c   : > { %12887 = vmatmul.mubr.bf16.gmra.mrb[16].mxu1 %v15637_v43 }
 0x46d   : > { %12890 = vmatprep.mubr.bf16.mxu1 %v15671_v55 }
 0x46f   : > { %v16248_v40 = vpop.f32.mrb[168].mxu1 }
 0x470   : > { %v16250_v49 = vpop.f32.mrb[169].mxu1 }
 0x471   : > { %v16252_v48 = vpop.f32.mrb[170].mxu1 }
 0x472   : > { %v16254_v36 = vpop.f32.mrb[171].mxu1 }
 0x474   : > { %12891 = vmatmul.mubr.bf16.gmra.mrb[20].mxu1 %v15661_v34  ;;  %v13311_v34 = vld [vmem:[%s16764_s1 + $0xb8] sm:$0xff]  }
 0x475   : > { %12894 = vmatprep.mubr.bf16.mxu1 %v15695_v8  ;;  %12912 = vmatprep.subr.bf16.mxu1 %v13311_v34 }
 0x476   : > { %12913 = vmatpush3.bf16.msra.mxu1 %v13311_v34 }
 0x477   : > { %v16258_v61 = vpop.f32.mrb[172].mxu1  ;;  %12946 = vmatprep.subr.bf16.mxu1 %v16425_v12 }
 0x478   : > { %17904 = vst [vmem:[#allocation120_spill] sm:$0xff] %v16258_v61  ;;  %v16260_v23 = vpop.f32.mrb[173].mxu1 }
 0x479   : > { %17905 = vst [vmem:[#allocation122_spill] sm:$0xff] %v16260_v23  ;;  %v16262_v25 = vpop.f32.mrb[174].mxu1 }
 0x47a   : > { %17906 = vst [vmem:[#allocation124_spill] sm:$0xff] %v16262_v25  ;;  %v16264_v43 = vpop.f32.mrb[175].mxu1 }
 0x47b   : > { %17907 = vst [vmem:[#allocation126_spill] sm:$0xff] %v16264_v43 }
 0x47c   : > { %12895 = vmatmul.mubr.bf16.gmra.mrb[24].mxu1 %v15685_v4 }
 0x47f   : > { %v16267_v55 = vpop.f32.mrb[176].mxu1 }
 0x480   : > { %17908 = vst [vmem:[#allocation132_spill] sm:$0xff] %v16267_v55  ;;  %v16269_v17 = vpop.f32.mrb[177].mxu1 }
 0x481   : > { %17909 = vst [vmem:[#allocation134_spill] sm:$0xff] %v16269_v17  ;;  %v16271_v11 = vpop.f32.mrb[178].mxu1 }
 0x482   : > { %17910 = vst [vmem:[#allocation136_spill] sm:$0xff] %v16271_v11  ;;  %v16273_v14 = vpop.f32.mrb[179].mxu1 }
 0x483   : > { %17911 = vst [vmem:[#allocation138_spill] sm:$0xff] %v16273_v14 }
 0x487   : > { %v16278_v8 = vpop.f32.mrb[180].mxu1 }
 0x488   : > { %17912 = vst [vmem:[#allocation144_spill] sm:$0xff] %v16278_v8  ;;  %v16280_v47 = vpop.f32.mrb[181].mxu1 }
 0x489   : > { %17913 = vst [vmem:[#allocation146_spill] sm:$0xff] %v16280_v47  ;;  %v16282_v46 = vpop.f32.mrb[182].mxu1 }
 0x48a   : > { %17914 = vst [vmem:[#allocation148_spill] sm:$0xff] %v16282_v46  ;;  %v16284_v4 = vpop.f32.mrb[183].mxu1 }
 0x48b   : > { %17915 = vst [vmem:[#allocation150_spill] sm:$0xff] %v16284_v4 }
 0x48f   : > { %v16286_v16 = vpop.f32.mrb[184].mxu1 }
 0x490   : > { %17916 = vst [vmem:[#allocation156_spill] sm:$0xff] %v16286_v16  ;;  %v16288_v22 = vpop.f32.mrb[185].mxu1 }
 0x491   : > { %17917 = vst [vmem:[#allocation158_spill] sm:$0xff] %v16288_v22  ;;  %v16290_v27 = vpop.f32.mrb[186].mxu1 }
 0x492   : > { %17918 = vst [vmem:[#allocation160_spill] sm:$0xff] %v16290_v27  ;;  %v16292_v7 = vpop.f32.mrb[187].mxu1 }
 0x493   : > { %17919 = vst [vmem:[#allocation162_spill] sm:$0xff] %v16292_v7 }
 0x497   : > { %v16294_v26 = vpop.f32.mrb[188].mxu1 }
 0x498   : > { %v16298_v24 = vpop.f32.mrb[189].mxu1 }
 0x499   : > { %v16302_v50 = vpop.f32.mrb[190].mxu1 }
 0x49a   : > { %v16306_v58 = vpop.f32.mrb[191].mxu1 }
 0x49f   : > { %v16310_v35 = vpop.f32.mrb[192].mxu1 }
 0x4a0   : > { %v16314_v9 = vpop.f32.mrb[193].mxu1 }
 0x4a1   : > { %v16318_v10 = vpop.f32.mrb[194].mxu1 }
 0x4a2   : > { %v16322_v60 = vpop.f32.mrb[195].mxu1 }
 0x4a7   : > { %v16326_v63 = vpop.f32.mrb[196].mxu1 }
 0x4a8   : > { %v16330_v21 = vpop.f32.mrb[197].mxu1 }
 0x4a9   : > { %v16334_v19 = vpop.f32.mrb[198].mxu1 }
 0x4aa   : > { %v16338_v44 = vpop.f32.mrb[199].mxu1 }
 0x4af   : > { %v16342_v38 = vpop.f32.mrb[200].mxu1 }
 0x4b0   : > { %v16346_v3 = vpop.f32.mrb[201].mxu1 }
 0x4b1   : > { %v16350_v41 = vpop.f32.mrb[202].mxu1 }
 0x4b2   : > { %v16354_v6 = vpop.f32.mrb[203].mxu1 }
 0x4b7   : > { %v16358_v59 = vpop.f32.mrb[204].mxu1 }
 0x4b8   : > { %17920 = vst [vmem:[#allocation168_spill] sm:$0xff] %v16358_v59  ;;  %v16362_v37 = vpop.f32.mrb[205].mxu1 }
 0x4b9   : > { %17921 = vst [vmem:[#allocation170_spill] sm:$0xff] %v16362_v37  ;;  %v16366_v42 = vpop.f32.mrb[206].mxu1 }
 0x4ba   : > { %17922 = vst [vmem:[#allocation172_spill] sm:$0xff] %v16366_v42  ;;  %v16370_v54 = vpop.f32.mrb[207].mxu1 }
 0x4bb   : > { %17923 = vst [vmem:[#allocation174_spill] sm:$0xff] %v16370_v54 }
 0x4bf   : > { %v16374_v53 = vpop.f32.mrb[208].mxu1 }
 0x4c0   : > { %17924 = vst [vmem:[#allocation180_spill] sm:$0xff] %v16374_v53  ;;  %v16378_v29 = vpop.f32.mrb[209].mxu1 }
 0x4c1   : > { %17925 = vst [vmem:[#allocation182_spill] sm:$0xff] %v16378_v29  ;;  %v16382_v0 = vpop.f32.mrb[210].mxu1 }
 0x4c2   : > { %17926 = vst [vmem:[#allocation184_spill] sm:$0xff] %v16382_v0  ;;  %v16386_v57 = vpop.f32.mrb[211].mxu1 }
 0x4c3   : > { %17927 = vst [vmem:[#allocation186_spill] sm:$0xff] %v16386_v57 }
 0x4c7   : > { %v16390_v52 = vpop.f32.mrb[212].mxu1 }
 0x4c8   : > { %17928 = vst [vmem:[#allocation106_spill] sm:$0xff] %v16390_v52  ;;  %v16394_v31 = vpop.f32.mrb[213].mxu1 }
 0x4c9   : > { %17929 = vst [vmem:[#allocation103_spill] sm:$0xff] %v16394_v31  ;;  %v16398_v15 = vpop.f32.mrb[214].mxu1 }
 0x4ca   : > { %17930 = vst [vmem:[#allocation192_spill] sm:$0xff] %v16398_v15  ;;  %v16402_v62 = vpop.f32.mrb[215].mxu1 }
 0x4cb   : > { %17931 = vst [vmem:[#allocation194_spill] sm:$0xff] %v16402_v62 }
 0x4cf   : > { %v16406_v57 = vpop.f32.mrb[216].mxu1 }
 0x4d0   : > { %17932 = vst [vmem:[#allocation107_spill] sm:$0xff] %v16406_v57  ;;  %v16410_v52 = vpop.f32.mrb[217].mxu1 }
 0x4d1   : > { %17933 = vst [vmem:[#allocation285_spill] sm:$0xff] %v16410_v52  ;;  %v16414_v31 = vpop.f32.mrb[218].mxu1 }
 0x4d2   : > { %17934 = vst [vmem:[#allocation196_spill] sm:$0xff] %v16414_v31  ;;  %v16418_v15 = vpop.f32.mrb[219].mxu1 }
 0x4d3   : > { %17935 = vst [vmem:[#allocation109_spill] sm:$0xff] %v16418_v15 }
 0x4d7   : > { %v12836_v62 = vpop.f32.mrb[220].mxu1 }
 0x4d8   : > { %v10097_v4 = vpop.f32.mrb[221].mxu1 }
 0x4d9   : > { %v12837_v46 = vpop.f32.mrb[222].mxu1 }
 0x4da   : > { %v10100_v47 = vpop.f32.mrb[223].mxu1 }
 0x4df   : > { %v12840_v28 = vpop.f32.mrb[224].mxu1 }
 0x4e0   : > { %v10113_v52 = vpop.f32.mrb[225].mxu1 }
 0x4e1   : > { %v12841_v22 = vpop.f32.mrb[226].mxu1 }
 0x4e2   : > { %v10116_v45 = vpop.f32.mrb[227].mxu1 }
 0x4e7   : > { %v16428_v31 = vpop.f32.mrb[228].mxu1 }
 0x4e8   : > { %v16430_v27 = vpop.f32.mrb[229].mxu1 }
 0x4e9   : > { %v16432_v34 = vpop.f32.mrb[230].mxu1 }
 0x4ea   : > { %v16434_v15 = vpop.f32.mrb[231].mxu1 }
 0x4ef   : > { %v16436_v7 = vpop.f32.mrb[232].mxu1 }
 0x4f0   : > { %v16438_v57 = vpop.f32.mrb[233].mxu1 }
 0x4f1   : > { %v16440_v16 = vpop.f32.mrb[234].mxu1 }
 0x4f2   : > { %v16442_v8 = vpop.f32.mrb[235].mxu1 }
 0x4f7   : > { %v16444_v14 = vpop.f32.mrb[236].mxu1 }
 0x4f8   : > { %v16446_v0 = vpop.f32.mrb[237].mxu1 }
 0x4f9   : > { %17936 = vst [vmem:[#allocation286_spill] sm:$0xff] %v16446_v0  ;;  %v16448_v11 = vpop.f32.mrb[238].mxu1 }
 0x4fa   : > { %17937 = vst [vmem:[#allocation198_spill] sm:$0xff] %v16448_v11  ;;  %v16450_v29 = vpop.f32.mrb[239].mxu1 }
 0x4fb   : > { %17938 = vst [vmem:[#allocation111_spill] sm:$0xff] %v16450_v29 }
 0x4ff   : > { %v16452_v17 = vpop.f32.mrb[240].mxu1 }
 0x500   : > { %17939 = vst [vmem:[#allocation287_spill] sm:$0xff] %v16452_v17  ;;  %v16454_v53 = vpop.f32.mrb[241].mxu1 }
 0x501   : > { %17940 = vst [vmem:[#allocation113_spill] sm:$0xff] %v16454_v53  ;;  %v16456_v55 = vpop.f32.mrb[242].mxu1 }
 0x502   : > { %17941 = vst [vmem:[#allocation288_spill] sm:$0xff] %v16456_v55  ;;  %v16458_v54 = vpop.f32.mrb[243].mxu1 }
 0x503   : > { %17942 = vst [vmem:[#allocation115_spill] sm:$0xff] %v16458_v54 }
 0x507   : > { %v16460_v43 = vpop.f32.mrb[244].mxu1 }
 0x508   : > { %17943 = vst [vmem:[#allocation116_spill] sm:$0xff] %v16460_v43  ;;  %v16462_v42 = vpop.f32.mrb[245].mxu1  ;;  %v16479_v43 = vld [vmem:[%s16765_s2 + $0x1] ss:$0 sm:$0xff] }
 0x509   : > { %17944 = vst [vmem:[#allocation3_spill] sm:$0xff] %v16462_v42  ;;  %v16464_v25 = vpop.f32.mrb[246].mxu1 }
 0x50a   : > { %17945 = vst [vmem:[#allocation204_spill] sm:$0xff] %v16464_v25  ;;  %v16466_v37 = vpop.f32.mrb[247].mxu1 }
 0x50b   : > { %17946 = vst [vmem:[#allocation117_spill] sm:$0xff] %v16466_v37  ;;  %v17951_v37 = vmax.f32 %v16215_v56, %v16294_v26 }
 0x50f   : > { %v16468_v23 = vpop.f32.mrb[248].mxu1 }
 0x510   : > { %17947 = vst [vmem:[#allocation4_spill] sm:$0xff] %v16468_v23  ;;  %v16470_v11 = vpop.f32.mrb[249].mxu1 }
 0x511   : > { %17948 = vst [vmem:[#allocation206_spill] sm:$0xff] %v16470_v11  ;;  %v16472_v29 = vpop.f32.mrb[250].mxu1 }
 0x512   : > { %17949 = vst [vmem:[#allocation118_spill] sm:$0xff] %v16472_v29  ;;  %v16474_v17 = vpop.f32.mrb[251].mxu1  ;;  %v17952_v29 = vmax.f32 %v16217_v33, %v16298_v24 }
 0x513   : > { %17950 = vst [vmem:[#allocation5_spill] sm:$0xff] %v16474_v17 }
 0x517   : > { %v12868_v53 = vpop.f32.mrb[252].mxu1 }
 0x518   : > { %v10386_v55 = vmax.f32 %v12836_v62, %v12868_v53  ;;  %v10225_v59 = vpop.f32.mrb[253].mxu1  ;;  %v17953_v53 = vmax.f32 %v16219_v30, %v16302_v50 }
 0x519   : > { %v10384_v42 = vmax.f32 %v10097_v4, %v10225_v59  ;;  %v12869_v25 = vpop.f32.mrb[254].mxu1  ;;  %v17954_v59 = vmax.f32 %v16221_v2, %v16306_v58  ;;  %v17956_v58 = vmax.f32 %v16227_v1, %v16314_v9 }
 0x51a   : > { %v10418_v23 = vmax.f32 %v17951_v37, %v10386_v55  ;;  %v10387_v54 = vmax.f32 %v12837_v46, %v12869_v25  ;;  %v10228_v11 = vpop.f32.mrb[255].mxu1 }
 0x51b   : > { %v10416_v17 = vmax.f32 %v17952_v29, %v10384_v42  ;;  %v10385_v61 = vmax.f32 %v10100_v47, %v10228_v11 }
 0x51c   : > { %v10455_v62 = vadd.f32 %v16479_v43, %v10418_v23  ;;  %v10419_v0 = vmax.f32 %v17953_v53, %v10387_v54 }
 0x51d   : > { %v10453_v4 = vadd.f32 %v16479_v43, %v10416_v17  ;;  %v10417_v56 = vmax.f32 %v17954_v59, %v10385_v61  ;;  %v17955_v17 = vmax.f32 %v16225_v13, %v16310_v35  ;;  %v17958_v13 = vmax.f32 %v16231_v20, %v16322_v60 }
 0x51e   : > { %v10456_v25 = vadd.f32 %v16479_v43, %v10419_v0  ;;  %v10487_v33 = vmax.f32 %v10455_v62, 0.0  ;;  %v17957_v62 = vmax.f32 %v16229_v39, %v16318_v10 }
 0x51f   : > { %v10454_v55 = vadd.f32 %v16479_v43, %v10417_v56  ;;  %v12872_v46 = vpop.f32.mrb[0].mxu1  ;;  %v10485_v23 = vmax.f32 %v10453_v4, 0.0 }
 0x520   : > { %v10488_v26 = vmax.f32 %v10456_v25, 0.0  ;;  %v10390_v11 = vmax.f32 %v12840_v28, %v12872_v46  ;;  %v10241_v47 = vpop.f32.mrb[1].mxu1 }
 0x521   : > { %v10486_v24 = vmax.f32 %v10454_v55, 0.0  ;;  %v10388_v29 = vmax.f32 %v10113_v52, %v10241_v47  ;;  %v12873_v30 = vpop.f32.mrb[2].mxu1  ;;  %v17959_v55 = vmax.f32 %v16238_v32, %v16326_v63  ;;  %v17962_v32 = vmax.f32 %v16244_v5, %v16338_v44 }
 0x522   : > { %v10518_v50 = vpack.c.bf16 %v10488_v26, %v10487_v33  ;;  %v10422_v54 = vmax.f32 %v17955_v17, %v10390_v11  ;;  %v10391_v2 = vmax.f32 %v12841_v22, %v12873_v30  ;;  %v10244_v61 = vpop.f32.mrb[3].mxu1  ;;  %v17963_v5 = vmax.f32 %v16248_v40, %v16342_v38 }
 0x523   : > { %v10420_v0 = vmax.f32 %v17956_v58, %v10388_v29  ;;  %v10389_v42 = vmax.f32 %v10116_v45, %v10244_v61  ;;  %v10517_v37 = vpack.c.bf16 %v10486_v24, %v10485_v23  ;;  %v17966_v40 = vmax.f32 %v16254_v36, %v16354_v6  ;;  %v17968_v36 = vld [vmem:[#allocation120_spill] sm:$0xff] }
 0x524   : > { %v10459_v28 = vadd.f32 %v16479_v43, %v10422_v54  ;;  %v10423_v52 = vmax.f32 %v17957_v62, %v10391_v2  ;;  %v17969_v6 = vld [vmem:[#allocation168_spill] sm:$0xff] }
 0x525   : > { %v10457_v53 = vadd.f32 %v16479_v43, %v10420_v0  ;;  %v10421_v35 = vmax.f32 %v17958_v13, %v10389_v42  ;;  %12914 = vmatprep.mubr.bf16.mxu1 %v10517_v37  ;;  %v17964_v42 = vmax.f32 %v16250_v49, %v16346_v3 }
 0x526   : > { %v10460_v22 = vadd.f32 %v16479_v43, %v10423_v52  ;;  %12915 = vmatmul.mubr.bf16.vlgmr.msra.gmra.mrb[28].mxu1 %v10518_v50  ;;  %v10491_v45 = vmax.f32 %v10459_v28, 0.0 }
 0x527   : > { %v10458_v1 = vadd.f32 %v16479_v43, %v10421_v35  ;;  %v12876_v9 = vpop.f32.mrb[4].mxu1  ;;  %12947 = vmatpush3.bf16.msra.mxu1 %v16425_v12  ;;  %v10489_v59 = vmax.f32 %v10457_v53, 0.0  ;;  %v17960_v12 = vmax.f32 %v16240_v18, %v16330_v21 }
 0x528   : > { %v10492_v4 = vmax.f32 %v10460_v22, 0.0  ;;  %v10394_v39 = vmax.f32 %v16428_v31, %v12876_v9  ;;  %v10257_v10 = vpop.f32.mrb[5].mxu1 }
 0x529   : > { %v10490_v56 = vmax.f32 %v10458_v1, 0.0  ;;  %v10392_v25 = vmax.f32 %v16430_v27, %v10257_v10  ;;  %v12877_v20 = vpop.f32.mrb[6].mxu1  ;;  %v17961_v27 = vmax.f32 %v16242_v51, %v16334_v19  ;;  %v17967_v1 = vld [vmem:[#allocation286_spill] sm:$0xff] }
 0x52a   : > { %v10520_v60 = vpack.c.bf16 %v10492_v4, %v10491_v45  ;;  %v10426_v46 = vmax.f32 %v17959_v55, %v10394_v39  ;;  %v10395_v33 = vmax.f32 %v16432_v34, %v12877_v20  ;;  %v10260_v26 = vpop.f32.mrb[7].mxu1  ;;  %v17970_v39 = vmax.f32 %v17968_v36, %v17969_v6  ;;  %v17972_v20 = vld [vmem:[#allocation122_spill] sm:$0xff] }
 0x52b   : > { %v10424_v11 = vmax.f32 %v17960_v12, %v10392_v25  ;;  %v10393_v31 = vmax.f32 %v16434_v15, %v10260_v26  ;;  %v10519_v47 = vpack.c.bf16 %v10490_v56, %v10489_v59  ;;  %v17971_v59 = vld [vmem:[#allocation198_spill] sm:$0xff] }
 0x52c   : > { %v10463_v23 = vadd.f32 %v16479_v43, %v10426_v46  ;;  %v10427_v24 = vmax.f32 %v17961_v27, %v10395_v33  ;;  %v17975_v33 = vld [vmem:[#allocation111_spill] sm:$0xff] }
 0x52d   : > { %v10461_v29 = vadd.f32 %v16479_v43, %v10424_v11  ;;  %v10425_v63 = vmax.f32 %v17962_v32, %v10393_v31  ;;  %12918 = vmatprep.mubr.bf16.mxu1 %v10519_v47  ;;  %v17976_v11 = vld [vmem:[#allocation124_spill] sm:$0xff] }
 0x52e   : > { %v10464_v34 = vadd.f32 %v16479_v43, %v10427_v24  ;;  %12919 = vmatmul.mubr.bf16.gmra.mrb[32].mxu1 %v10520_v60  ;;  %v10495_v21 = vmax.f32 %v10463_v23, 0.0  ;;  %v17973_v60 = vld [vmem:[#allocation170_spill] sm:$0xff]  ;;  %v17977_v31 = vld [vmem:[#allocation172_spill] sm:$0xff] }
 0x52f   : > { %v10462_v18 = vadd.f32 %v16479_v43, %v10425_v63  ;;  %v12880_v15 = vpop.f32.mrb[8].mxu1  ;;  %v10493_v51 = vmax.f32 %v10461_v29, 0.0  ;;  %v17974_v55 = vmax.f32 %v17972_v20, %v17973_v60  ;;  %v17978_v47 = vmax.f32 %v17976_v11, %v17977_v31  ;;  %v17979_v24 = vld [vmem:[#allocation126_spill] sm:$0xff] }
 0x530   : > { %v10496_v30 = vmax.f32 %v10464_v34, 0.0  ;;  %v10398_v50 = vmax.f32 %v16436_v7, %v12880_v15  ;;  %v10273_v17 = vpop.f32.mrb[9].mxu1  ;;  %v17980_v29 = vld [vmem:[#allocation174_spill] sm:$0xff] }
 0x531   : > { %v10494_v19 = vmax.f32 %v10462_v18, 0.0  ;;  %v10396_v54 = vmax.f32 %v16438_v57, %v10273_v17  ;;  %v12881_v2 = vpop.f32.mrb[10].mxu1  ;;  %v17965_v57 = vmax.f32 %v16252_v48, %v16350_v41  ;;  %v17981_v32 = vmax.f32 %v17979_v24, %v17980_v29  ;;  %v18004_v24 = vld [vmem:[#allocation146_spill] sm:$0xff]  ;;  %v18005_v29 = vld [vmem:[#allocation103_spill] sm:$0xff] }
 0x532   : > { %v10522_v61 = vpack.c.bf16 %v10496_v30, %v10495_v21  ;;  %v10430_v44 = vmax.f32 %v17963_v5, %v10398_v50  ;;  %v10399_v58 = vmax.f32 %v16440_v16, %v12881_v2  ;;  %v10276_v0 = vpop.f32.mrb[11].mxu1  ;;  %v17982_v50 = vld [vmem:[#allocation287_spill] sm:$0xff]  ;;  %v17983_v2 = vld [vmem:[#allocation113_spill] sm:$0xff] }
 0x533   : > { %v10428_v37 = vmax.f32 %v17964_v42, %v10396_v54  ;;  %v10397_v7 = vmax.f32 %v16442_v8, %v10276_v0  ;;  %v10521_v28 = vpack.c.bf16 %v10494_v19, %v10493_v51  ;;  %v17985_v0 = vld [vmem:[#allocation180_spill] sm:$0xff] }
 0x534   : > { %v10467_v62 = vadd.f32 %v16479_v43, %v10430_v44  ;;  %v10431_v52 = vmax.f32 %v17965_v57, %v10399_v58  ;;  %v17984_v58 = vld [vmem:[#allocation132_spill] sm:$0xff]  ;;  %v17988_v57 = vld [vmem:[#allocation134_spill] sm:$0xff] }
 0x535   : > { %v10465_v53 = vadd.f32 %v16479_v43, %v10428_v37  ;;  %v10429_v16 = vmax.f32 %v17966_v40, %v10397_v7  ;;  %12922 = vmatprep.mubr.bf16.mxu1 %v10521_v28  ;;  %v17986_v42 = vmax.f32 %v17984_v58, %v17985_v0  ;;  %v17987_v7 = vld [vmem:[#allocation288_spill] sm:$0xff] }
 0x536   : > { %v10468_v38 = vadd.f32 %v16479_v43, %v10431_v52  ;;  %12923 = vmatmul.mubr.bf16.gmra.mrb[36].mxu1 %v10522_v61  ;;  %v10499_v3 = vmax.f32 %v10467_v62, 0.0  ;;  %v17989_v52 = vld [vmem:[#allocation182_spill] sm:$0xff] }
 0x537   : > { %v10466_v49 = vadd.f32 %v16479_v43, %v10429_v16  ;;  %v12884_v8 = vpop.f32.mrb[12].mxu1  ;;  %v10497_v48 = vmax.f32 %v10465_v53, 0.0  ;;  %v17990_v53 = vmax.f32 %v17988_v57, %v17989_v52  ;;  %v17991_v16 = vld [vmem:[#allocation115_spill] sm:$0xff] }
 0x538   : > { %v10500_v13 = vmax.f32 %v10468_v38, 0.0  ;;  %v10402_v35 = vmax.f32 %v16444_v14, %v12884_v8  ;;  %v10289_v22 = vpop.f32.mrb[13].mxu1 }
 0x539   : > { %v10498_v41 = vmax.f32 %v10466_v49, 0.0  ;;  %v10400_v9 = vmax.f32 %v17967_v1, %v10289_v22  ;;  %v12885_v45 = vpop.f32.mrb[14].mxu1  ;;  %v17996_v1 = vld [vmem:[#allocation186_spill] sm:$0xff] }
 0x53a   : > { %v10524_v4 = vpack.c.bf16 %v10500_v13, %v10499_v3  ;;  %v10434_v10 = vmax.f32 %v17970_v39, %v10402_v35  ;;  %v10403_v56 = vmax.f32 %v17971_v59, %v12885_v45  ;;  %v10292_v25 = vpop.f32.mrb[15].mxu1  ;;  %v17992_v3 = vld [vmem:[#allocation136_spill] sm:$0xff] }
 0x53b   : > { %v10432_v46 = vmax.f32 %v17974_v55, %v10400_v9  ;;  %v10401_v14 = vmax.f32 %v17975_v33, %v10292_v25  ;;  %v10523_v26 = vpack.c.bf16 %v10498_v41, %v10497_v48  ;;  %v17993_v13 = vld [vmem:[#allocation184_spill] sm:$0xff]  ;;  %v17995_v41 = vld [vmem:[#allocation138_spill] sm:$0xff]  ;;  %v17999_v55 = vld [vmem:[#allocation3_spill] sm:$0xff] }
 0x53c   : > { %v10471_v12 = vadd.f32 %v16479_v43, %v10434_v10  ;;  %v10435_v23 = vmax.f32 %v17978_v47, %v10403_v56  ;;  %v17994_v35 = vmax.f32 %v17992_v3, %v17993_v13  ;;  %v17997_v9 = vmax.f32 %v17995_v41, %v17996_v1  ;;  %v17998_v59 = vld [vmem:[#allocation116_spill] sm:$0xff]  ;;  %v18020_v41 = vld [vmem:[#allocation158_spill] sm:$0xff]  ;;  %v18021_v1 = vld [vmem:[#allocation285_spill] sm:$0xff] }
 0x53d   : > { %v10469_v27 = vadd.f32 %v16479_v43, %v10432_v46  ;;  %v10433_v63 = vmax.f32 %v17981_v32, %v10401_v14  ;;  %12926 = vmatprep.mubr.bf16.mxu1 %v10523_v26  ;;  %v18000_v26 = vld [vmem:[#allocation144_spill] sm:$0xff]  ;;  %v18006_v32 = vmax.f32 %v18004_v24, %v18005_v29  ;;  %v13314_v29 = vld [vmem:[%s16764_s1 + $0xd0] sm:$0xff]  }
 0x53e   : > { %v10472_v34 = vadd.f32 %v16479_v43, %v10435_v23  ;;  %12927 = vmatmul.mubr.bf16.gmra.mrb[40].mxu1 %v10524_v4  ;;  %v10503_v21 = vmax.f32 %v10471_v12, 0.0  ;;  %v18001_v12 = vld [vmem:[#allocation106_spill] sm:$0xff]  ;;  %v18003_v47 = vld [vmem:[#allocation204_spill] sm:$0xff] }
 0x53f   : > { %v10470_v18 = vadd.f32 %v16479_v43, %v10433_v63  ;;  %v12888_v15 = vpop.f32.mrb[16].mxu1  ;;  %v10501_v19 = vmax.f32 %v10469_v27, 0.0  ;;  %v18002_v11 = vmax.f32 %v18000_v26, %v18001_v12  ;;  %v13313_v24 = vld [vmem:[%s16764_s1 + $0xc8] sm:$0xff]  }
 0x540   : > { %v10504_v30 = vmax.f32 %v10472_v34, 0.0  ;;  %v10406_v17 = vmax.f32 %v17982_v50, %v12888_v15  ;;  %v10305_v51 = vpop.f32.mrb[17].mxu1  ;;  %v18007_v34 = vld [vmem:[#allocation117_spill] sm:$0xff]  ;;  %v18009_v50 = vld [vmem:[#allocation192_spill] sm:$0xff]  ;;  %12948 = vmatprep.subr.bf16.mxu1 %v13313_v24 }
 0x541   : > { %v10502_v54 = vmax.f32 %v10470_v18, 0.0  ;;  %v10404_v61 = vmax.f32 %v17983_v2, %v10305_v51  ;;  %v12889_v5 = vpop.f32.mrb[18].mxu1  ;;  %v18012_v2 = vld [vmem:[#allocation194_spill] sm:$0xff]  ;;  %12949 = vmatpush3.bf16.msra.mxu1 %v13313_v24 }
 0x542   : > { %v10526_v44 = vpack.c.bf16 %v10504_v30, %v10503_v21  ;;  %v10438_v37 = vmax.f32 %v17986_v42, %v10406_v17  ;;  %v10407_v28 = vmax.f32 %v17987_v7, %v12889_v5  ;;  %v10308_v62 = vpop.f32.mrb[19].mxu1  ;;  %v18008_v30 = vld [vmem:[#allocation148_spill] sm:$0xff]  ;;  %12950 = vmatprep.subr.bf16.mxu1 %v13314_v29 }
 0x543   : > { %v10436_v40 = vmax.f32 %v17990_v53, %v10404_v61  ;;  %v10405_v38 = vmax.f32 %v17991_v16, %v10308_v62  ;;  %v10525_v49 = vpack.c.bf16 %v10502_v54, %v10501_v19  ;;  %v18010_v17 = vmax.f32 %v18008_v30, %v18009_v50  ;;  %v18011_v54 = vld [vmem:[#allocation150_spill] sm:$0xff]  ;;  %v18014_v7 = vld [vmem:[#allocation4_spill] sm:$0xff] }
 0x544   : > { %v10475_v8 = vadd.f32 %v16479_v43, %v10438_v37  ;;  %v10439_v22 = vmax.f32 %v17994_v35, %v10407_v28  ;;  %v18013_v61 = vmax.f32 %v18011_v54, %v18012_v2  ;;  %v18015_v53 = vld [vmem:[#allocation206_spill] sm:$0xff] }
 0x545   : > { %v10473_v48 = vadd.f32 %v16479_v43, %v10436_v40  ;;  %v10437_v45 = vmax.f32 %v17997_v9, %v10405_v38  ;;  %12930 = vmatprep.mubr.bf16.mxu1 %v10525_v49  ;;  %v18016_v49 = vld [vmem:[#allocation156_spill] sm:$0xff]  ;;  %v18019_v35 = vld [vmem:[#allocation118_spill] sm:$0xff]  ;;  %v18022_v9 = vmax.f32 %v18020_v41, %v18021_v1  ;;  %12951 = vmatpush3.bf16.msra.mxu1 %v13314_v29 }
 0x546   : > { %v10476_v4 = vadd.f32 %v16479_v43, %v10439_v22  ;;  %12931 = vmatmul.mubr.bf16.gmra.mrb[44].mxu1 %v10526_v44  ;;  %v10507_v39 = vmax.f32 %v10475_v8, 0.0  ;;  %v18017_v8 = vld [vmem:[#allocation107_spill] sm:$0xff] }
 0x547   : > { %v10474_v36 = vadd.f32 %v16479_v43, %v10437_v45  ;;  %v12892_v6 = vpop.f32.mrb[20].mxu1  ;;  %v10505_v20 = vmax.f32 %v10473_v48, 0.0  ;;  %v18018_v3 = vmax.f32 %v18016_v49, %v18017_v8 }
 0x548   : > { %v10508_v10 = vmax.f32 %v10476_v4, 0.0  ;;  %v10410_v56 = vmax.f32 %v17998_v59, %v12892_v6  ;;  %v10321_v25 = vpop.f32.mrb[21].mxu1  ;;  %v18023_v4 = vld [vmem:[#allocation5_spill] sm:$0xff]  ;;  %v18025_v59 = vld [vmem:[#allocation196_spill] sm:$0xff] }
 0x549   : > { %v10506_v60 = vmax.f32 %v10474_v36, 0.0  ;;  %v10408_v46 = vmax.f32 %v17999_v55, %v10321_v25  ;;  %v12893_v33 = vpop.f32.mrb[22].mxu1  ;;  %v18028_v55 = vld [vmem:[#allocation109_spill] sm:$0xff] }
 0x54a   : > { %v10528_v14 = vpack.c.bf16 %v10508_v10, %v10507_v39  ;;  %v10442_v31 = vmax.f32 %v18002_v11, %v10410_v56  ;;  %v10411_v23 = vmax.f32 %v18003_v47, %v12893_v33  ;;  %v10324_v27 = vpop.f32.mrb[23].mxu1  ;;  %v18024_v10 = vld [vmem:[#allocation160_spill] sm:$0xff] }
 0x54b   : > { %v10440_v63 = vmax.f32 %v18006_v32, %v10408_v46  ;;  %v10409_v18 = vmax.f32 %v18007_v34, %v10324_v27  ;;  %v10527_v15 = vpack.c.bf16 %v10506_v60, %v10505_v20  ;;  %v18026_v56 = vmax.f32 %v18024_v10, %v18025_v59  ;;  %v18027_v60 = vld [vmem:[#allocation162_spill] sm:$0xff]  ;;  %v13316_v32 = vld [vmem:[%s16764_s1 + $0xe0] sm:$0xff]   ;;  %v13318_v34 = vld [vmem:[%s16764_s1 + $0xf0] sm:$0xff]  }
 0x54c   : > { %v10479_v21 = vadd.f32 %v16479_v43, %v10442_v31  ;;  %v10443_v51 = vmax.f32 %v18010_v17, %v10411_v23  ;;  %v18029_v46 = vmax.f32 %v18027_v60, %v18028_v55 }
 0x54d   : > { %v10477_v19 = vadd.f32 %v16479_v43, %v10440_v63  ;;  %v10441_v5 = vmax.f32 %v18013_v61, %v10409_v18  ;;  %12934 = vmatprep.mubr.bf16.mxu1 %v10527_v15  ;;  %v13317_v63 = vld [vmem:[%s16764_s1 + $0xe8] sm:$0xff]   ;;  %v13319_v18 = vld [vmem:[%s16764_s1 + $0xf8] sm:$0xff]   ;;  %v13369_v15 = vmov 0.0  }
 0x54e   : > { %v10480_v44 = vadd.f32 %v16479_v43, %v10443_v51  ;;  %12935 = vmatmul.mubr.bf16.gmra.mrb[48].mxu1 %v10528_v14  ;;  %v10511_v42 = vmax.f32 %v10479_v21, 0.0 }
 0x54f   : > { %v10478_v58 = vadd.f32 %v16479_v43, %v10441_v5  ;;  %v12896_v0 = vpop.f32.mrb[24].mxu1  ;;  %v10509_v57 = vmax.f32 %v10477_v19, 0.0 }
 0x550   : > { %v10512_v37 = vmax.f32 %v10480_v44, 0.0  ;;  %v10414_v28 = vmax.f32 %v18014_v7, %v12896_v0  ;;  %v10337_v62 = vpop.f32.mrb[25].mxu1 }
 0x551   : > { %v10510_v52 = vmax.f32 %v10478_v58, 0.0  ;;  %v10412_v40 = vmax.f32 %v18015_v53, %v10337_v62  ;;  %v12897_v16 = vpop.f32.mrb[26].mxu1 }
 0x552   : > { %v10530_v38 = vpack.c.bf16 %v10512_v37, %v10511_v42  ;;  %v10446_v13 = vmax.f32 %v18018_v3, %v10414_v28  ;;  %v10415_v22 = vmax.f32 %v18019_v35, %v12897_v16  ;;  %v10340_v48 = vpop.f32.mrb[27].mxu1 }
 0x553   : > { %v10444_v45 = vmax.f32 %v18022_v9, %v10412_v40  ;;  %v10413_v36 = vmax.f32 %v18023_v4, %v10340_v48  ;;  %v10529_v6 = vpack.c.bf16 %v10510_v52, %v10509_v57  ;;  %v11826_v4 = vld [vmem:[%s16765_s2 + $0x2] ss:$0 sm:$0xff] }
 0x554   : > { %v10483_v39 = vadd.f32 %v16479_v43, %v10446_v13  ;;  %v10447_v25 = vmax.f32 %v18026_v56, %v10415_v22 }
 0x555   : > { %v10481_v20 = vadd.f32 %v16479_v43, %v10444_v45  ;;  %v10445_v33 = vmax.f32 %v18029_v46, %v10413_v36  ;;  %12938 = vmatprep.mubr.bf16.mxu1 %v10529_v6 }
 0x556   : > { %v10484_v14 = vadd.f32 %v16479_v43, %v10447_v25  ;;  %12939 = vmatmul.mubr.bf16.gmra.mrb[52].mxu1 %v10530_v38  ;;  %v10515_v12 = vmax.f32 %v10483_v39, 0.0 }
 0x557   : > { %v10482_v26 = vadd.f32 %v16479_v43, %v10445_v33  ;;  %v10513_v31 = vmax.f32 %v10481_v20, 0.0  ;;  %v13315_v43 = vld [vmem:[%s16764_s1 + $0xd8] sm:$0xff]  }
 0x558   : > { %v10516_v11 = vmax.f32 %v10484_v14, 0.0  ;;  %12952 = vmatprep.subr.bf16.mxu1 %v13315_v43 }
 0x559   : > { %v10514_v47 = vmax.f32 %v10482_v26, 0.0  ;;  %12953 = vmatpush3.bf16.msra.mxu1 %v13315_v43 }
 0x55a   : > { %v10532_v23 = vpack.c.bf16 %v10516_v11, %v10515_v12  ;;  %12954 = vmatprep.subr.bf16.mxu1 %v13316_v32 }
 0x55b   : > { %v10531_v27 = vpack.c.bf16 %v10514_v47, %v10513_v31 }
 0x55d   : > { %12942 = vmatprep.mubr.bf16.mxu1 %v10531_v27  ;;  %12955 = vmatpush3.bf16.msra.mxu1 %v13316_v32 }
 0x55e   : > { %12943 = vmatmul.mubr.bf16.gmra.mrb[56].mxu1 %v10532_v23  ;;  %12956 = vmatprep.subr.bf16.mxu1 %v13317_v63 }
 0x561   : > { %12957 = vmatpush3.bf16.msra.mxu1 %v13317_v63 }
 0x562   : > { %12958 = vmatprep.subr.bf16.mxu1 %v13318_v34 }
 0x565   : > { %12959 = vmatpush3.bf16.msra.mxu1 %v13318_v34 }
 0x566   : > { %12960 = vmatprep.subr.bf16.mxu1 %v13319_v18 }
 0x569   : > { %12961 = vmatpush3.bf16.msra.mxu1 %v13319_v18 }
 0x56a   : > { %12970 = vmatprep.subr.bf16.mxu1 %v13369_v15 }
 0x5f9   : > { %v12916_v21 = vpop.f32.mrb[28].mxu1 }
 0x5fa   : > { %v10631_v30 = vpop.f32.mrb[29].mxu1 }
 0x5fb   : > { %v12917_v50 = vpop.f32.mrb[30].mxu1 }
 0x5fc   : > { %v10634_v17 = vpop.f32.mrb[31].mxu1 }
 0x601   : > { %v12920_v51 = vpop.f32.mrb[32].mxu1 }
 0x602   : > { %v10647_v19 = vpop.f32.mrb[33].mxu1 }
 0x603   : > { %v12921_v54 = vpop.f32.mrb[34].mxu1 }
 0x604   : > { %v16656_v2 = vpop.f32.mrb[35].mxu1 }
 0x609   : > { %v12924_v61 = vpop.f32.mrb[36].mxu1 }
 0x60a   : > { %v10760_v5 = vmax.f32 %v12916_v21, %v12924_v61  ;;  %v10663_v44 = vpop.f32.mrb[37].mxu1 }
 0x60b   : > { %v10758_v58 = vmax.f32 %v10631_v30, %v10663_v44  ;;  %v12925_v0 = vpop.f32.mrb[38].mxu1 }
 0x60c   : > { %v10761_v42 = vmax.f32 %v12917_v50, %v12925_v0  ;;  %v10666_v37 = vpop.f32.mrb[39].mxu1  ;;  %v13320_v50 = vld [vmem:[%s16764_s1 + $0x100] sm:$0xff]  }
 0x60d   : > { %v10759_v7 = vmax.f32 %v10634_v17, %v10666_v37 }
 0x611   : > { %v12928_v28 = vpop.f32.mrb[40].mxu1 }
 0x612   : > { %v10764_v62 = vmax.f32 %v12920_v51, %v12928_v28  ;;  %v10679_v57 = vpop.f32.mrb[41].mxu1  ;;  %v13322_v28 = vld [vmem:[%s16764_s1 + $0x110] sm:$0xff]  }
 0x613   : > { %v10762_v52 = vmax.f32 %v10647_v19, %v10679_v57  ;;  %v12929_v53 = vpop.f32.mrb[42].mxu1  ;;  %v13324_v57 = vld [vmem:[%s16764_s1 + $0x120] sm:$0xff]  }
 0x614   : > { %v10765_v40 = vmax.f32 %v12921_v54, %v12929_v53  ;;  %v10682_v16 = vpop.f32.mrb[43].mxu1  ;;  %v13326_v53 = vld [vmem:[%s16764_s1 + $0x130] sm:$0xff]  }
 0x615   : > { %v10763_v38 = vmax.f32 %v16656_v2, %v10682_v16 }
 0x619   : > { %v12932_v49 = vpop.f32.mrb[44].mxu1 }
 0x61a   : > { %v10695_v8 = vpop.f32.mrb[45].mxu1 }
 0x61b   : > { %v12933_v3 = vpop.f32.mrb[46].mxu1 }
 0x61c   : > { %v10698_v13 = vpop.f32.mrb[47].mxu1 }
 0x621   : > { %v12936_v35 = vpop.f32.mrb[48].mxu1 }
 0x622   : > { %v10711_v22 = vpop.f32.mrb[49].mxu1 }
 0x623   : > { %v12937_v48 = vpop.f32.mrb[50].mxu1 }
 0x624   : > { %v10714_v41 = vpop.f32.mrb[51].mxu1 }
 0x629   : > { %v12940_v1 = vpop.f32.mrb[52].mxu1 }
 0x62a   : > { %v10768_v9 = vmax.f32 %v12932_v49, %v12940_v1  ;;  %v10727_v45 = vpop.f32.mrb[53].mxu1  ;;  %v11835_v1 = vld [vmem:[%s16765_s2 + $0x3] ss:$0 sm:$0xff] }
 0x62b   : > { %v10766_v36 = vmax.f32 %v10695_v8, %v10727_v45  ;;  %v12941_v6 = vpop.f32.mrb[54].mxu1 }
 0x62c   : > { %v10776_v39 = vmax.f32 %v10760_v5, %v10768_v9  ;;  %v10769_v10 = vmax.f32 %v12933_v3, %v12941_v6  ;;  %v10730_v59 = vpop.f32.mrb[55].mxu1  ;;  %v13321_v5 = vld [vmem:[%s16764_s1 + $0x108] sm:$0xff]  }
 0x62d   : > { %v10774_v56 = vmax.f32 %v10758_v58, %v10766_v36  ;;  %v10767_v25 = vmax.f32 %v10698_v13, %v10730_v59 }
 0x62e   : > { %v10789_v20 = vadd.f32 %v11826_v4, %v10776_v39  ;;  %v10777_v60 = vmax.f32 %v10761_v42, %v10769_v10 }
 0x62f   : > { %v10787_v55 = vadd.f32 %v11826_v4, %v10774_v56  ;;  %v10775_v46 = vmax.f32 %v10759_v7, %v10767_v25  ;;  %v13328_v56 = vld [vmem:[%s16764_s1 + $0x140] sm:$0xff]  }
 0x630   : > { %v10790_v33 = vadd.f32 %v11826_v4, %v10777_v60  ;;  %v10797_v12 = vmax.f32 %v10789_v20, 0.0  ;;  %v13329_v20 = vld [vmem:[%s16764_s1 + $0x148] sm:$0xff]   ;;  %v13330_v60 = vld [vmem:[%s16764_s1 + $0x150] sm:$0xff]  }
 0x631   : > { %v10788_v14 = vadd.f32 %v11826_v4, %v10775_v46  ;;  %v12944_v26 = vpop.f32.mrb[56].mxu1  ;;  %v10795_v23 = vmax.f32 %v10787_v55, 0.0  ;;  %v13331_v55 = vld [vmem:[%s16764_s1 + $0x158] sm:$0xff]   ;;  %v13332_v46 = vld [vmem:[%s16764_s1 + $0x160] sm:$0xff]  }
 0x632   : > { %v10798_v11 = vmax.f32 %v10790_v33, 0.0  ;;  %v10772_v31 = vmax.f32 %v12936_v35, %v12944_v26  ;;  %v10743_v47 = vpop.f32.mrb[57].mxu1  ;;  %v13333_v33 = vld [vmem:[%s16764_s1 + $0x168] sm:$0xff]   ;;  %v13335_v26 = vld [vmem:[%s16764_s1 + $0x178] sm:$0xff]  }
 0x633   : > { %v10796_v27 = vmax.f32 %v10788_v14, 0.0  ;;  %v10770_v24 = vmax.f32 %v10711_v22, %v10743_v47  ;;  %v12945_v29 = vpop.f32.mrb[58].mxu1  ;;  %v13334_v14 = vld [vmem:[%s16764_s1 + $0x170] sm:$0xff]  }
 0x634   : > { %v10804_v43 = vpack.c.bf16 %v10798_v11, %v10797_v12  ;;  %v10780_v32 = vmax.f32 %v10764_v62, %v10772_v31  ;;  %v10773_v63 = vmax.f32 %v12937_v48, %v12945_v29  ;;  %v10746_v34 = vpop.f32.mrb[59].mxu1  ;;  %v13323_v62 = vld [vmem:[%s16764_s1 + $0x118] sm:$0xff]   ;;  %v11836_v12 = vld [vmem:[%s16765_s2 + $0x4] ss:$0 sm:$0xff] }
 0x635   : > { %v10778_v18 = vmax.f32 %v10762_v52, %v10770_v24  ;;  %v10771_v21 = vmax.f32 %v10714_v41, %v10746_v34  ;;  %v10803_v30 = vpack.c.bf16 %v10796_v27, %v10795_v23  ;;  %v13325_v52 = vld [vmem:[%s16764_s1 + $0x128] sm:$0xff]   ;;  %v11064_v29 = vld [vmem:[%s4378_s26] sm:$0xff] }
 0x636   : > { %v10793_v17 = vadd.f32 %v11826_v4, %v10780_v32  ;;  %v10781_v51 = vmax.f32 %v10765_v40, %v10773_v63  ;;  %v13327_v40 = vld [vmem:[%s16764_s1 + $0x138] sm:$0xff]  }
 0x637   : > { %v10791_v19 = vadd.f32 %v11826_v4, %v10778_v18  ;;  %v10779_v54 = vmax.f32 %v10763_v38, %v10771_v21  ;;  %12962 = vmatprep.mubr.bf16.mxu1 %v10803_v30  ;;  %v11845_v21 = vld [vmem:[%s16765_s2 + $0x5] ss:$0 sm:$0xff] }
 0x638   : > { %v10794_v2 = vadd.f32 %v11826_v4, %v10781_v51  ;;  %12963 = vmatmul.mubr.bf16.vlgmr.msra.gmra.mrb[60].mxu1 %v10804_v43  ;;  %v10801_v44 = vmax.f32 %v10793_v17, 0.0  ;;  %v11065_v43 = vld [vmem:[%s4378_s26 + $0x8] sm:$0xff] }
 0x639   : > { %v10792_v61 = vadd.f32 %v11826_v4, %v10779_v54  ;;  %12971 = vmatpush3.bf16.msra.mxu1 %v13320_v50  ;;  %v10799_v0 = vmax.f32 %v10791_v19, 0.0 }
 0x63a   : > { %v10802_v58 = vmax.f32 %v10794_v2, 0.0  ;;  %12972 = vmatprep.subr.bf16.mxu1 %v13369_v15 }
 0x63b   : > { %v10800_v42 = vmax.f32 %v10792_v61, 0.0 }
 0x63c   : > { %v10806_v37 = vpack.c.bf16 %v10802_v58, %v10801_v44 }
 0x63d   : > { %v10805_v7 = vpack.c.bf16 %v10800_v42, %v10799_v0  ;;  %12973 = vmatpush3.bf16.msra.mxu1 %v13321_v5 }
 0x63e   : > { %12974 = vmatprep.subr.bf16.mxu1 %v13369_v15 }
 0x63f   : > { %12966 = vmatprep.mubr.bf16.mxu1 %v10805_v7 }
 0x640   : > { %12967 = vmatmul.mubr.bf16.gmra.mrb[64].mxu1 %v10806_v37 }
 0x641   : > { %12975 = vmatpush3.bf16.msra.mxu1 %v13322_v28  ;;  %12986 = vmatprep.mubr.msk.bf16.mxu1 %vm13370_vm2, %v13369_v15 }
 0x642   : > { %12976 = vmatprep.subr.bf16.mxu1 %v13369_v15 }
 0x645   : > { %12977 = vmatpush3.bf16.msra.mxu1 %v13323_v62 }
 0x646   : > { %12978 = vmatprep.subr.bf16.mxu1 %v13369_v15 }
 0x649   : > { %12979 = vmatpush3.bf16.msra.mxu1 %v13324_v57 }
 0x64a   : > { %12980 = vmatprep.subr.bf16.mxu1 %v13369_v15 }
 0x64d   : > { %12981 = vmatpush3.bf16.msra.mxu1 %v13325_v52 }
 0x64e   : > { %12982 = vmatprep.subr.bf16.mxu1 %v13369_v15 }
 0x651   : > { %12983 = vmatpush3.bf16.msra.mxu1 %v13326_v53 }
 0x652   : > { %12984 = vmatprep.subr.bf16.mxu1 %v13369_v15 }
 0x655   : > { %12985 = vmatpush3.bf16.msra.mxu1 %v13327_v40 }
 0x656   : > { %12990 = vmatprep.subr.bf16.mxu1 %v13369_v15 }
 0x70b   : > { %v12964_v16 = vpop.f32.mrb[60].mxu1 }
 0x70c   : > { %v10905_v38 = vpop.f32.mrb[61].mxu1 }
 0x70d   : > { %v10936_v49 = vmax.f32 %v10905_v38, %v12964_v16  ;;  %v12965_v8 = vpop.f32.mrb[62].mxu1 }
 0x70e   : > { %v10908_v3 = vpop.f32.mrb[63].mxu1 }
 0x70f   : > { %v10937_v13 = vmax.f32 %v10908_v3, %v12965_v8 }
 0x713   : > { %v12968_v35 = vpop.f32.mrb[64].mxu1 }
 0x714   : > { %v10921_v22 = vpop.f32.mrb[65].mxu1 }
 0x715   : > { %v10938_v48 = vmax.f32 %v10921_v22, %v12968_v35  ;;  %v12969_v41 = vpop.f32.mrb[66].mxu1 }
 0x716   : > { %v10924_v9 = vpop.f32.mrb[67].mxu1 }
 0x717   : > { %v10940_v45 = vmax.f32 %v10936_v49, %v10938_v48  ;;  %v10939_v4 = vmax.f32 %v10924_v9, %v12969_v41 }
 0x719   : > { %v10947_v36 = vadd.f32 %v11835_v1, %v10940_v45  ;;  %v10941_v6 = vmax.f32 %v10937_v13, %v10939_v4 }
 0x71b   : > { %v10948_v39 = vadd.f32 %v11835_v1, %v10941_v6  ;;  %v10949_v10 = vmax.f32 %v10947_v36, 0.0 }
 0x71d   : > { %v10950_v59 = vmax.f32 %v10948_v39, 0.0 }
 0x71f   : > { %v10951_v25 = vpack.c.bf16 %v10950_v59, %v10949_v10 }
 0x721   : > { %12987 = vmatmul.mubr.bf16.vlgmr.msra.gmra.mrb[68].mxu1 %v10951_v25 }
 0x722   : > { %12991 = vmatpush3.bf16.msra.mxu1 %v13328_v56  ;;  %13006 = vmatprep.mubr.msk.bf16.mxu1 %vm13370_vm2, %v13369_v15 }
 0x723   : > { %12992 = vmatprep.subr.bf16.mxu1 %v13369_v15 }
 0x726   : > { %12993 = vmatpush3.bf16.msra.mxu1 %v13329_v20 }
 0x727   : > { %12994 = vmatprep.subr.bf16.mxu1 %v13369_v15 }
 0x72a   : > { %12995 = vmatpush3.bf16.msra.mxu1 %v13330_v60 }
 0x72b   : > { %12996 = vmatprep.subr.bf16.mxu1 %v13369_v15 }
 0x72e   : > { %12997 = vmatpush3.bf16.msra.mxu1 %v13331_v55 }
 0x72f   : > { %12998 = vmatprep.subr.bf16.mxu1 %v13369_v15 }
 0x732   : > { %12999 = vmatpush3.bf16.msra.mxu1 %v13332_v46 }
 0x733   : > { %13000 = vmatprep.subr.bf16.mxu1 %v13369_v15 }
 0x736   : > { %13001 = vmatpush3.bf16.msra.mxu1 %v13333_v33 }
 0x737   : > { %13002 = vmatprep.subr.bf16.mxu1 %v13369_v15 }
 0x73a   : > { %13003 = vmatpush3.bf16.msra.mxu1 %v13334_v14 }
 0x73b   : > { %13004 = vmatprep.subr.bf16.mxu1 %v13369_v15 }
 0x73e   : > { %13005 = vmatpush3.bf16.msra.mxu1 %v13335_v26 }
 0x7f4   : > { %v11055_v11 = vpop.f32.mrb[68].mxu1 }
 0x7f5   : > { %v11056_v15 = vadd.f32 %v11836_v12, %v11055_v11  ;;  %v12988_v31 = vpop.f32.mrb[69].mxu1 }
 0x7f6   : > { %v11058_v47 = vpop.f32.mrb[70].mxu1 }
 0x7f7   : > { %v11062_v23 = vmax.f32 %v11056_v15, 0.0  ;;  %v11059_v27 = vadd.f32 %v11836_v12, %v11058_v47  ;;  %v12989_v24 = vpop.f32.mrb[71].mxu1 }
 0x7f9   : > { %v11063_v32 = vmax.f32 %v11059_v27, 0.0  ;;  %v11066_v63 = vmul.f32 %v11064_v29, %v11062_v23 }
 0x7fb   : > { %v11067_v34 = vmul.f32 %v11065_v43, %v11063_v32 }
 0x7fd   : > { %v11068_v18 = vpack.c.bf16 %v11067_v34, %v11066_v63 }
 0x7ff   : > { %13007 = vmatmul.mubr.bf16.vlgmr.msra.gmra.mrb[72].mxu1 %v11068_v18 }
 0x8d2   : > { %v11172_v30 = vpop.f32.mrb[72].mxu1 }
 0x8d3   : > { %v11173_v50 = vadd.f32 %v11845_v21, %v11172_v30  ;;  %v13008_v17 = vpop.f32.mrb[73].mxu1 }
 0x8d4   : > { %v11175_v51 = vpop.f32.mrb[74].mxu1 }
 0x8d5   : > { %11179 = vmax.xlane.f32.xlu0 %v11173_v50  ;;  %v13009_v19 = vpop.f32.mrb[75].mxu1  ;;  %v11176_v54 = vadd.f32 %v11845_v21, %v11175_v51 }
 0x8d9   : > { %11181 = vmax.xlane.f32.xlu0 %v11176_v54 }
 0x962   : > { %v11180_v2 = vpop.xlane.xlu0 %11179 }
 0x963   : > { %v11183_v61 = vsub.f32 %v11173_v50, %v11180_v2 }
 0x965   : > { %v11185_v5 = vmul.f32 1.442695, %v11183_v61 }
 0x966   : > { %v11182_v44 = vpop.xlane.xlu0 %11181 }
 0x967   : > { %v11184_v58 = vsub.f32 %v11176_v54, %v11182_v44  ;;  %13336 = vpow2.f32 %v11185_v5 }
 0x969   : > { %v11187_v0 = vmul.f32 1.442695, %v11184_v58 }
 0x96b   : > { %13338 = vpow2.f32 %v11187_v0 }
 0x971   : > { %v13337_v42 = vpop.eup %13336 }
 0x972   : > { %11189 = vadd.xlane.f32.xlu1 %v13337_v42 }
 0x975   : > { %v13339_v37 = vpop.eup %13338 }
 0x976   : > { %11191 = vadd.xlane.f32.xlu1 %v13339_v37 }
 0x9ff   : > { %v11190_v7 = vpop.xlane.xlu1 %11189 }
 0xa00   : > { %13340 = vlog2.f32 %v11190_v7 }
 0xa03   : > { %v11192_v28 = vpop.xlane.xlu1 %11191 }
 0xa04   : > { %13342 = vlog2.f32 %v11192_v28 }
 0xa0a   : > { %v13341_v62 = vpop.eup %13340 }
 0xa0b   : > { %v11194_v57 = vmul.f32 0.6931472, %v13341_v62 }
 0xa0d   : > { %v11197_v52 = vsub.f32 %v11183_v61, %v11194_v57 }
 0xa0e   : > { %v13343_v53 = vpop.eup %13342 }
 0xa0f   : > { %11199 = vst [vmem:[%s4384_s29] sm:$0xff] %v11197_v52  ;;  %v11196_v40 = vmul.f32 0.6931472, %v13343_v53 }
 0xa11   : > { %v11198_v16 = vsub.f32 %v11184_v58, %v11196_v40 }
 0xa13   : > { %11200 = vst [vmem:[%s4384_s29 + $0x8] sm:$0xff] %v11198_v16 }
 0xa14 PF: > { %p11_p9 = scmp.ge.s32.totalorder %s13413_s19, 4   ;;  %s18030_s15 = smov %s13363_s16 }
 0xa15   : > { %s18031_s16 = smov %s13422_s22  ;;  %s18032_s17 = smov %s13413_s19 }
 0xa16   :  { %13 = sbr.rel (!%p11_p9) target bundleno = 2 (0x2), region = 130 }

</bundles_post_ra>
